<compile_context>
chip_gen: v5e
topology: v5e:2x2
jax: 0.10.0
libtpu: 0.0.40
codegen_flags: <defaults>
</compile_context>

<pallas_src>
import math
from functools import partial

import jax
import jax.numpy as jnp
from jax import lax
from jax.experimental import pallas as pl
from jax.experimental.pallas import tpu as pltpu


# ---------------------------------------------------------------------------
# Fused encoder kernel
# ---------------------------------------------------------------------------
def _encoder_kernel(x_ref, wembt_ref, pe_ref,
                    wq_ref, wk_ref, wv_ref, wot_ref, bo_ref,
                    g1_ref, be1_ref, w1t_ref, b1_ref, w2t_ref, b2_ref,
                    g2_ref, be2_ref, o_ref,
                    *, batch, seq_len, embed_dim, n_heads, eps):
    E = embed_dim
    H = n_heads
    dh = E // H
    S = seq_len
    B = batch
    e_pad = o_ref.shape[-1]
    num_layers = wq_ref.shape[0]
    inv_e = 1.0 / E
    bf16 = jnp.bfloat16

    # Lane-validity mask: only the first E of the e_pad feature lanes are real.
    lane_mask = (lax.broadcasted_iota(jnp.int32, (1, e_pad), 1) < E).astype(jnp.float32)

    def layer_norm(y, g, b):
        # mean/var over the E valid lanes (padded lanes hold exact zeros)
        mu = jnp.sum(y, axis=-1, keepdims=True) * inv_e
        yc = (y - mu) * lane_mask
        var = jnp.sum(yc * yc, axis=-1, keepdims=True) * inv_e
        # gamma/beta are zero-padded, so padded lanes come out exactly 0 again
        return yc * lax.rsqrt(var + eps) * g + b

    def split_heads(t):                       # (B*S, E) -> (H*B, S, dh)
        t = t.reshape(B * S, H, dh)
        t = jnp.transpose(t, (1, 0, 2))       # (H, B*S, dh)
        return t.reshape(H * B, S, dh)

    def merge_heads(t):                       # (H*B, S, dh) -> (B*S, E)
        t = t.reshape(H, B * S, dh)
        t = jnp.transpose(t, (1, 0, 2))       # (B*S, H, dh)
        return t.reshape(B * S, E)

    # ---- embedding linear + positional encoding ------------------------------
    # TODO(synk): all nn.Dropout layers (p=0.1 on PE, p=0.2 in blocks) are identity
    #             in eval mode; stochastic masking is not implemented.
    # pe_ref already contains the embedding bias (folded at pack time).
    h0 = jnp.dot(x_ref[...], wembt_ref[...], preferred_element_type=jnp.float32)
    h0 = h0 + pe_ref[...]                                    # (B*S, Ep) f32

    # ---- transformer blocks ---------------------------------------------------
    def one_layer(li, h):
        hb = h.astype(bf16)
        # block-diagonal per-head Q/K/V projections as dense MXU matmuls
        # (1/sqrt(dh) already folded into the packed Q weights)
        q = jnp.dot(hb, wq_ref[li], preferred_element_type=jnp.float32)   # (B*S, E)
        k = jnp.dot(hb, wk_ref[li], preferred_element_type=jnp.float32)
        v = jnp.dot(hb, wv_ref[li], preferred_element_type=jnp.float32)

        # batched scaled-dot-product attention over merged (head, batch) axis
        qz = split_heads(q).astype(bf16)                     # (H*B, S, dh)
        kz = split_heads(k).astype(bf16)
        vz = split_heads(v).astype(bf16)
        s = jnp.einsum('zqd,zkd->zqk', qz, kz,
                       preferred_element_type=jnp.float32)   # (H*B, S, S) f32
        m = jnp.max(s, axis=-1, keepdims=True)
        p = jnp.exp(s - m)
        p = p * pl.reciprocal(jnp.sum(p, axis=-1, keepdims=True), approx=True)
        ctx = jnp.einsum('zqk,zkd->zqd', p.astype(bf16), vz,
                         preferred_element_type=jnp.float32)  # (H*B, S, dh) f32
        ctx = merge_heads(ctx)                                # (B*S, E) f32

        # output projection + residual + LayerNorm1
        attn = jnp.dot(ctx.astype(bf16), wot_ref[li],
                       preferred_element_type=jnp.float32) + bo_ref[li]
        n1 = layer_norm(attn + h, g1_ref[li], be1_ref[li])

        # feed forward + residual + LayerNorm2
        ffh = jnp.dot(n1.astype(bf16), w1t_ref[li],
                      preferred_element_type=jnp.float32) + b1_ref[li]
        ffh = jnp.maximum(ffh, 0.0)
        ff = jnp.dot(ffh.astype(bf16), w2t_ref[li],
                     preferred_element_type=jnp.float32) + b2_ref[li]
        return layer_norm(ff + n1, g2_ref[li], be2_ref[li])

    # TODO(synk): for deep stacks switch to unroll=False or a layer grid axis
    #             (all-layer weight residency will not survive v7x's 64 MiB VMEM
    #             at realistic E/F/L); fine at num_layers=2.
    o_ref[...] = lax.fori_loop(0, num_layers, one_layer, h0, unroll=True)


def transformer_encoder(x, packed, *, embed_dim, n_heads):
    """Single fused pallas_call for the full encoder forward pass."""
    B, S, In = x.shape
    in_pad, e_pad = packed['wembt'].shape

    # lane-dense input: pad feature dim to 128, cast to bf16 (matmul operand)
    x2 = jnp.pad(x.reshape(B * S, In), ((0, 0), (0, in_pad - In))).astype(jnp.bfloat16)

    inputs = (x2, packed['wembt'], packed['pe'],
              packed['wq'], packed['wk'], packed['wv'], packed['wot'], packed['bo'],
              packed['g1'], packed['be1'], packed['w1t'], packed['b1'],
              packed['w2t'], packed['b2'], packed['g2'], packed['be2'])

    # Intentional VMEM residency: size the scoped limit from the actual footprint.
    out_bytes = B * S * e_pad * 4
    footprint = sum(int(a.size) * a.dtype.itemsize for a in inputs) + out_bytes
    vmem_limit = int(min(100 * (1 << 20), max(32 * (1 << 20), 2 * footprint + (8 << 20))))

    vmem_spec = pl.BlockSpec(memory_space=pltpu.MemorySpace.VMEM)
    kernel = partial(_encoder_kernel, batch=B, seq_len=S,
                     embed_dim=embed_dim, n_heads=n_heads, eps=1e-5)
    out_pad = pl.pallas_call(
        kernel,
        out_shape=jax.ShapeDtypeStruct((B * S, e_pad), jnp.float32),
        in_specs=[vmem_spec] * len(inputs),
        out_specs=vmem_spec,
        compiler_params=pltpu.CompilerParams(vmem_limit_bytes=vmem_limit),
    )(*inputs)
    return out_pad[:, :embed_dim].reshape(B, S, embed_dim)


# ---------------------------------------------------------------------------
# One-time parameter packing: transpose, pad feature dims to 128 lanes, cast
# matmul weights to bf16, build block-diagonal per-head projections (with the
# softmax scale folded into Q), fold the embedding bias into the PE slab,
# and stack per-layer weights.
# NOTE: all padded lanes/rows are exact zeros (jnp.pad) — LayerNorm correctness
#       relies on this invariant (mean/var divide by E, not e_pad).
# ---------------------------------------------------------------------------
def _round_up(n, m):
    return ((n + m - 1) // m) * m


def pack_params(params, pe, *, n_heads, batch):
    E, In = params['embed_w'].shape
    F = params['layers'][0]['w1'].shape[0]
    dh = E // n_heads
    e_pad = _round_up(E, 128)
    f_pad = _round_up(F, 128)
    in_pad = _round_up(In, 128)
    scale = 1.0 / math.sqrt(dh)
    eye = jnp.eye(n_heads, dtype=jnp.float32)
    bf16 = jnp.bfloat16

    def pad_cols(a, n):
        return jnp.pad(a, [(0, 0)] * (a.ndim - 1) + [(0, n - a.shape[-1])])

    def pad_rows(a, n):
        return jnp.pad(a, [(0, 0)] * (a.ndim - 2) + [(0, n - a.shape[-2]), (0, 0)])

    def stack(fn, dtype=jnp.float32):
        return jnp.stack([fn(lp) for lp in params['layers']]).astype(dtype)

    return {
        # embedding (bf16 weights) + positional encoding with embedding bias folded in
        'wembt': pad_rows(pad_cols(params['embed_w'].T, e_pad), in_pad).astype(bf16),
        'pe': (jnp.tile(pad_cols(pe, e_pad), (batch, 1))
               + pad_cols(params['embed_b'].reshape(1, E), e_pad)),          # (B*S, Ep) f32
        # attention: block-diag per-head projections (weight shared across heads), bf16
        'wq': stack(lambda lp: pad_rows(jnp.kron(eye, lp['wq'].T * scale), e_pad), bf16),
        'wk': stack(lambda lp: pad_rows(jnp.kron(eye, lp['wk'].T), e_pad), bf16),
        'wv': stack(lambda lp: pad_rows(jnp.kron(eye, lp['wv'].T), e_pad), bf16),
        'wot': stack(lambda lp: pad_cols(lp['wo'].T, e_pad), bf16),          # (L, E, Ep)
        'bo': stack(lambda lp: pad_cols(lp['bo'].reshape(1, E), e_pad)),
        # layer norms (gamma/beta zero-padded so padded lanes stay exactly 0), f32
        'g1': stack(lambda lp: pad_cols(lp['ln1_g'].reshape(1, E), e_pad)),
        'be1': stack(lambda lp: pad_cols(lp['ln1_b'].reshape(1, E), e_pad)),
        'g2': stack(lambda lp: pad_cols(lp['ln2_g'].reshape(1, E), e_pad)),
        'be2': stack(lambda lp: pad_cols(lp['ln2_b'].reshape(1, E), e_pad)),
        # feed forward (bf16 weights, f32 biases)
        'w1t': stack(lambda lp: pad_rows(pad_cols(lp['w1'].T, f_pad), e_pad), bf16),
        'b1': stack(lambda lp: pad_cols(lp['b1'].reshape(1, F), f_pad)),
        'w2t': stack(lambda lp: pad_cols(pad_rows(lp['w2'].T, f_pad), e_pad), bf16),
        'b2': stack(lambda lp: pad_cols(lp['b2'].reshape(1, E), e_pad)),
    }


# ---------------------------------------------------------------------------
# Parameter init (deterministic, synthetic) + sinusoidal positional encoding
# ---------------------------------------------------------------------------
def make_positional_encoding(seq_len, embed_dim):
    pos = jnp.arange(seq_len, dtype=jnp.float32)[:, None]
    div = jnp.exp(jnp.arange(0, embed_dim, 2, dtype=jnp.float32)
                  * (-math.log(10000.0) / embed_dim))
    pe = jnp.zeros((seq_len, embed_dim), dtype=jnp.float32)
    pe = pe.at[:, 0::2].set(jnp.sin(pos * div))
    pe = pe.at[:, 1::2].set(jnp.cos(pos * div))
    return pe


def init_params(key, input_size, embed_dim, n_heads, expansion_factor, num_layers):
    dh = embed_dim // n_heads
    ff = expansion_factor * embed_dim
    keys = jax.random.split(key, 2 + num_layers)
    params = {
        'embed_w': 0.05 * jax.random.normal(keys[0], (embed_dim, input_size), jnp.float32),
        'embed_b': 0.05 * jax.random.normal(keys[1], (embed_dim,), jnp.float32),
        'layers': [],
    }
    for li in range(num_layers):
        ks = jax.random.split(keys[2 + li], 8)
        params['layers'].append({
            'wq': 0.1 * jax.random.normal(ks[0], (dh, dh), jnp.float32),
            'wk': 0.1 * jax.random.normal(ks[1], (dh, dh), jnp.float32),
            'wv': 0.1 * jax.random.normal(ks[2], (dh, dh), jnp.float32),
            'wo': 0.05 * jax.random.normal(ks[3], (embed_dim, embed_dim), jnp.float32),
            'bo': 0.05 * jax.random.normal(ks[4], (embed_dim,), jnp.float32),
            'ln1_g': jnp.ones((embed_dim,), jnp.float32),
            'ln1_b': jnp.zeros((embed_dim,), jnp.float32),
            'w1': 0.05 * jax.random.normal(ks[5], (ff, embed_dim), jnp.float32),
            'b1': 0.05 * jax.random.normal(ks[6], (ff,), jnp.float32),
            'w2': 0.05 * jax.random.normal(ks[7], (embed_dim, ff), jnp.float32),
            'b2': jnp.zeros((embed_dim,), jnp.float32),
            'ln2_g': jnp.ones((embed_dim,), jnp.float32),
            'ln2_b': jnp.zeros((embed_dim,), jnp.float32),
        })
    return params


# ---------------------------------------------------------------------------
# Pure-JAX reference (same semantics, full f32) for validation
# ---------------------------------------------------------------------------
def _layer_norm_ref(y, g, b, eps=1e-5):
    mu = jnp.mean(y, axis=-1, keepdims=True)
    var = jnp.mean(jnp.square(y - mu), axis=-1, keepdims=True)
    return (y - mu) * lax.rsqrt(var + eps) * g + b


def encoder_reference(x, params, pe, *, n_heads):
    E = params['embed_w'].shape[0]
    dh = E // n_heads
    h = jnp.einsum('bsi,ei->bse', x, params['embed_w']) + params['embed_b']
    h = h + pe[None, :, :]
    for lp in params['layers']:
        B, S, _ = h.shape
        xh = h.reshape(B, S, n_heads, dh)
        q = jnp.einsum('bshd,ed->bshe', xh, lp['wq'])
        k = jnp.einsum('bshd,ed->bshe', xh, lp['wk'])
        v = jnp.einsum('bshd,ed->bshe', xh, lp['wv'])
        s = jnp.einsum('bqhe,bkhe->bhqk', q, k) / math.sqrt(dh)
        p = jax.nn.softmax(s, axis=-1)
        ctx = jnp.einsum('bhqk,bkhd->bqhd', p, v).reshape(B, S, E)
        attn = ctx @ lp['wo'].T + lp['bo']
        n1 = _layer_norm_ref(attn + h, lp['ln1_g'], lp['ln1_b'])
        ff = jnp.maximum(n1 @ lp['w1'].T + lp['b1'], 0.0) @ lp['w2'].T + lp['b2']
        h = _layer_norm_ref(ff + n1, lp['ln2_g'], lp['ln2_b'])
    return h


# ---------------------------------------------------------------------------
if __name__ == "__main__":
    B, S, INPUT_SIZE, EMBED_DIM = 2, 8, 16, 32
    N_HEADS, EXPANSION, NUM_LAYERS = 8, 4, 2

    key = jax.random.PRNGKey(0)
    kx, kp = jax.random.split(key)
    x = jax.random.normal(kx, (B, S, INPUT_SIZE), jnp.float32)

    params = init_params(kp, INPUT_SIZE, EMBED_DIM, N_HEADS, EXPANSION, NUM_LAYERS)
    pe = make_positional_encoding(S, EMBED_DIM)
    packed = pack_params(params, pe, n_heads=N_HEADS, batch=B)   # one-time packing

    out = transformer_encoder(x, packed, embed_dim=EMBED_DIM, n_heads=N_HEADS)
    out = jax.block_until_ready(out)
    assert out.shape == (B, S, EMBED_DIM) and out.dtype == jnp.float32

    ref = encoder_reference(x, params, pe, n_heads=N_HEADS)
    max_err = float(jnp.max(jnp.abs(out - ref)))
    assert max_err < 5e-2, f"kernel/reference mismatch: max abs err {max_err}"

    print("KERNEL_OK")
</pallas_src>

<mosaic_0001>
module attributes {stable_mosaic.version = 11 : i64} {
  func.func @_encoder_kernel(%arg0: memref<16x128xbf16, #tpu.memory_space<vmem>>, %arg1: memref<128x128xbf16, #tpu.memory_space<vmem>>, %arg2: memref<16x128xf32, #tpu.memory_space<vmem>>, %arg3: memref<2x128x32xbf16, #tpu.memory_space<vmem>>, %arg4: memref<2x128x32xbf16, #tpu.memory_space<vmem>>, %arg5: memref<2x128x32xbf16, #tpu.memory_space<vmem>>, %arg6: memref<2x32x128xbf16, #tpu.memory_space<vmem>>, %arg7: memref<2x1x128xf32, #tpu.memory_space<vmem>>, %arg8: memref<2x1x128xf32, #tpu.memory_space<vmem>>, %arg9: memref<2x1x128xf32, #tpu.memory_space<vmem>>, %arg10: memref<2x128x128xbf16, #tpu.memory_space<vmem>>, %arg11: memref<2x1x128xf32, #tpu.memory_space<vmem>>, %arg12: memref<2x128x128xbf16, #tpu.memory_space<vmem>>, %arg13: memref<2x1x128xf32, #tpu.memory_space<vmem>>, %arg14: memref<2x1x128xf32, #tpu.memory_space<vmem>>, %arg15: memref<2x1x128xf32, #tpu.memory_space<vmem>>, %arg16: memref<16x128xf32, #tpu.memory_space<vmem>>) attributes {dimension_semantics = [], scalar_prefetch = 0 : i64, scratch_operands = 0 : i64, tpu.core_type = #tpu.core_type<tc>} {
    %0 = tpu.iota {dimensions = array<i32: 1>} : vector<1x128xi32>
    %c32_i32 = arith.constant 32 : i32
    %1 = vector.broadcast %c32_i32 : i32 to vector<1x128xi32>
    %2 = arith.cmpi slt, %0, %1 : vector<1x128xi32>
    %3 = arith.extui %2 : vector<1x128xi1> to vector<1x128xi32>
    %4 = arith.sitofp %3 : vector<1x128xi32> to vector<1x128xf32>
    %c0 = arith.constant 0 : index
    %c0_0 = arith.constant 0 : index
    %5 = vector.load %arg0[%c0, %c0_0] : memref<16x128xbf16, #tpu.memory_space<vmem>>, vector<16x128xbf16>
    %c0_1 = arith.constant 0 : index
    %c0_2 = arith.constant 0 : index
    %6 = vector.load %arg1[%c0_1, %c0_2] : memref<128x128xbf16, #tpu.memory_space<vmem>>, vector<128x128xbf16>
    %cst = arith.constant dense<0.000000e+00> : vector<16x128xf32>
    %7 = tpu.matmul %5, %6, %cst {dimension_numbers = #tpu.dot_dimension_numbers<[1], [0], [0], [1], [0, 0, 1, 1], [], []>} : vector<16x128xbf16>, vector<128x128xbf16>, vector<16x128xf32> -> vector<16x128xf32>
    %c0_3 = arith.constant 0 : index
    %c0_4 = arith.constant 0 : index
    %8 = vector.load %arg2[%c0_3, %c0_4] : memref<16x128xf32, #tpu.memory_space<vmem>>, vector<16x128xf32>
    %9 = arith.addf %7, %8 : vector<16x128xf32>
    %c0_i32 = arith.constant 0 : i32
    %10 = arith.truncf %9 : vector<16x128xf32> to vector<16x128xbf16>
    %11 = arith.index_cast %c0_i32 : i32 to index
    %c0_5 = arith.constant 0 : index
    %c0_6 = arith.constant 0 : index
    %12 = vector.load %arg3[%11, %c0_5, %c0_6] : memref<2x128x32xbf16, #tpu.memory_space<vmem>>, vector<1x128x32xbf16>
    %13 = vector.shape_cast %12 : vector<1x128x32xbf16> to vector<128x32xbf16>
    %cst_7 = arith.constant dense<0.000000e+00> : vector<16x32xf32>
    %14 = tpu.matmul %10, %13, %cst_7 {dimension_numbers = #tpu.dot_dimension_numbers<[1], [0], [0], [1], [0, 0, 1, 1], [], []>} : vector<16x128xbf16>, vector<128x32xbf16>, vector<16x32xf32> -> vector<16x32xf32>
    %15 = arith.index_cast %c0_i32 : i32 to index
    %c0_8 = arith.constant 0 : index
    %c0_9 = arith.constant 0 : index
    %16 = vector.load %arg4[%15, %c0_8, %c0_9] : memref<2x128x32xbf16, #tpu.memory_space<vmem>>, vector<1x128x32xbf16>
    %17 = vector.shape_cast %16 : vector<1x128x32xbf16> to vector<128x32xbf16>
    %cst_10 = arith.constant dense<0.000000e+00> : vector<16x32xf32>
    %18 = tpu.matmul %10, %17, %cst_10 {dimension_numbers = #tpu.dot_dimension_numbers<[1], [0], [0], [1], [0, 0, 1, 1], [], []>} : vector<16x128xbf16>, vector<128x32xbf16>, vector<16x32xf32> -> vector<16x32xf32>
    %19 = arith.index_cast %c0_i32 : i32 to index
    %c0_11 = arith.constant 0 : index
    %c0_12 = arith.constant 0 : index
    %20 = vector.load %arg5[%19, %c0_11, %c0_12] : memref<2x128x32xbf16, #tpu.memory_space<vmem>>, vector<1x128x32xbf16>
    %21 = vector.shape_cast %20 : vector<1x128x32xbf16> to vector<128x32xbf16>
    %cst_13 = arith.constant dense<0.000000e+00> : vector<16x32xf32>
    %22 = tpu.matmul %10, %21, %cst_13 {dimension_numbers = #tpu.dot_dimension_numbers<[1], [0], [0], [1], [0, 0, 1, 1], [], []>} : vector<16x128xbf16>, vector<128x32xbf16>, vector<16x32xf32> -> vector<16x32xf32>
    %23 = vector.shape_cast %14 : vector<16x32xf32> to vector<16x8x4xf32>
    %24 = tpu.transpose %23, [1, 0, 2] : vector<16x8x4xf32> -> vector<8x16x4xf32>
    %25 = vector.shape_cast %24 : vector<8x16x4xf32> to vector<16x8x4xf32>
    %26 = arith.truncf %25 : vector<16x8x4xf32> to vector<16x8x4xbf16>
    %27 = vector.shape_cast %18 : vector<16x32xf32> to vector<16x8x4xf32>
    %28 = tpu.transpose %27, [1, 0, 2] : vector<16x8x4xf32> -> vector<8x16x4xf32>
    %29 = vector.shape_cast %28 : vector<8x16x4xf32> to vector<16x8x4xf32>
    %30 = arith.truncf %29 : vector<16x8x4xf32> to vector<16x8x4xbf16>
    %31 = vector.shape_cast %22 : vector<16x32xf32> to vector<16x8x4xf32>
    %32 = tpu.transpose %31, [1, 0, 2] : vector<16x8x4xf32> -> vector<8x16x4xf32>
    %33 = vector.shape_cast %32 : vector<8x16x4xf32> to vector<16x8x4xf32>
    %34 = arith.truncf %33 : vector<16x8x4xf32> to vector<16x8x4xbf16>
    "tpu.trace_start"() <{level = 10 : i32, message = "zqd,zkd->zqk"}> : () -> ()
    %cst_14 = arith.constant dense<0.000000e+00> : vector<16x8x8xf32>
    %35 = tpu.matmul %26, %30, %cst_14 {dimension_numbers = #tpu.dot_dimension_numbers<[2], [2], [1], [1], [0, 0, 0, 1, 1, 1], [0], [0]>} : vector<16x8x4xbf16>, vector<16x8x4xbf16>, vector<16x8x8xf32> -> vector<16x8x8xf32>
    "tpu.trace_stop"() : () -> ()
    %cst_15 = arith.constant dense<0xFF800000> : vector<16x8xf32>
    %36 = vector.multi_reduction <maximumf>, %35, %cst_15 [2] : vector<16x8x8xf32> to vector<16x8xf32>
    %37 = vector.shape_cast %36 : vector<16x8xf32> to vector<16x8x1xf32>
    %38 = vector.broadcast %37 : vector<16x8x1xf32> to vector<16x8x8xf32>
    %39 = arith.subf %35, %38 : vector<16x8x8xf32>
    %40 = math.exp %39 : vector<16x8x8xf32>
    %cst_16 = arith.constant dense<0.000000e+00> : vector<16x8xf32>
    %41 = vector.multi_reduction <add>, %40, %cst_16 [2] : vector<16x8x8xf32> to vector<16x8xf32>
    %42 = vector.shape_cast %41 : vector<16x8xf32> to vector<16x8x1xf32>
    %43 = tpu.reciprocal %42 {approx = true} : vector<16x8x1xf32> -> vector<16x8x1xf32>
    %44 = vector.broadcast %43 : vector<16x8x1xf32> to vector<16x8x8xf32>
    %45 = arith.mulf %40, %44 : vector<16x8x8xf32>
    %46 = arith.truncf %45 : vector<16x8x8xf32> to vector<16x8x8xbf16>
    "tpu.trace_start"() <{level = 10 : i32, message = "zqk,zkd->zqd"}> : () -> ()
    %cst_17 = arith.constant dense<0.000000e+00> : vector<16x8x4xf32>
    %47 = tpu.matmul %46, %34, %cst_17 {dimension_numbers = #tpu.dot_dimension_numbers<[2], [1], [1], [2], [0, 0, 0, 1, 1, 2], [0], [0]>} : vector<16x8x8xbf16>, vector<16x8x4xbf16>, vector<16x8x4xf32> -> vector<16x8x4xf32>
    "tpu.trace_stop"() : () -> ()
    %48 = vector.shape_cast %47 : vector<16x8x4xf32> to vector<8x16x4xf32>
    %49 = tpu.transpose %48, [1, 0, 2] : vector<8x16x4xf32> -> vector<16x8x4xf32>
    %50 = vector.shape_cast %49 : vector<16x8x4xf32> to vector<16x32xf32>
    %51 = arith.truncf %50 : vector<16x32xf32> to vector<16x32xbf16>
    %52 = arith.index_cast %c0_i32 : i32 to index
    %c0_18 = arith.constant 0 : index
    %c0_19 = arith.constant 0 : index
    %53 = vector.load %arg6[%52, %c0_18, %c0_19] : memref<2x32x128xbf16, #tpu.memory_space<vmem>>, vector<1x32x128xbf16>
    %54 = vector.shape_cast %53 : vector<1x32x128xbf16> to vector<32x128xbf16>
    %cst_20 = arith.constant dense<0.000000e+00> : vector<16x128xf32>
    %55 = tpu.matmul %51, %54, %cst_20 {dimension_numbers = #tpu.dot_dimension_numbers<[1], [0], [0], [1], [0, 0, 1, 1], [], []>} : vector<16x32xbf16>, vector<32x128xbf16>, vector<16x128xf32> -> vector<16x128xf32>
    %56 = arith.index_cast %c0_i32 : i32 to index
    %c0_21 = arith.constant 0 : index
    %c0_22 = arith.constant 0 : index
    %57 = vector.load %arg7[%56, %c0_21, %c0_22] : memref<2x1x128xf32, #tpu.memory_space<vmem>>, vector<1x1x128xf32>
    %58 = vector.shape_cast %57 : vector<1x1x128xf32> to vector<1x128xf32>
    %59 = vector.broadcast %58 : vector<1x128xf32> to vector<16x128xf32>
    %60 = arith.addf %55, %59 : vector<16x128xf32>
    %61 = arith.addf %60, %9 : vector<16x128xf32>
    %62 = arith.index_cast %c0_i32 : i32 to index
    %c0_23 = arith.constant 0 : index
    %c0_24 = arith.constant 0 : index
    %63 = vector.load %arg8[%62, %c0_23, %c0_24] : memref<2x1x128xf32, #tpu.memory_space<vmem>>, vector<1x1x128xf32>
    %64 = vector.shape_cast %63 : vector<1x1x128xf32> to vector<1x128xf32>
    %65 = arith.index_cast %c0_i32 : i32 to index
    %c0_25 = arith.constant 0 : index
    %c0_26 = arith.constant 0 : index
    %66 = vector.load %arg9[%65, %c0_25, %c0_26] : memref<2x1x128xf32, #tpu.memory_space<vmem>>, vector<1x1x128xf32>
    %67 = vector.shape_cast %66 : vector<1x1x128xf32> to vector<1x128xf32>
    %cst_27 = arith.constant dense<0.000000e+00> : vector<16xf32>
    %68 = vector.multi_reduction <add>, %61, %cst_27 [1] : vector<16x128xf32> to vector<16xf32>
    %69 = vector.shape_cast %68 : vector<16xf32> to vector<16x1xf32>
    %cst_28 = arith.constant 3.125000e-02 : f32
    %70 = vector.broadcast %cst_28 : f32 to vector<16x1xf32>
    %71 = arith.mulf %69, %70 : vector<16x1xf32>
    %72 = vector.broadcast %71 : vector<16x1xf32> to vector<16x128xf32>
    %73 = arith.subf %61, %72 : vector<16x128xf32>
    %74 = vector.broadcast %4 : vector<1x128xf32> to vector<16x128xf32>
    %75 = arith.mulf %73, %74 : vector<16x128xf32>
    %76 = arith.mulf %75, %75 : vector<16x128xf32>
    %cst_29 = arith.constant dense<0.000000e+00> : vector<16xf32>
    %77 = vector.multi_reduction <add>, %76, %cst_29 [1] : vector<16x128xf32> to vector<16xf32>
    %78 = vector.shape_cast %77 : vector<16xf32> to vector<16x1xf32>
    %cst_30 = arith.constant 3.125000e-02 : f32
    %79 = vector.broadcast %cst_30 : f32 to vector<16x1xf32>
    %80 = arith.mulf %78, %79 : vector<16x1xf32>
    %cst_31 = arith.constant 9.99999974E-6 : f32
    %81 = vector.broadcast %cst_31 : f32 to vector<16x1xf32>
    %82 = arith.addf %80, %81 : vector<16x1xf32>
    %83 = math.rsqrt %82 : vector<16x1xf32>
    %84 = vector.broadcast %83 : vector<16x1xf32> to vector<16x128xf32>
    %85 = arith.mulf %75, %84 : vector<16x128xf32>
    %86 = vector.broadcast %64 : vector<1x128xf32> to vector<16x128xf32>
    %87 = arith.mulf %85, %86 : vector<16x128xf32>
    %88 = vector.broadcast %67 : vector<1x128xf32> to vector<16x128xf32>
    %89 = arith.addf %87, %88 : vector<16x128xf32>
    %90 = arith.truncf %89 : vector<16x128xf32> to vector<16x128xbf16>
    %91 = arith.index_cast %c0_i32 : i32 to index
    %c0_32 = arith.constant 0 : index
    %c0_33 = arith.constant 0 : index
    %92 = vector.load %arg10[%91, %c0_32, %c0_33] : memref<2x128x128xbf16, #tpu.memory_space<vmem>>, vector<1x128x128xbf16>
    %93 = vector.shape_cast %92 : vector<1x128x128xbf16> to vector<128x128xbf16>
    %cst_34 = arith.constant dense<0.000000e+00> : vector<16x128xf32>
    %94 = tpu.matmul %90, %93, %cst_34 {dimension_numbers = #tpu.dot_dimension_numbers<[1], [0], [0], [1], [0, 0, 1, 1], [], []>} : vector<16x128xbf16>, vector<128x128xbf16>, vector<16x128xf32> -> vector<16x128xf32>
    %95 = arith.index_cast %c0_i32 : i32 to index
    %c0_35 = arith.constant 0 : index
    %c0_36 = arith.constant 0 : index
    %96 = vector.load %arg11[%95, %c0_35, %c0_36] : memref<2x1x128xf32, #tpu.memory_space<vmem>>, vector<1x1x128xf32>
    %97 = vector.shape_cast %96 : vector<1x1x128xf32> to vector<1x128xf32>
    %98 = vector.broadcast %97 : vector<1x128xf32> to vector<16x128xf32>
    %99 = arith.addf %94, %98 : vector<16x128xf32>
    %cst_37 = arith.constant 0.000000e+00 : f32
    %100 = vector.broadcast %cst_37 : f32 to vector<16x128xf32>
    %101 = arith.maximumf %99, %100 : vector<16x128xf32>
    %102 = arith.truncf %101 : vector<16x128xf32> to vector<16x128xbf16>
    %103 = arith.index_cast %c0_i32 : i32 to index
    %c0_38 = arith.constant 0 : index
    %c0_39 = arith.constant 0 : index
    %104 = vector.load %arg12[%103, %c0_38, %c0_39] : memref<2x128x128xbf16, #tpu.memory_space<vmem>>, vector<1x128x128xbf16>
    %105 = vector.shape_cast %104 : vector<1x128x128xbf16> to vector<128x128xbf16>
    %cst_40 = arith.constant dense<0.000000e+00> : vector<16x128xf32>
    %106 = tpu.matmul %102, %105, %cst_40 {dimension_numbers = #tpu.dot_dimension_numbers<[1], [0], [0], [1], [0, 0, 1, 1], [], []>} : vector<16x128xbf16>, vector<128x128xbf16>, vector<16x128xf32> -> vector<16x128xf32>
    %107 = arith.index_cast %c0_i32 : i32 to index
    %c0_41 = arith.constant 0 : index
    %c0_42 = arith.constant 0 : index
    %108 = vector.load %arg13[%107, %c0_41, %c0_42] : memref<2x1x128xf32, #tpu.memory_space<vmem>>, vector<1x1x128xf32>
    %109 = vector.shape_cast %108 : vector<1x1x128xf32> to vector<1x128xf32>
    %110 = vector.broadcast %109 : vector<1x128xf32> to vector<16x128xf32>
    %111 = arith.addf %106, %110 : vector<16x128xf32>
    %112 = arith.addf %111, %89 : vector<16x128xf32>
    %113 = arith.index_cast %c0_i32 : i32 to index
    %c0_43 = arith.constant 0 : index
    %c0_44 = arith.constant 0 : index
    %114 = vector.load %arg14[%113, %c0_43, %c0_44] : memref<2x1x128xf32, #tpu.memory_space<vmem>>, vector<1x1x128xf32>
    %115 = vector.shape_cast %114 : vector<1x1x128xf32> to vector<1x128xf32>
    %116 = arith.index_cast %c0_i32 : i32 to index
    %c0_45 = arith.constant 0 : index
    %c0_46 = arith.constant 0 : index
    %117 = vector.load %arg15[%116, %c0_45, %c0_46] : memref<2x1x128xf32, #tpu.memory_space<vmem>>, vector<1x1x128xf32>
    %118 = vector.shape_cast %117 : vector<1x1x128xf32> to vector<1x128xf32>
    %cst_47 = arith.constant dense<0.000000e+00> : vector<16xf32>
    %119 = vector.multi_reduction <add>, %112, %cst_47 [1] : vector<16x128xf32> to vector<16xf32>
    %120 = vector.shape_cast %119 : vector<16xf32> to vector<16x1xf32>
    %cst_48 = arith.constant 3.125000e-02 : f32
    %121 = vector.broadcast %cst_48 : f32 to vector<16x1xf32>
    %122 = arith.mulf %120, %121 : vector<16x1xf32>
    %123 = vector.broadcast %122 : vector<16x1xf32> to vector<16x128xf32>
    %124 = arith.subf %112, %123 : vector<16x128xf32>
    %125 = vector.broadcast %4 : vector<1x128xf32> to vector<16x128xf32>
    %126 = arith.mulf %124, %125 : vector<16x128xf32>
    %127 = arith.mulf %126, %126 : vector<16x128xf32>
    %cst_49 = arith.constant dense<0.000000e+00> : vector<16xf32>
    %128 = vector.multi_reduction <add>, %127, %cst_49 [1] : vector<16x128xf32> to vector<16xf32>
    %129 = vector.shape_cast %128 : vector<16xf32> to vector<16x1xf32>
    %cst_50 = arith.constant 3.125000e-02 : f32
    %130 = vector.broadcast %cst_50 : f32 to vector<16x1xf32>
    %131 = arith.mulf %129, %130 : vector<16x1xf32>
    %cst_51 = arith.constant 9.99999974E-6 : f32
    %132 = vector.broadcast %cst_51 : f32 to vector<16x1xf32>
    %133 = arith.addf %131, %132 : vector<16x1xf32>
    %134 = math.rsqrt %133 : vector<16x1xf32>
    %135 = vector.broadcast %134 : vector<16x1xf32> to vector<16x128xf32>
    %136 = arith.mulf %126, %135 : vector<16x128xf32>
    %137 = vector.broadcast %115 : vector<1x128xf32> to vector<16x128xf32>
    %138 = arith.mulf %136, %137 : vector<16x128xf32>
    %139 = vector.broadcast %118 : vector<1x128xf32> to vector<16x128xf32>
    %140 = arith.addf %138, %139 : vector<16x128xf32>
    %c1_i32 = arith.constant 1 : i32
    %141 = arith.truncf %140 : vector<16x128xf32> to vector<16x128xbf16>
    %142 = arith.index_cast %c1_i32 : i32 to index
    %c0_52 = arith.constant 0 : index
    %c0_53 = arith.constant 0 : index
    %143 = vector.load %arg3[%142, %c0_52, %c0_53] : memref<2x128x32xbf16, #tpu.memory_space<vmem>>, vector<1x128x32xbf16>
    %144 = vector.shape_cast %143 : vector<1x128x32xbf16> to vector<128x32xbf16>
    %cst_54 = arith.constant dense<0.000000e+00> : vector<16x32xf32>
    %145 = tpu.matmul %141, %144, %cst_54 {dimension_numbers = #tpu.dot_dimension_numbers<[1], [0], [0], [1], [0, 0, 1, 1], [], []>} : vector<16x128xbf16>, vector<128x32xbf16>, vector<16x32xf32> -> vector<16x32xf32>
    %146 = arith.index_cast %c1_i32 : i32 to index
    %c0_55 = arith.constant 0 : index
    %c0_56 = arith.constant 0 : index
    %147 = vector.load %arg4[%146, %c0_55, %c0_56] : memref<2x128x32xbf16, #tpu.memory_space<vmem>>, vector<1x128x32xbf16>
    %148 = vector.shape_cast %147 : vector<1x128x32xbf16> to vector<128x32xbf16>
    %cst_57 = arith.constant dense<0.000000e+00> : vector<16x32xf32>
    %149 = tpu.matmul %141, %148, %cst_57 {dimension_numbers = #tpu.dot_dimension_numbers<[1], [0], [0], [1], [0, 0, 1, 1], [], []>} : vector<16x128xbf16>, vector<128x32xbf16>, vector<16x32xf32> -> vector<16x32xf32>
    %150 = arith.index_cast %c1_i32 : i32 to index
    %c0_58 = arith.constant 0 : index
    %c0_59 = arith.constant 0 : index
    %151 = vector.load %arg5[%150, %c0_58, %c0_59] : memref<2x128x32xbf16, #tpu.memory_space<vmem>>, vector<1x128x32xbf16>
    %152 = vector.shape_cast %151 : vector<1x128x32xbf16> to vector<128x32xbf16>
    %cst_60 = arith.constant dense<0.000000e+00> : vector<16x32xf32>
    %153 = tpu.matmul %141, %152, %cst_60 {dimension_numbers = #tpu.dot_dimension_numbers<[1], [0], [0], [1], [0, 0, 1, 1], [], []>} : vector<16x128xbf16>, vector<128x32xbf16>, vector<16x32xf32> -> vector<16x32xf32>
    %154 = vector.shape_cast %145 : vector<16x32xf32> to vector<16x8x4xf32>
    %155 = tpu.transpose %154, [1, 0, 2] : vector<16x8x4xf32> -> vector<8x16x4xf32>
    %156 = vector.shape_cast %155 : vector<8x16x4xf32> to vector<16x8x4xf32>
    %157 = arith.truncf %156 : vector<16x8x4xf32> to vector<16x8x4xbf16>
    %158 = vector.shape_cast %149 : vector<16x32xf32> to vector<16x8x4xf32>
    %159 = tpu.transpose %158, [1, 0, 2] : vector<16x8x4xf32> -> vector<8x16x4xf32>
    %160 = vector.shape_cast %159 : vector<8x16x4xf32> to vector<16x8x4xf32>
    %161 = arith.truncf %160 : vector<16x8x4xf32> to vector<16x8x4xbf16>
    %162 = vector.shape_cast %153 : vector<16x32xf32> to vector<16x8x4xf32>
    %163 = tpu.transpose %162, [1, 0, 2] : vector<16x8x4xf32> -> vector<8x16x4xf32>
    %164 = vector.shape_cast %163 : vector<8x16x4xf32> to vector<16x8x4xf32>
    %165 = arith.truncf %164 : vector<16x8x4xf32> to vector<16x8x4xbf16>
    "tpu.trace_start"() <{level = 10 : i32, message = "zqd,zkd->zqk"}> : () -> ()
    %cst_61 = arith.constant dense<0.000000e+00> : vector<16x8x8xf32>
    %166 = tpu.matmul %157, %161, %cst_61 {dimension_numbers = #tpu.dot_dimension_numbers<[2], [2], [1], [1], [0, 0, 0, 1, 1, 1], [0], [0]>} : vector<16x8x4xbf16>, vector<16x8x4xbf16>, vector<16x8x8xf32> -> vector<16x8x8xf32>
    "tpu.trace_stop"() : () -> ()
    %cst_62 = arith.constant dense<0xFF800000> : vector<16x8xf32>
    %167 = vector.multi_reduction <maximumf>, %166, %cst_62 [2] : vector<16x8x8xf32> to vector<16x8xf32>
    %168 = vector.shape_cast %167 : vector<16x8xf32> to vector<16x8x1xf32>
    %169 = vector.broadcast %168 : vector<16x8x1xf32> to vector<16x8x8xf32>
    %170 = arith.subf %166, %169 : vector<16x8x8xf32>
    %171 = math.exp %170 : vector<16x8x8xf32>
    %cst_63 = arith.constant dense<0.000000e+00> : vector<16x8xf32>
    %172 = vector.multi_reduction <add>, %171, %cst_63 [2] : vector<16x8x8xf32> to vector<16x8xf32>
    %173 = vector.shape_cast %172 : vector<16x8xf32> to vector<16x8x1xf32>
    %174 = tpu.reciprocal %173 {approx = true} : vector<16x8x1xf32> -> vector<16x8x1xf32>
    %175 = vector.broadcast %174 : vector<16x8x1xf32> to vector<16x8x8xf32>
    %176 = arith.mulf %171, %175 : vector<16x8x8xf32>
    %177 = arith.truncf %176 : vector<16x8x8xf32> to vector<16x8x8xbf16>
    "tpu.trace_start"() <{level = 10 : i32, message = "zqk,zkd->zqd"}> : () -> ()
    %cst_64 = arith.constant dense<0.000000e+00> : vector<16x8x4xf32>
    %178 = tpu.matmul %177, %165, %cst_64 {dimension_numbers = #tpu.dot_dimension_numbers<[2], [1], [1], [2], [0, 0, 0, 1, 1, 2], [0], [0]>} : vector<16x8x8xbf16>, vector<16x8x4xbf16>, vector<16x8x4xf32> -> vector<16x8x4xf32>
    "tpu.trace_stop"() : () -> ()
    %179 = vector.shape_cast %178 : vector<16x8x4xf32> to vector<8x16x4xf32>
    %180 = tpu.transpose %179, [1, 0, 2] : vector<8x16x4xf32> -> vector<16x8x4xf32>
    %181 = vector.shape_cast %180 : vector<16x8x4xf32> to vector<16x32xf32>
    %182 = arith.truncf %181 : vector<16x32xf32> to vector<16x32xbf16>
    %183 = arith.index_cast %c1_i32 : i32 to index
    %c0_65 = arith.constant 0 : index
    %c0_66 = arith.constant 0 : index
    %184 = vector.load %arg6[%183, %c0_65, %c0_66] : memref<2x32x128xbf16, #tpu.memory_space<vmem>>, vector<1x32x128xbf16>
    %185 = vector.shape_cast %184 : vector<1x32x128xbf16> to vector<32x128xbf16>
    %cst_67 = arith.constant dense<0.000000e+00> : vector<16x128xf32>
    %186 = tpu.matmul %182, %185, %cst_67 {dimension_numbers = #tpu.dot_dimension_numbers<[1], [0], [0], [1], [0, 0, 1, 1], [], []>} : vector<16x32xbf16>, vector<32x128xbf16>, vector<16x128xf32> -> vector<16x128xf32>
    %187 = arith.index_cast %c1_i32 : i32 to index
    %c0_68 = arith.constant 0 : index
    %c0_69 = arith.constant 0 : index
    %188 = vector.load %arg7[%187, %c0_68, %c0_69] : memref<2x1x128xf32, #tpu.memory_space<vmem>>, vector<1x1x128xf32>
    %189 = vector.shape_cast %188 : vector<1x1x128xf32> to vector<1x128xf32>
    %190 = vector.broadcast %189 : vector<1x128xf32> to vector<16x128xf32>
    %191 = arith.addf %186, %190 : vector<16x128xf32>
    %192 = arith.addf %191, %140 : vector<16x128xf32>
    %193 = arith.index_cast %c1_i32 : i32 to index
    %c0_70 = arith.constant 0 : index
    %c0_71 = arith.constant 0 : index
    %194 = vector.load %arg8[%193, %c0_70, %c0_71] : memref<2x1x128xf32, #tpu.memory_space<vmem>>, vector<1x1x128xf32>
    %195 = vector.shape_cast %194 : vector<1x1x128xf32> to vector<1x128xf32>
    %196 = arith.index_cast %c1_i32 : i32 to index
    %c0_72 = arith.constant 0 : index
    %c0_73 = arith.constant 0 : index
    %197 = vector.load %arg9[%196, %c0_72, %c0_73] : memref<2x1x128xf32, #tpu.memory_space<vmem>>, vector<1x1x128xf32>
    %198 = vector.shape_cast %197 : vector<1x1x128xf32> to vector<1x128xf32>
    %cst_74 = arith.constant dense<0.000000e+00> : vector<16xf32>
    %199 = vector.multi_reduction <add>, %192, %cst_74 [1] : vector<16x128xf32> to vector<16xf32>
    %200 = vector.shape_cast %199 : vector<16xf32> to vector<16x1xf32>
    %cst_75 = arith.constant 3.125000e-02 : f32
    %201 = vector.broadcast %cst_75 : f32 to vector<16x1xf32>
    %202 = arith.mulf %200, %201 : vector<16x1xf32>
    %203 = vector.broadcast %202 : vector<16x1xf32> to vector<16x128xf32>
    %204 = arith.subf %192, %203 : vector<16x128xf32>
    %205 = vector.broadcast %4 : vector<1x128xf32> to vector<16x128xf32>
    %206 = arith.mulf %204, %205 : vector<16x128xf32>
    %207 = arith.mulf %206, %206 : vector<16x128xf32>
    %cst_76 = arith.constant dense<0.000000e+00> : vector<16xf32>
    %208 = vector.multi_reduction <add>, %207, %cst_76 [1] : vector<16x128xf32> to vector<16xf32>
    %209 = vector.shape_cast %208 : vector<16xf32> to vector<16x1xf32>
    %cst_77 = arith.constant 3.125000e-02 : f32
    %210 = vector.broadcast %cst_77 : f32 to vector<16x1xf32>
    %211 = arith.mulf %209, %210 : vector<16x1xf32>
    %cst_78 = arith.constant 9.99999974E-6 : f32
    %212 = vector.broadcast %cst_78 : f32 to vector<16x1xf32>
    %213 = arith.addf %211, %212 : vector<16x1xf32>
    %214 = math.rsqrt %213 : vector<16x1xf32>
    %215 = vector.broadcast %214 : vector<16x1xf32> to vector<16x128xf32>
    %216 = arith.mulf %206, %215 : vector<16x128xf32>
    %217 = vector.broadcast %195 : vector<1x128xf32> to vector<16x128xf32>
    %218 = arith.mulf %216, %217 : vector<16x128xf32>
    %219 = vector.broadcast %198 : vector<1x128xf32> to vector<16x128xf32>
    %220 = arith.addf %218, %219 : vector<16x128xf32>
    %221 = arith.truncf %220 : vector<16x128xf32> to vector<16x128xbf16>
    %222 = arith.index_cast %c1_i32 : i32 to index
    %c0_79 = arith.constant 0 : index
    %c0_80 = arith.constant 0 : index
    %223 = vector.load %arg10[%222, %c0_79, %c0_80] : memref<2x128x128xbf16, #tpu.memory_space<vmem>>, vector<1x128x128xbf16>
    %224 = vector.shape_cast %223 : vector<1x128x128xbf16> to vector<128x128xbf16>
    %cst_81 = arith.constant dense<0.000000e+00> : vector<16x128xf32>
    %225 = tpu.matmul %221, %224, %cst_81 {dimension_numbers = #tpu.dot_dimension_numbers<[1], [0], [0], [1], [0, 0, 1, 1], [], []>} : vector<16x128xbf16>, vector<128x128xbf16>, vector<16x128xf32> -> vector<16x128xf32>
    %226 = arith.index_cast %c1_i32 : i32 to index
    %c0_82 = arith.constant 0 : index
    %c0_83 = arith.constant 0 : index
    %227 = vector.load %arg11[%226, %c0_82, %c0_83] : memref<2x1x128xf32, #tpu.memory_space<vmem>>, vector<1x1x128xf32>
    %228 = vector.shape_cast %227 : vector<1x1x128xf32> to vector<1x128xf32>
    %229 = vector.broadcast %228 : vector<1x128xf32> to vector<16x128xf32>
    %230 = arith.addf %225, %229 : vector<16x128xf32>
    %cst_84 = arith.constant 0.000000e+00 : f32
    %231 = vector.broadcast %cst_84 : f32 to vector<16x128xf32>
    %232 = arith.maximumf %230, %231 : vector<16x128xf32>
    %233 = arith.truncf %232 : vector<16x128xf32> to vector<16x128xbf16>
    %234 = arith.index_cast %c1_i32 : i32 to index
    %c0_85 = arith.constant 0 : index
    %c0_86 = arith.constant 0 : index
    %235 = vector.load %arg12[%234, %c0_85, %c0_86] : memref<2x128x128xbf16, #tpu.memory_space<vmem>>, vector<1x128x128xbf16>
    %236 = vector.shape_cast %235 : vector<1x128x128xbf16> to vector<128x128xbf16>
    %cst_87 = arith.constant dense<0.000000e+00> : vector<16x128xf32>
    %237 = tpu.matmul %233, %236, %cst_87 {dimension_numbers = #tpu.dot_dimension_numbers<[1], [0], [0], [1], [0, 0, 1, 1], [], []>} : vector<16x128xbf16>, vector<128x128xbf16>, vector<16x128xf32> -> vector<16x128xf32>
    %238 = arith.index_cast %c1_i32 : i32 to index
    %c0_88 = arith.constant 0 : index
    %c0_89 = arith.constant 0 : index
    %239 = vector.load %arg13[%238, %c0_88, %c0_89] : memref<2x1x128xf32, #tpu.memory_space<vmem>>, vector<1x1x128xf32>
    %240 = vector.shape_cast %239 : vector<1x1x128xf32> to vector<1x128xf32>
    %241 = vector.broadcast %240 : vector<1x128xf32> to vector<16x128xf32>
    %242 = arith.addf %237, %241 : vector<16x128xf32>
    %243 = arith.addf %242, %220 : vector<16x128xf32>
    %244 = arith.index_cast %c1_i32 : i32 to index
    %c0_90 = arith.constant 0 : index
    %c0_91 = arith.constant 0 : index
    %245 = vector.load %arg14[%244, %c0_90, %c0_91] : memref<2x1x128xf32, #tpu.memory_space<vmem>>, vector<1x1x128xf32>
    %246 = vector.shape_cast %245 : vector<1x1x128xf32> to vector<1x128xf32>
    %247 = arith.index_cast %c1_i32 : i32 to index
    %c0_92 = arith.constant 0 : index
    %c0_93 = arith.constant 0 : index
    %248 = vector.load %arg15[%247, %c0_92, %c0_93] : memref<2x1x128xf32, #tpu.memory_space<vmem>>, vector<1x1x128xf32>
    %249 = vector.shape_cast %248 : vector<1x1x128xf32> to vector<1x128xf32>
    %cst_94 = arith.constant dense<0.000000e+00> : vector<16xf32>
    %250 = vector.multi_reduction <add>, %243, %cst_94 [1] : vector<16x128xf32> to vector<16xf32>
    %251 = vector.shape_cast %250 : vector<16xf32> to vector<16x1xf32>
    %cst_95 = arith.constant 3.125000e-02 : f32
    %252 = vector.broadcast %cst_95 : f32 to vector<16x1xf32>
    %253 = arith.mulf %251, %252 : vector<16x1xf32>
    %254 = vector.broadcast %253 : vector<16x1xf32> to vector<16x128xf32>
    %255 = arith.subf %243, %254 : vector<16x128xf32>
    %256 = vector.broadcast %4 : vector<1x128xf32> to vector<16x128xf32>
    %257 = arith.mulf %255, %256 : vector<16x128xf32>
    %258 = arith.mulf %257, %257 : vector<16x128xf32>
    %cst_96 = arith.constant dense<0.000000e+00> : vector<16xf32>
    %259 = vector.multi_reduction <add>, %258, %cst_96 [1] : vector<16x128xf32> to vector<16xf32>
    %260 = vector.shape_cast %259 : vector<16xf32> to vector<16x1xf32>
    %cst_97 = arith.constant 3.125000e-02 : f32
    %261 = vector.broadcast %cst_97 : f32 to vector<16x1xf32>
    %262 = arith.mulf %260, %261 : vector<16x1xf32>
    %cst_98 = arith.constant 9.99999974E-6 : f32
    %263 = vector.broadcast %cst_98 : f32 to vector<16x1xf32>
    %264 = arith.addf %262, %263 : vector<16x1xf32>
    %265 = math.rsqrt %264 : vector<16x1xf32>
    %266 = vector.broadcast %265 : vector<16x1xf32> to vector<16x128xf32>
    %267 = arith.mulf %257, %266 : vector<16x128xf32>
    %268 = vector.broadcast %246 : vector<1x128xf32> to vector<16x128xf32>
    %269 = arith.mulf %267, %268 : vector<16x128xf32>
    %270 = vector.broadcast %249 : vector<1x128xf32> to vector<16x128xf32>
    %271 = arith.addf %269, %270 : vector<16x128xf32>
    %c2_i32 = arith.constant 2 : i32
    %c0_99 = arith.constant 0 : index
    %c0_100 = arith.constant 0 : index
    %272 = vector.load %arg16[%c0_99, %c0_100] : memref<16x128xf32, #tpu.memory_space<vmem>>, vector<16x128xf32>
    tpu.vector_store %arg16[%c0_99, %c0_100], %271 {strides = array<i32>} : memref<16x128xf32, #tpu.memory_space<vmem>>, vector<16x128xf32>,
    return
  }
}

</mosaic_0001>

<bundles_post_ra>
// kernel: tpu_custom_call.1
= control target key start
LH: loop header
LB: loop body
LE: loop exit
PB: predicated region body
PF: predicated region fallthrough
CT: control target
= control target key end

     0   :  { %s11903_s0 = inlined_call_operand.vmem [shape: bf16[16,128], index: 0, kind: input, shape index: {}]   ;;  %s11904_s1 = inlined_call_operand.vmem [shape: bf16[128,128], index: 1, kind: input, shape index: {}]   ;;  %s11905_s2 = inlined_call_operand.vmem [shape: f32[16,128], index: 2, kind: input, shape index: {}]   ;;  %s11906_s3 = inlined_call_operand.vmem [shape: bf16[2,128,32], index: 3, kind: input, shape index: {}]   ;;  %s11907_s4 = inlined_call_operand.vmem [shape: bf16[2,128,32], index: 4, kind: input, shape index: {}]   ;;  %s11908_s5 = inlined_call_operand.vmem [shape: bf16[2,128,32], index: 5, kind: input, shape index: {}]   ;;  %s11909_s6 = inlined_call_operand.vmem [shape: bf16[2,32,128], index: 6, kind: input, shape index: {}]   ;;  %s11910_s7 = inlined_call_operand.vmem [shape: f32[2,1,128], index: 7, kind: input, shape index: {}]   ;;  %s11911_s8 = inlined_call_operand.vmem [shape: f32[2,1,128], index: 8, kind: input, shape index: {}]   ;;  %s11912_s9 = inlined_call_operand.vmem [shape: f32[2,1,128], index: 9, kind: input, shape index: {}]   ;;  %s11913_s10 = inlined_call_operand.vmem [shape: bf16[2,128,128], index: 10, kind: input, shape index: {}]   ;;  %s11914_s11 = inlined_call_operand.vmem [shape: f32[2,1,128], index: 11, kind: input, shape index: {}]   ;;  %s11915_s12 = inlined_call_operand.vmem [shape: bf16[2,128,128], index: 12, kind: input, shape index: {}]   ;;  %s11916_s13 = inlined_call_operand.vmem [shape: f32[2,1,128], index: 13, kind: input, shape index: {}]   ;;  %s11917_s14 = inlined_call_operand.vmem [shape: f32[2,1,128], index: 14, kind: input, shape index: {}]   ;;  %s11918_s15 = inlined_call_operand.vmem [shape: f32[2,1,128], index: 15, kind: input, shape index: {}]   ;;  %s11919_s16 = inlined_call_operand.hbm [shape: f32[16,128], index: 16, kind: output, shape index: {}]  }
   0x1   :  { %11938 = sst [smem:[#allocation11_spill]] %s11903_s0 }
   0x2   :  { %v7519_v0 = vld [vmem:[%s11904_s1 + $0x38] sm:$0xff]  ;;  %v7518_v1 = vld [vmem:[%s11904_s1 + $0x30] sm:$0xff]  ;;  %v7517_v7 = vld [vmem:[%s11904_s1 + $0x28] sm:$0xff] }
   0x3   :  { %134 = vmatpush.bf16.msra.mxu0 %v7519_v0  ;;  %v7527_v2 = vld [vmem:[%s11906_s3 + $0x38] sm:$0xff]  ;;  %v7526_v5 = vld [vmem:[%s11906_s3 + $0x30] sm:$0xff]  ;;  %v7525_v9 = vld [vmem:[%s11906_s3 + $0x28] sm:$0xff] }
   0x4   :  { %v7535_v3 = vld [vmem:[%s11907_s4 + $0x38] sm:$0xff]  ;;  %213 = vmatpush.bf16.msra.mxu1 %v7527_v2  ;;  %v7534_v6 = vld [vmem:[%s11907_s4 + $0x30] sm:$0xff]  ;;  %v7533_v10 = vld [vmem:[%s11907_s4 + $0x28] sm:$0xff] }
   0x5   :  { %v7543_v4 = vld [vmem:[%s11908_s5 + $0x38] sm:$0xff]  ;;  %291 = vmatpush.bf16.msra.mxu2 %v7535_v3  ;;  %v7542_v8 = vld [vmem:[%s11908_s5 + $0x30] sm:$0xff]  ;;  %v7516_v11 = vld [vmem:[%s11904_s1 + $0x20] sm:$0xff] }
   0x6   :  { %369 = vmatpush.bf16.msra.mxu3 %v7543_v4  ;;  %v7541_v12 = vld [vmem:[%s11908_s5 + $0x28] sm:$0xff] }
   0x7   :  { %135 = vmatpush.bf16.msra.mxu0 %v7518_v1 }
   0x8   :  { %214 = vmatpush.bf16.msra.mxu1 %v7526_v5 }
   0x9   :  { %292 = vmatpush.bf16.msra.mxu2 %v7534_v6 }
   0xa   :  { %370 = vmatpush.bf16.msra.mxu3 %v7542_v8 }
   0xb   :  { %136 = vmatpush.bf16.msra.mxu0 %v7517_v7 }
   0xc   :  { %21 = vsyncpa [#allocation3], 0  ;;  %215 = vmatpush.bf16.msra.mxu1 %v7525_v9  ;;  %v7524_v13 = vld [vmem:[%s11906_s3 + $0x20] sm:$0xff]  ;;  %v7515_v15 = vld [vmem:[%s11904_s1 + $0x18] sm:$0xff]  ;;  %s11939_s24 = sld [smem:[#allocation11_spill]]  ;;  %s8074_s0 = smov 124  }
   0xd   :  { %293 = vmatpush.bf16.msra.mxu2 %v7533_v10  ;;  %v7532_v14 = vld [vmem:[%s11907_s4 + $0x20] sm:$0xff]  ;;  %v7523_v17 = vld [vmem:[%s11906_s3 + $0x18] sm:$0xff]  ;;  %v7514_v19 = vld [vmem:[%s11904_s1 + $0x10] sm:$0xff]  ;;  %s8075_s17 = smov 108   ;;  %s8076_s18 = smov 104   ;;  %vm428_vm0 = vcmask 1047556  }
   0xe   :  { %371 = vmatpush.bf16.msra.mxu3 %v7541_v12  ;;  %v7540_v16 = vld [vmem:[%s11908_s5 + $0x20] sm:$0xff]  ;;  %v7531_v18 = vld [vmem:[%s11907_s4 + $0x18] sm:$0xff]  ;;  %v7513_v21 = vld [vmem:[%s11904_s1 + $0x8] sm:$0xff]  ;;  %s8077_s19 = smov 116   ;;  %s8078_s20 = smov 100   ;;  %vm1908_vm1 = vcmask 31744  }
   0xf   :  { %137 = vmatpush.bf16.msra.mxu0 %v7516_v11  ;;  %v7539_v20 = vld [vmem:[%s11908_s5 + $0x18] sm:$0xff]  ;;  %v7512_v22 = vld [vmem:[%s11904_s1] sm:$0xff]  ;;  %v7522_v24 = vld [vmem:[%s11906_s3 + $0x10] sm:$0xff]  ;;  %s8072_s1 = smov 112   ;;  %v8079_v56 = vmov 1983009808  }
  0x10   :  { %216 = vmatpush.bf16.msra.mxu1 %v7524_v13  ;;  %v7530_v25 = vld [vmem:[%s11907_s4 + $0x10] sm:$0xff]  ;;  %v7521_v27 = vld [vmem:[%s11906_s3 + $0x8] sm:$0xff]  ;;  %v7520_v30 = vld [vmem:[%s11906_s3] sm:$0xff]  ;;  %v433_v57 = vunpack.c.l.s4 %v8079_v56  ;;  %v8080_v13 = vmov 1934713408   ;;  %vm2213_vm2 = vcmask 64512  }
  0x11   :  { %294 = vmatpush.bf16.msra.mxu2 %v7532_v14  ;;  %v7538_v26 = vld [vmem:[%s11908_s5 + $0x10] sm:$0xff]  ;;  %v7529_v28 = vld [vmem:[%s11907_s4 + $0x8] sm:$0xff]  ;;  %v7528_v31 = vld [vmem:[%s11907_s4] sm:$0xff]  ;;  %v481_v14 = vunpack.c.l.s4 %v8080_v13  ;;  %vm2409_vm3 = vcmask 1043456   ;;  %s11936_s21 = smov 8   ;;  %s11934_s22 = smov 4  }
  0x12   :  { %372 = vmatpush.bf16.msra.mxu3 %v7540_v16  ;;  %v7511_v23 = vld [vmem:[%s11939_s24] sm:$0xff]  ;;  %v7537_v29 = vld [vmem:[%s11908_s5 + $0x8] sm:$0xff]  ;;  %v8333_v0 = vunpack.c.0.s8 %v433_v57  ;;  %s11935_s23 = smov 12   ;;  %s11932_s24 = smov 16   ;;  %vm3219_vm4 = vcmask 97280   ;;  %vm3222_vm5 = vcmask 130048  }
  0x13   :  { %138 = vmatpush.bf16.msra.mxu0 %v7515_v15  ;;  %v7536_v32 = vld [vmem:[%s11908_s5] sm:$0xff]  ;;  %v79_v35 = vld [vmem:[%s11905_s2 + $0x8] sm:$0xff]  ;;  %s11930_s25 = smov 20   ;;  %s11933_s26 = smov 24   ;;  %vm3225_vm6 = vcmask 162816   ;;  %vm3228_vm7 = vcmask 195584  }
  0x14   :  { %217 = vmatpush.bf16.msra.mxu1 %v7523_v17  ;;  %v78_v34 = vld [vmem:[%s11905_s2] sm:$0xff]  ;;  %s8073_s2 = smov 120   ;;  %s11931_s27 = smov 28   ;;  %vm3231_vm8 = vcmask 228352   ;;  %vm3255_vm9 = vcmask 261120  }
  0x15   :  { %295 = vmatpush.bf16.msra.mxu2 %v7531_v18  ;;  %s6969_s29 = sshll.u32 %s11919_s16, 4  ;;  %s6970_s29 = int_to_ptr.hbm [resolvable:$true] %s6969_s29 }
  0x16   :  { %373 = vmatpush.bf16.msra.mxu3 %v7539_v20 }
  0x17   :  { %139 = vmatpush.bf16.msra.mxu0 %v7514_v19 }
  0x18   :  { %218 = vmatpush.bf16.msra.mxu1 %v7522_v24 }
  0x19   :  { %296 = vmatpush.bf16.msra.mxu2 %v7530_v25 }
  0x1a   :  { %374 = vmatpush.bf16.msra.mxu3 %v7538_v26 }
  0x1b   :  { %140 = vmatpush.bf16.msra.mxu0 %v7513_v21 }
  0x1c   :  { %219 = vmatpush.bf16.msra.mxu1 %v7521_v27 }
  0x1d   :  { %297 = vmatpush.bf16.msra.mxu2 %v7529_v28 }
  0x1e   :  { %375 = vmatpush.bf16.msra.mxu3 %v7537_v29 }
  0x1f   :  { %141 = vmatpush.bf16.msra.mxu0 %v7512_v22 }
  0x20   :  { %220 = vmatpush.bf16.msra.mxu1 %v7520_v30 }
  0x21   :  { %298 = vmatpush.bf16.msra.mxu2 %v7528_v31  ;;  %v8374_v31 = vunpack.c.0.s8 %v481_v14 }
  0x22   :  { %142 = vmatmul.bf16.vlgmr.msra.gmra.mxu0 %v7511_v23  ;;  %376 = vmatpush.bf16.msra.mxu3 %v7536_v32 }
  0x9f   :  { %v143_v33 = vpop.f32.mrf.mxu0 }
  0xa0   :  { %v8281_v37 = vadd.f32 %v143_v33, %v78_v34 }
  0xa2   :  { %11940 = vst [vmem:[#allocation5_spill] sm:$0xff] %v8281_v37 }
  0xa7   :  { %v145_v36 = vpop.f32.mrf.mxu0 }
  0xa8   :  { %v8283_v38 = vadd.f32 %v145_v36, %v79_v35 }
  0xaa   :  { %11941 = vst [vmem:[#allocation6_spill] sm:$0xff] %v8283_v38  ;;  %v148_v39 = vpack.c.bf16 %v8283_v38, %v8281_v37 }
  0xac   :  { %221 = vmatmul.bf16.vlgmr.msra.gmra.mxu1 %v148_v39  ;;  %299 = vmatmul.bf16.vlgmr.msra.gmra.mxu2 %v148_v39 }
  0xad   :  { %377 = vmatmul.bf16.vlgmr.msra.gmra.mxu3 %v148_v39 }
 0x129   :  { %v222_v40 = vpop.f32.mrf.mxu1 }
 0x12a   :  { %v430_v61 = vrot.slane %v222_v40, 4 }
 0x12f   :  { %v8287_v41 = vpop.f32.mrf.mxu2 }
 0x130   :  { %v8304_v46 = vpop.f32.mrf.mxu3  ;;  %v938_v12 = vrot.slane %v8287_v41, 4 }
 0x131   :  { %v224_v42 = vpop.f32.mrf.mxu1  ;;  %11942 = vst [vmem:[#allocation7_spill] sm:$0xff] %v8304_v46 }
 0x132   :  { %v7633_v43 = vpack.i.bf16 %v224_v42, %v222_v40  ;;  %v542_v62 = vrot.slane %v224_v42, 4 }
 0x134   :  { %7634 = vrot.lane.b32.xlu0 %v7633_v43, %s8072_s1  ;;  %7629 = vrot.lane.b32.xlu2 %v7633_v43, %s8073_s2 }
 0x135   :  { %7624 = vrot.lane.b32.xlu1 %v7633_v43, %s8074_s0 }
 0x137   :  { %v8292_v44 = vpop.f32.mrf.mxu2 }
 0x138   :  { %v7638_v45 = vpack.i.bf16 %v8292_v44, %v8287_v41  ;;  %v8309_v47 = vpop.f32.mrf.mxu3  ;;  %v1050_v17 = vrot.slane %v8292_v44, 4 }
 0x139   :  { %11943 = vst [vmem:[#allocation8_spill] sm:$0xff] %v8309_v47  ;;  %v8313_v48 = vpack.i.bf16 %v8309_v47, %v8304_v46 }
 0x13b   :  { %11944 = vst [vmem:[#allocation9_spill] sm:$0xff] %v8313_v48 }
 0x13c   :  { %7639 = vrot.lane.b32.xlu0 %v7638_v45, %s8074_s0  ;;  %7664 = vrot.lane.b32.xlu2 %v7638_v45, %s8075_s17 }
 0x13d   :  { %7649 = vrot.lane.b32.xlu1 %v7638_v45, %s8072_s1 }
 0x144   :  { %7644 = vrot.lane.b32.xlu0 %v7638_v45, %s8073_s2  ;;  %7669 = vrot.lane.b32.xlu2 %v7638_v45, %s8076_s18 }
 0x145   :  { %7654 = vrot.lane.b32.xlu1 %v7638_v45, %s8077_s19 }
 0x14c   :  { %7679 = vrot.lane.b32.xlu0 %v7638_v45, %s8078_s20  ;;  %7674 = vrot.lane.b32.xlu2 %v7633_v43, %s8075_s17 }
 0x14d   :  { %7659 = vrot.lane.b32.xlu1 %v7633_v43, %s8077_s19 }
 0x154   :  { %7684 = vrot.lane.b32.xlu0 %v7633_v43, %s8076_s18 }
 0x155   :  { %7689 = vrot.lane.b32.xlu1 %v7633_v43, %s8078_s20 }
 0x15c   :  { %7694 = vrot.lane.b32.xlu0 %v8313_v48, %s8073_s2 }
 0x15d   :  { %7699 = vrot.lane.b32.xlu1 %v8313_v48, %s8077_s19 }
 0x164   :  { %7709 = vrot.lane.b32.xlu0 %v8313_v48, %s8074_s0 }
 0x18e   :  { %v7630_v49 = vpop.permute.xlu2 %7629 }
 0x18f   :  { %v7632_v53 = vunpack.i.h.bf16 %v7630_v49  ;;  %v7631_v54 = vunpack.i.l.bf16 %v7630_v49 }
 0x191   :  { %v540_v58 = vrot.slane %v7632_v53, 4  ;;  %v427_v59 = vrot.slane %v7631_v54, 4  ;;  %v431_v3 = vsel %vm428_vm0, %v7631_v54, %v430_v61  ;;  %v543_v4 = vsel %vm428_vm0, %v7632_v53, %v542_v62 }
 0x192   :  { %v8346_v7 = vperm.slane %v431_v3, %v8333_v0  ;;  %v8349_v8 = vperm.slane %v543_v4, %v8333_v0 }
 0x193   :  { %v541_v1 = vsel %vm428_vm0, %v540_v58, %v224_v42  ;;  %v429_v2 = vsel %vm428_vm0, %v427_v59, %v222_v40 }
 0x194   :  { %v8340_v5 = vperm.slane %v541_v1, %v8333_v0  ;;  %v8343_v6 = vperm.slane %v429_v2, %v8333_v0 }
 0x196   :  { %v8325_v52 = vpop.permute.xlu2 %7664 }
 0x197   :  { %v7667_v10 = vunpack.i.h.bf16 %v8325_v52  ;;  %v7666_v11 = vunpack.i.l.bf16 %v8325_v52 }
 0x199   :  { %v8363_v24 = vrot.slane %v7667_v10, 4  ;;  %v8367_v25 = vrot.slane %v7666_v11, 4 }
 0x19e   :  { %v8331_v63 = vpop.permute.xlu2 %7669 }
 0x19f   :  { %v7672_v15 = vunpack.i.h.bf16 %v8331_v63  ;;  %v7671_v16 = vunpack.i.l.bf16 %v8331_v63 }
 0x1a1   :  { %v1072_v33 = vrot.slane %v7672_v15, 4  ;;  %v960_v34 = vrot.slane %v7671_v16, 4 }
 0x1a6   :  { %v8321_v50 = vpop.permute.xlu0 %7634  ;;  %v8369_v26 = vpop.permute.xlu2 %7674 }
 0x1a7   :  { %v8323_v51 = vpop.permute.xlu1 %7624  ;;  %v7637_v29 = vunpack.i.h.bf16 %v8321_v50  ;;  %v7636_v30 = vunpack.i.l.bf16 %v8321_v50  ;;  %v11920_v39 = vunpack.i.h.bf16 %v8369_v26  ;;  %v7676_v40 = vunpack.i.l.bf16 %v8369_v26 }
 0x1a8   :  { %v7627_v45 = vunpack.i.h.bf16 %v8323_v51  ;;  %v7626_v49 = vunpack.i.l.bf16 %v8323_v51 }
 0x1a9   :  { %v8386_v56 = vrot.slane %v7637_v29, 4  ;;  %v8390_v57 = vrot.slane %v7636_v30, 4  ;;  %v8399_v3 = vrot.slane %v11920_v39, 4 }
 0x1ae   :  { %v8327_v55 = vpop.permute.xlu0 %7639 }
 0x1af   :  { %v8329_v60 = vpop.permute.xlu1 %7649  ;;  %v7642_v27 = vunpack.i.h.bf16 %v8327_v55  ;;  %v7641_v42 = vunpack.i.l.bf16 %v8327_v55 }
 0x1b0   :  { %v7651_v43 = vunpack.i.l.bf16 %v8329_v60  ;;  %v7652_v61 = vunpack.i.h.bf16 %v8329_v60 }
 0x1b1   :  { %v1062_v53 = vrot.slane %v7642_v27, 4  ;;  %v950_v4 = vrot.slane %v7641_v42, 4 }
 0x1b6   :  { %v7645_v9 = vpop.permute.xlu0 %7644 }
 0x1b7   :  { %v7647_v18 = vunpack.i.h.bf16 %v7645_v9  ;;  %v7655_v19 = vpop.permute.xlu1 %7654  ;;  %v7646_v28 = vunpack.i.l.bf16 %v7645_v9  ;;  %v962_v9 = vrot.slane %v7651_v43, 4 }
 0x1b8   :  { %v7657_v32 = vunpack.i.h.bf16 %v7655_v19  ;;  %v7656_v36 = vunpack.i.l.bf16 %v7655_v19 }
 0x1b9   :  { %v1048_v35 = vrot.slane %v7647_v18, 4  ;;  %v936_v54 = vrot.slane %v7646_v28, 4  ;;  %v1051_v58 = vsel %vm428_vm0, %v7647_v18, %v1050_v17  ;;  %v939_v13 = vsel %vm428_vm0, %v7646_v28, %v938_v12 }
 0x1ba   :  { %v1060_v59 = vrot.slane %v7657_v32, 4  ;;  %v1063_v1 = vsel %vm428_vm0, %v7657_v32, %v1062_v53  ;;  %v948_v2 = vrot.slane %v7656_v36, 4  ;;  %v1059_v14 = vperm.slane %v1051_v58, %v8333_v0 }
 0x1bb   :  { %v1049_v62 = vsel %vm428_vm0, %v1048_v35, %v8292_v44  ;;  %v937_v17 = vsel %vm428_vm0, %v936_v54, %v8287_v41  ;;  %v8407_v44 = vrot.slane %v7676_v40, 4  ;;  %v1071_v35 = vperm.slane %v1063_v1, %v8333_v0 }
 0x1bc   :  { %v1055_v19 = vperm.slane %v1049_v62, %v8333_v0  ;;  %v1061_v32 = vsel %vm428_vm0, %v1060_v59, %v7642_v27  ;;  %v8414_v12 = vrot.slane %v7627_v45, 4  ;;  %v1074_v28 = vrot.slane %v7652_v61, 4 }
 0x1bd   :  { %v949_v53 = vsel %vm428_vm0, %v948_v2, %v7641_v42  ;;  %v951_v41 = vsel %vm428_vm0, %v7656_v36, %v950_v4  ;;  %v1073_v54 = vsel %vm428_vm0, %v1072_v33, %v7652_v61  ;;  %v963_v58 = vsel %vm428_vm0, %v7671_v16, %v962_v9 }
 0x1be   :  { %v7680_v55 = vpop.permute.xlu0 %7679  ;;  %v947_v62 = vperm.slane %v939_v13, %v8333_v0  ;;  %v1110_v27 = vrot.slane %v1059_v14, 4  ;;  %v1067_v59 = vperm.slane %v1061_v32, %v8333_v0  ;;  %v1098_v21 = vrot.slane %v1055_v19, 4 }
 0x1bf   :  { %v7682_v60 = vunpack.i.h.bf16 %v7680_v55  ;;  %v7681_v18 = vunpack.i.l.bf16 %v7680_v55  ;;  %v943_v55 = vperm.slane %v937_v17, %v8333_v0  ;;  %v1108_v20 = vrot.slane %v1071_v35, 4 }
 0x1c0   :  { %v955_v22 = vperm.slane %v949_v53, %v8333_v0  ;;  %v959_v42 = vperm.slane %v951_v41, %v8333_v0  ;;  %v8427_v33 = vrot.slane %v7626_v49, 4  ;;  %v1075_v16 = vsel %vm428_vm0, %v7672_v15, %v1074_v28 }
 0x1c1   :  { %v1084_v1 = vrot.slane %v7682_v60, 4  ;;  %v972_v23 = vrot.slane %v7681_v18, 4  ;;  %v1079_v36 = vperm.slane %v1073_v54, %v8333_v0  ;;  %v961_v61 = vsel %vm428_vm0, %v960_v34, %v7651_v43 }
 0x1c2   :  { %v971_v2 = vperm.slane %v963_v58, %v8333_v0  ;;  %v986_v4 = vrot.slane %v943_v55, 4  ;;  %v998_v9 = vrot.slane %v947_v62, 4  ;;  %v975_v13 = vsel %vm428_vm0, %v7681_v18, %v8367_v25  ;;  %v8464_v58 = vpop.permute.xlu1 %7659 }
 0x1c3   :  { %v1096_v17 = vrot.slane %v1067_v59, 4  ;;  %v1111_v32 = vsel %vm428_vm0, %v1071_v35, %v1110_v27  ;;  %v973_v63 = vsel %vm428_vm0, %v972_v23, %v7666_v11  ;;  %v1085_v15 = vsel %vm428_vm0, %v1084_v1, %v7667_v10 }
 0x1c4   :  { %v1099_v34 = vsel %vm428_vm0, %v1067_v59, %v1098_v21  ;;  %v1109_v43 = vsel %vm428_vm0, %v1108_v20, %v1059_v14  ;;  %v984_v28 = vrot.slane %v955_v22, 4  ;;  %v996_v53 = vrot.slane %v959_v42, 4 }
 0x1c5   :  { %v1083_v41 = vperm.slane %v1075_v16, %v8333_v0  ;;  %v967_v25 = vperm.slane %v961_v61, %v8333_v0  ;;  %v983_v18 = vperm.slane %v975_v13, %v8333_v0  ;;  %v1087_v35 = vsel %vm428_vm0, %v7682_v60, %v8363_v24 }
 0x1c6   :  { %v1022_v11 = vrot.slane %v971_v2, 4  ;;  %v987_v52 = vsel %vm428_vm0, %v955_v22, %v986_v4  ;;  %v979_v10 = vperm.slane %v973_v63, %v8333_v0  ;;  %v1091_v21 = vperm.slane %v1085_v15, %v8333_v0 }
 0x1c7   :  { %v1097_v20 = vsel %vm428_vm0, %v1096_v17, %v1055_v19  ;;  %v8456_v23 = vperm.slane %v1099_v34, %v8374_v31  ;;  %v8459_v14 = vperm.slane %v1109_v43, %v8374_v31  ;;  %v8462_v54 = vperm.slane %v1111_v32, %v8374_v31 }
 0x1c8   :  { %v985_v24 = vsel %vm428_vm0, %v984_v28, %v943_v55  ;;  %v997_v22 = vsel %vm428_vm0, %v996_v53, %v947_v62  ;;  %v999_v60 = vsel %vm428_vm0, %v959_v42, %v998_v9  ;;  %v1095_v27 = vperm.slane %v1087_v35, %v8333_v0 }
 0x1c9   :  { %v1122_v19 = vrot.slane %v1079_v36, 4  ;;  %v1010_v59 = vrot.slane %v967_v25, 4  ;;  %v8471_v1 = vperm.slane %v987_v52, %v8374_v31  ;;  %v1020_v16 = vrot.slane %v983_v18, 4 }
 0x1ca   :  { %v8474_v61 = vperm.slane %v1097_v20, %v8374_v31  ;;  %v1008_v4 = vrot.slane %v979_v10, 4  ;;  %v1023_v13 = vsel %vm428_vm0, %v983_v18, %v1022_v11  ;;  %v1120_v17 = vrot.slane %v1091_v21, 4 }
 0x1cb   :  { %v1134_v55 = vrot.slane %v1083_v41, 4  ;;  %v8478_v62 = vperm.slane %v985_v24, %v8374_v31  ;;  %v8481_v42 = vperm.slane %v997_v22, %v8374_v31  ;;  %v1007_v9 = vperm.slane %v999_v60, %v8374_v31 }
 0x1cc   :  { %v1150_v32 = vrot.slane %v8456_v23, 4  ;;  %v1154_v63 = vrot.slane %v8459_v14, 4  ;;  %v1158_v15 = vrot.slane %v8462_v54, 4  ;;  %v1132_v34 = vrot.slane %v1095_v27, 4 }
 0x1cd   :  { %v1011_v43 = vsel %vm428_vm0, %v979_v10, %v1010_v59  ;;  %v1021_v28 = vsel %vm428_vm0, %v1020_v16, %v971_v2  ;;  %v1031_v53 = vperm.slane %v1023_v13, %v8374_v31  ;;  %v7662_v18 = vunpack.i.h.bf16 %v8464_v58  ;;  %v7685_v2 = vpop.permute.xlu0 %7684 }
 0x1ce   :  { %v1038_v11 = vrot.slane %v8471_v1, 4  ;;  %v1009_v52 = vsel %vm428_vm0, %v1008_v4, %v967_v25  ;;  %v1121_v20 = vsel %vm428_vm0, %v1120_v17, %v1079_v36  ;;  %v1042_v22 = vrot.slane %v8481_v42, 4 }
 0x1cf   :  { %v1046_v60 = vrot.slane %v1007_v9, 4  ;;  %v1123_v10 = vsel %vm428_vm0, %v1091_v21, %v1122_v19  ;;  %v8499_v59 = vperm.slane %v1011_v43, %v8374_v31  ;;  %v8502_v16 = vperm.slane %v1021_v28, %v8374_v31  ;;  %v7690_v21 = vpop.permute.xlu1 %7689 }
 0x1d0   :  { %v1133_v13 = vsel %vm428_vm0, %v1132_v34, %v1083_v41  ;;  %v1135_v25 = vsel %vm428_vm0, %v1095_v27, %v1134_v55  ;;  %v8507_v36 = vperm.slane %v1009_v52, %v8374_v31  ;;  %v1044_v4 = vrot.slane %v1031_v53, 4 }
 0x1d1   :  { %v8510_v17 = vperm.slane %v1121_v20, %v8374_v31  ;;  %v552_v35 = vrot.slane %v7662_v18, 4  ;;  %v8513_v19 = vperm.slane %v1123_v10, %v8374_v31  ;;  %v7661_v43 = vunpack.i.l.bf16 %v8464_v58 }
 0x1d2   :  { %v555_v28 = vsel %vm428_vm0, %v7662_v18, %v8414_v12  ;;  %v7687_v41 = vunpack.i.h.bf16 %v7685_v2  ;;  %v8519_v27 = vsel %vm428_vm0, %v1031_v53, %v1046_v60  ;;  %v8522_v55 = vperm.slane %v1133_v13, %v8374_v31 }
 0x1d3   :  { %v1143_v34 = vperm.slane %v1135_v25, %v8374_v31  ;;  %v7686_v52 = vunpack.i.l.bf16 %v7685_v2  ;;  %v8528_v10 = vsel %vm428_vm0, %v8499_v59, %v1038_v11  ;;  %v7691_v24 = vunpack.i.l.bf16 %v7690_v21 }
 0x1d4   :  { %v8534_v53 = vsel %vm428_vm0, %v8502_v16, %v1042_v22  ;;  %v8537_v18 = vsel %vm428_vm0, %v1044_v4, %v1007_v9  ;;  %v8543_v11 = vsel %vm428_vm0, %v8513_v19, %v1150_v32  ;;  %v440_v13 = vrot.slane %v7661_v43, 4 }
 0x1d5   :  { %v7692_v25 = vunpack.i.h.bf16 %v7690_v21  ;;  %v8547_v12 = vsel %vm428_vm0, %v1143_v34, %v1158_v15  ;;  %v564_v22 = vrot.slane %v7687_v41, 4  ;;  %v452_v20 = vrot.slane %v7686_v52, 4 }
 0x1d6   :  { %v8551_v9 = vsel %vm428_vm0, %v8522_v55, %v1154_v63  ;;  %v443_v4 = vsel %vm428_vm0, %v7661_v43, %v8427_v33  ;;  %v464_v2 = vrot.slane %v7691_v24, 4  ;;  %v467_v32 = vsel %vm428_vm0, %v7691_v24, %v8407_v44 }
 0x1d7   :  { %v1156_v60 = vrot.slane %v1143_v34, 4  ;;  %v1198_v58 = vrot.slane %v8534_v53, 4  ;;  %v455_v15 = vsel %vm428_vm0, %v7686_v52, %v8390_v57  ;;  %v441_v63 = vsel %vm428_vm0, %v440_v13, %v7626_v49 }
 0x1d8   :  { %v553_v33 = vsel %vm428_vm0, %v552_v35, %v7627_v45  ;;  %v576_v43 = vrot.slane %v7692_v25, 4  ;;  %v451_v44 = vperm.slane %v443_v4, %v8333_v0  ;;  %v453_v24 = vsel %vm428_vm0, %v452_v20, %v7636_v30 }
 0x1d9   :  { %v565_v57 = vsel %vm428_vm0, %v564_v22, %v7637_v29  ;;  %v475_v34 = vperm.slane %v467_v32, %v8333_v0  ;;  %v1310_v52 = vrot.slane %v8551_v9, 4  ;;  %v463_v49 = vperm.slane %v455_v15, %v8333_v0 }
 0x1da   :  { %v579_v51 = vsel %vm428_vm0, %v7692_v25, %v8399_v3  ;;  %v465_v45 = vsel %vm428_vm0, %v464_v2, %v7676_v40  ;;  %v8585_v30 = vsel %vm428_vm0, %v1156_v60, %v8462_v54  ;;  %v447_v50 = vperm.slane %v441_v63, %v8333_v0 }
 0x1db   :  { %v559_v29 = vperm.slane %v553_v33, %v8333_v0  ;;  %v567_v35 = vsel %vm428_vm0, %v7687_v41, %v8386_v56  ;;  %v8593_v20 = vsel %vm428_vm0, %v8519_v27, %v1198_v58  ;;  %v459_v3 = vperm.slane %v453_v24, %v8333_v0 }
 0x1dc   :  { %v571_v13 = vperm.slane %v565_v57, %v8333_v0  ;;  %v11945_v40 = vunpack.i.h.bf16 %v8369_v26  ;;  %v11946_v60 = vrot.slane %v8346_v7, 4  ;;  %v587_v25 = vperm.slane %v579_v51, %v8333_v0 }
 0x1dd   :  { %v471_v56 = vperm.slane %v465_v45, %v8333_v0  ;;  %v512_v41 = vrot.slane %v475_v34, 4  ;;  %v488_v22 = vrot.slane %v451_v44, 4  ;;  %v563_v58 = vperm.slane %v555_v28, %v8333_v0 }
 0x1de   :  { %v577_v54 = vsel %vm428_vm0, %v576_v43, %v11945_v40  ;;  %v491_v2 = vsel %vm428_vm0, %v451_v44, %v11946_v60  ;;  %v514_v4 = vrot.slane %v463_v49, 4  ;;  %v575_v32 = vperm.slane %v567_v35, %v8333_v0 }
 0x1df   :  { %v8609_v26 = vsel %vm428_vm0, %v8547_v12, %v1310_v52  ;;  %v476_v15 = vrot.slane %v447_v50, 4  ;;  %v588_v63 = vrot.slane %v559_v29, 4  ;;  %v583_v33 = vperm.slane %v577_v54, %v8333_v0 }
 0x1e0   :  { %v499_v43 = vperm.slane %v491_v2, %v8374_v31  ;;  %v11947_v24 = vrot.slane %v8340_v5, 4  ;;  %v502_v44 = vrot.slane %v459_v3, 4  ;;  %v614_v51 = vrot.slane %v571_v13, 4 }
 0x1e1   :  { %v11948_v28 = vrot.slane %v8343_v6, 4  ;;  %v624_v35 = vrot.slane %v587_v25, 4  ;;  %v500_v40 = vrot.slane %v471_v56, 4  ;;  %v513_v52 = vsel %vm428_vm0, %v512_v41, %v463_v49 }
 0x1e2   :  { %v591_v57 = vsel %vm428_vm0, %v559_v29, %v11947_v24  ;;  %v489_v60 = vsel %vm428_vm0, %v488_v22, %v8346_v7  ;;  %v600_v54 = vrot.slane %v563_v58, 4  ;;  %v626_v39 = vrot.slane %v575_v32, 4 }
 0x1e3   :  { %v479_v45 = vsel %vm428_vm0, %v447_v50, %v11948_v28  ;;  %v515_v2 = vsel %vm428_vm0, %v475_v34, %v514_v4  ;;  %v477_v29 = vsel %vm428_vm0, %v476_v15, %v8343_v6  ;;  %v589_v24 = vsel %vm428_vm0, %v588_v63, %v8340_v5 }
 0x1e4   :  { %v11949_v21 = vrot.slane %v8349_v8, 4  ;;  %v612_v28 = vrot.slane %v583_v33, 4  ;;  %v487_v49 = vperm.slane %v479_v45, %v8374_v31  ;;  %v615_v41 = vsel %vm428_vm0, %v583_v33, %v614_v51 }
 0x1e5   :  { %v503_v7 = vsel %vm428_vm0, %v471_v56, %v502_v44  ;;  %v519_v22 = vperm.slane %v513_v52, %v8374_v31  ;;  %v495_v34 = vperm.slane %v489_v60, %v8374_v31  ;;  %v625_v6 = vsel %vm428_vm0, %v624_v35, %v575_v32 }
 0x1e6   :  { %v603_v50 = vsel %vm428_vm0, %v563_v58, %v11949_v21  ;;  %v501_v4 = vsel %vm428_vm0, %v500_v40, %v459_v3  ;;  %v523_v5 = vperm.slane %v515_v2, %v8374_v31  ;;  %v8639_v15 = vperm.slane %v477_v29, %v8374_v31 }
 0x1e7   :  { %v8642_v21 = vperm.slane %v589_v24, %v8374_v31  ;;  %v601_v58 = vsel %vm428_vm0, %v600_v54, %v8349_v8  ;;  %v627_v56 = vsel %vm428_vm0, %v587_v25, %v626_v39  ;;  %v599_v63 = vperm.slane %v591_v57, %v8374_v31 }
 0x1e8   :  { %v613_v33 = vsel %vm428_vm0, %v612_v28, %v571_v13  ;;  %v623_v32 = vperm.slane %v615_v41, %v8374_v31  ;;  %v511_v3 = vperm.slane %v503_v7, %v8374_v31  ;;  %v538_v44 = vrot.slane %v499_v43, 4 }
 0x1e9   :  { %v631_v51 = vperm.slane %v625_v6, %v8374_v31  ;;  %v8653_v45 = vperm.slane %v501_v4, %v8374_v31  ;;  %v532_v35 = vrot.slane %v519_v22, 4  ;;  %v607_v40 = vperm.slane %v601_v58, %v8374_v31 }
 0x1ea   :  { %v611_v8 = vperm.slane %v603_v50, %v8374_v31  ;;  %v635_v39 = vperm.slane %v627_v56, %v8374_v31  ;;  %v536_v25 = vrot.slane %v523_v5, 4  ;;  %v526_v13 = vrot.slane %v8639_v15, 4 }
 0x1eb   :  { %v530_v57 = vrot.slane %v487_v49, 4  ;;  %v534_v52 = vrot.slane %v495_v34, 4  ;;  %v8660_v60 = vperm.slane %v613_v33, %v8374_v31  ;;  %v638_v54 = vrot.slane %v8642_v21, 4 }
 0x1ec   :  { %v642_v2 = vrot.slane %v599_v63, 4  ;;  %v640_v29 = vrot.slane %v623_v32, 4  ;;  %v528_v24 = vrot.slane %v511_v3, 4  ;;  %v644_v28 = vrot.slane %v631_v51, 4 }
 0x1ed   :  { %v8665_v41 = vsel %vm428_vm0, %v8653_v45, %v526_v13  ;;  %v8668_v50 = vsel %vm428_vm0, %v532_v35, %v495_v34  ;;  %v535_v7 = vsel %vm428_vm0, %v519_v22, %v534_v52  ;;  %v646_v6 = vrot.slane %v607_v40, 4 }
 0x1ee   :  { %v650_v4 = vrot.slane %v611_v8, 4  ;;  %v648_v58 = vrot.slane %v635_v39, 4  ;;  %v8672_v56 = vsel %vm428_vm0, %v536_v25, %v499_v43  ;;  %v8676_v38 = vsel %vm428_vm0, %v511_v3, %v530_v57 }
 0x1ef   :  { %v539_v37 = vsel %vm428_vm0, %v523_v5, %v538_v44  ;;  %v8681_v13 = vsel %vm428_vm0, %v8660_v60, %v638_v54  ;;  %v8684_v34 = vsel %vm428_vm0, %v528_v24, %v487_v49  ;;  %v666_v22 = vrot.slane %v8665_v41, 4 }
 0x1f0   :  { %v678_v35 = vrot.slane %v8668_v50, 4  ;;  %v690_v43 = vrot.slane %v535_v7, 4  ;;  %v8690_v52 = vsel %vm428_vm0, %v640_v29, %v599_v63  ;;  %v8693_v3 = vsel %vm428_vm0, %v623_v32, %v642_v2 }
 0x1f1   :  { %v8696_v5 = vsel %vm428_vm0, %v644_v28, %v607_v40  ;;  %v8699_v44 = vsel %vm428_vm0, %v631_v51, %v646_v6  ;;  %v8702_v49 = vsel %vm428_vm0, %v648_v58, %v611_v8  ;;  %v8705_v57 = vsel %vm428_vm0, %v635_v39, %v650_v4 }
 0x1f2   :  { %v11950_v54 = vrot.slane %v8499_v59, 4  ;;  %v688_v51 = vrot.slane %v539_v37, 4  ;;  %v667_v8 = vsel %vm428_vm0, %v8676_v38, %v666_v22  ;;  %v679_v39 = vsel %vm428_vm0, %v8672_v56, %v678_v35 }
 0x1f3   :  { %v691_v29 = vsel %vm428_vm0, %v539_v37, %v690_v43  ;;  %v778_v59 = vrot.slane %v8681_v13, 4  ;;  %v790_v24 = vrot.slane %v8696_v5, 4  ;;  %v1172_v6 = vrot.slane %v8528_v10, 4 }
 0x1f4   :  { %v8711_v63 = vsel %vm428_vm0, %v11950_v54, %v8471_v1  ;;  %v800_v58 = vrot.slane %v8705_v57, 4  ;;  %v11951_v22 = vrot.slane %v8507_v36, 4  ;;  %v11952_v37 = vrot.slane %v8478_v62, 4 }
 0x1f5   :  { %v1160_v28 = vrot.slane %v8711_v63, 4  ;;  %v8741_v54 = vperm.slane %v667_v8, %v8333_v0  ;;  %v8744_v1 = vperm.slane %v679_v39, %v8333_v0  ;;  %v8747_v4 = vsel %vm428_vm0, %v688_v51, %v535_v7 }
 0x1f6   :  { %v8732_v35 = vsel %vm428_vm0, %v11951_v22, %v8478_v62  ;;  %v8738_v43 = vsel %vm428_vm0, %v8507_v36, %v11952_v37  ;;  %v8750_v33 = vperm.slane %v691_v29, %v8333_v0  ;;  %v8754_v22 = vsel %vm428_vm0, %v8693_v3, %v778_v59 }
 0x1f7   :  { %11953 = vst [vmem:[#allocation10_spill] sm:$0xff] %v8744_v1  ;;  %v11954_v8 = vrot.slane %v8502_v16, 4  ;;  %v8766_v7 = vsel %vm428_vm0, %v8702_v49, %v790_v24  ;;  %v1161_v51 = vsel %vm428_vm0, %v1160_v28, %v8732_v35  ;;  %v1173_v29 = vsel %vm428_vm0, %v1172_v6, %v8738_v43 }
 0x1f8   :  { %v1184_v59 = vrot.slane %v8537_v18, 4  ;;  %v8775_v37 = vsel %vm428_vm0, %v800_v58, %v8699_v44  ;;  %v1174_v24 = vrot.slane %v8738_v43, 4  ;;  %v11955_v6 = vrot.slane %v8519_v27, 4 }
 0x1f9   :  { %v8762_v39 = vsel %vm428_vm0, %v11954_v8, %v8481_v42  ;;  %v1167_v42 = vperm.slane %v1161_v51, %v8333_v0  ;;  %v1179_v8 = vperm.slane %v1173_v29, %v8333_v0  ;;  %v11956_v58 = vrot.slane %v8510_v17, 4 }
 0x1fa   :  { %v1185_v28 = vsel %vm428_vm0, %v1184_v59, %v8762_v39  ;;  %v1197_v36 = vsel %vm428_vm0, %v11955_v6, %v8534_v53  ;;  %v11957_v43 = vrot.slane %v8474_v61, 4  ;;  %v11958_v53 = vrot.slane %v8513_v19, 4 }
 0x1fb   :  { %v8791_v62 = vsel %vm428_vm0, %v11956_v58, %v8474_v61  ;;  %v1191_v51 = vperm.slane %v1185_v28, %v8333_v0  ;;  %v1203_v29 = vperm.slane %v1197_v36, %v8333_v0  ;;  %v1208_v2 = vrot.slane %v1179_v8, 4 }
 0x1fc   :  { %v8799_v59 = vsel %vm428_vm0, %v8510_v17, %v11957_v43  ;;  %v8806_v6 = vsel %vm428_vm0, %v11958_v53, %v8456_v23  ;;  %v1284_v28 = vrot.slane %v8543_v11, 4  ;;  %v11959_v61 = vrot.slane %v8522_v55, 4 }
 0x1fd   :  { %v1209_v36 = vsel %vm428_vm0, %v1208_v2, %v1167_v42  ;;  %v1232_v58 = vrot.slane %v1203_v29, 4  ;;  %v1272_v43 = vrot.slane %v8806_v6, 4  ;;  %v1296_v53 = vrot.slane %v8585_v30, 4 }
 0x1fe   :  { %v8814_v17 = vsel %vm428_vm0, %v11959_v61, %v8459_v14  ;;  %v1215_v40 = vperm.slane %v1209_v36, %v8374_v31  ;;  %v1285_v23 = vsel %vm428_vm0, %v1284_v28, %v8799_v59  ;;  %v11960_v14 = vrot.slane %v8547_v12, 4 }
 0x1ff   :  { %v1233_v2 = vsel %vm428_vm0, %v1232_v58, %v1191_v51  ;;  %v1273_v32 = vsel %vm428_vm0, %v1272_v43, %v8791_v62  ;;  %v1291_v55 = vperm.slane %v1285_v23, %v8333_v0  ;;  %v1297_v28 = vsel %vm428_vm0, %v1296_v53, %v8814_v17 }
 0x200   :  { %v1309_v61 = vsel %vm428_vm0, %v11960_v14, %v8551_v9  ;;  %v1239_v36 = vperm.slane %v1233_v2, %v8374_v31  ;;  %v1258_v25 = vrot.slane %v1215_v40, 4  ;;  %v1279_v19 = vperm.slane %v1273_v32, %v8333_v0 }
 0x201   :  { %v1303_v58 = vperm.slane %v1297_v28, %v8333_v0  ;;  %v1315_v27 = vperm.slane %v1309_v61, %v8333_v0  ;;  %v1320_v43 = vrot.slane %v1291_v55, 4  ;;  %v1210_v16 = vrot.slane %v1167_v42, 4 }
 0x202   :  { %v1256_v23 = vrot.slane %v1239_v36, 4  ;;  %v1259_v47 = vsel %vm428_vm0, %v1239_v36, %v1258_v25  ;;  %v1234_v12 = vrot.slane %v1191_v51, 4  ;;  %v1322_v46 = vrot.slane %v1279_v19, 4 }
 0x203   :  { %v1321_v9 = vsel %vm428_vm0, %v1320_v43, %v1279_v19  ;;  %v1344_v2 = vrot.slane %v1315_v27, 4  ;;  %v1386_v14 = vpack.c.bf16 %v1259_v47, %v1259_v47  ;;  %v1211_v32 = vsel %vm428_vm0, %v1179_v8, %v1210_v16 }
 0x204   :  { %v1257_v48 = vsel %vm428_vm0, %v1256_v23, %v1215_v40  ;;  %v1286_v53 = vrot.slane %v8799_v59, 4  ;;  %v1327_v28 = vperm.slane %v1321_v9, %v8374_v31  ;;  %v1235_v61 = vsel %vm428_vm0, %v1203_v29, %v1234_v12 }
 0x205   :  { %v1384_v42 = vpack.c.bf16 %v1257_v48, %v1257_v48  ;;  %v1345_v1 = vsel %vm428_vm0, %v1344_v2, %v1303_v58  ;;  %v8845_v25 = vperm.slane %v1211_v32, %v8374_v31  ;;  %v8848_v51 = vperm.slane %v1235_v61, %v8374_v31 }
 0x206   :  { %v1351_v47 = vperm.slane %v1345_v1, %v8374_v31  ;;  %v1370_v16 = vrot.slane %v1327_v28, 4  ;;  %v1951_v40 = vsel %vm1908_vm1, %v1386_v14, 0  ;;  %v1323_v8 = vsel %vm428_vm0, %v1291_v55, %v1322_v46 }
 0x207   :  { %v1913_v59 = vsel %vm1908_vm1, %v1384_v42, 0  ;;  %v1298_v29 = vrot.slane %v8814_v17, 4  ;;  %v1260_v48 = vrot.slane %v8848_v51, 4  ;;  %v1346_v19 = vrot.slane %v1303_v58, 4 }
 0x208   :  { %1922 = vmatpush.bf16.xpose.msrb.mxu2 %v1913_v59  ;;  %v1368_v36 = vrot.slane %v1351_v47, 4  ;;  %v1371_v43 = vsel %vm428_vm0, %v1351_v47, %v1370_v16  ;;  %v11961_v23 = vrot.slane %v8732_v35, 4  ;;  %v1175_v12 = vsel %vm428_vm0, %v8528_v10, %v1174_v24 }
 0x209   :  { %v1387_v46 = vpack.c.bf16 %v1371_v43, %v1371_v43  ;;  %v1261_v17 = vsel %vm428_vm0, %v1260_v48, %v8845_v25  ;;  %v8866_v55 = vperm.slane %v1323_v8, %v8374_v31  ;;  %v1347_v58 = vsel %vm428_vm0, %v1315_v27, %v1346_v19 }
 0x20a   :  { %v1163_v1 = vsel %vm428_vm0, %v8711_v63, %v11961_v23  ;;  %v1369_v9 = vsel %vm428_vm0, %v1368_v36, %v1327_v28  ;;  %v1388_v2 = vpack.c.bf16 %v1261_v17, %v1261_v17  ;;  %v8871_v35 = vperm.slane %v1347_v58, %v8374_v31 }
 0x20b   :  { %v8874_v63 = vperm.slane %v1163_v1, %v8333_v0  ;;  %v1385_v10 = vpack.c.bf16 %v1369_v9, %v1369_v9  ;;  %v1970_v24 = vsel %vm1908_vm1, %v1387_v46, 0  ;;  %v8878_v14 = vperm.slane %v1175_v12, %v8333_v0 }
 0x20c   :  { %v11962_v32 = vrot.slane %v8762_v39, 4  ;;  %v1989_v28 = vsel %vm1908_vm1, %v1388_v2, 0  ;;  %v1372_v61 = vrot.slane %v8871_v35, 4  ;;  %v8891_v47 = vperm.slane %v8593_v20, %v8333_v0 }
 0x20d   :  { %v1932_v16 = vsel %vm1908_vm1, %v1385_v10, 0  ;;  %1998 = vmatpush.bf16.xpose.msrb.mxu0 %v1989_v28  ;;  %v11963_v39 = vrot.slane %v8791_v62, 4  ;;  %v1287_v8 = vsel %vm428_vm0, %v8543_v11, %v1286_v53  ;;  %v1299_v11 = vsel %vm428_vm0, %v8585_v30, %v1298_v29 }
 0x20e   :  { %v1187_v27 = vsel %vm428_vm0, %v8537_v18, %v11962_v32  ;;  %1941 = vmatpush.bf16.xpose.msrb.mxu3 %v1932_v16  ;;  %v1373_v59 = vsel %vm428_vm0, %v1372_v61, %v8866_v55  ;;  %v1244_v20 = vrot.slane %v8891_v47, 4  ;;  %v8908_v19 = vperm.slane %v1287_v8, %v8333_v0 }
 0x20f   :  { %v8887_v42 = vperm.slane %v1187_v27, %v8333_v0  ;;  %v1275_v18 = vsel %vm428_vm0, %v8806_v6, %v11963_v39  ;;  %v1389_v62 = vpack.c.bf16 %v1373_v59, %v1373_v59  ;;  %v8916_v53 = vperm.slane %v8609_v26, %v8333_v0 }
 0x210   :  { %1960 = vmatpush.bf16.xpose.msra.mxu2 %v1951_v40  ;;  %v1220_v40 = vrot.slane %v8878_v14, 4  ;;  %v8905_v48 = vperm.slane %v1275_v18, %v8333_v0  ;;  %v8924_v23 = vperm.slane %v1299_v11, %v8333_v0  ;;  %v1332_v1 = vrot.slane %v8908_v19, 4 }
 0x211   :  { %v1245_v43 = vsel %vm428_vm0, %v1244_v20, %v8887_v42  ;;  %v2008_v12 = vsel %vm1908_vm1, %v1389_v62, 0  ;;  %v1356_v30 = vrot.slane %v8916_v53, 4  ;;  %v11964_v26 = vrot.slane %v8653_v45, 4 }
 0x212   :  { %v1221_v6 = vsel %vm428_vm0, %v1220_v40, %v8874_v63  ;;  %v8929_v46 = vperm.slane %v1245_v43, %v8374_v31  ;;  %v1262_v17 = vrot.slane %v8845_v25, 4  ;;  %2017 = vmatpush.bf16.xpose.msrb.mxu1 %v2008_v12  ;;  %v1333_v58 = vsel %vm428_vm0, %v1332_v1, %v8905_v48 }
 0x213   :  { %v8919_v36 = vperm.slane %v1221_v6, %v8374_v31  ;;  %v8936_v29 = vsel %vm428_vm0, %v11964_v26, %v8639_v15  ;;  %v11965_v9 = vrot.slane %v8684_v34, 4  ;;  %v11966_v10 = vrot.slane %v8676_v38, 4 }
 0x214   :  { %v1264_v45 = vrot.slane %v8929_v46, 4  ;;  %v8951_v15 = vperm.slane %v1333_v58, %v8374_v31  ;;  %v1357_v25 = vsel %vm428_vm0, %v1356_v30, %v8924_v23  ;;  %v11967_v38 = vrot.slane %v8672_v56, 4 }
 0x215   :  { %v653_v2 = vsel %vm428_vm0, %v11965_v9, %v8936_v29  ;;  %v8957_v27 = vperm.slane %v1357_v25, %v8374_v31  ;;  %v695_v61 = vperm.slane %v8747_v4, %v8333_v0  ;;  %v11968_v39 = vrot.slane %v8660_v60, 4 }
 0x216   :  { %1979 = vmatpush.bf16.xpose.msra.mxu3 %v1970_v24  ;;  %v665_v24 = vsel %vm428_vm0, %v11966_v10, %v8665_v41  ;;  %v659_v32 = vperm.slane %v653_v2, %v8333_v0  ;;  %v677_v41 = vsel %vm428_vm0, %v11967_v38, %v8668_v50  ;;  %v1265_v16 = vsel %vm428_vm0, %v1264_v45, %v8919_v36 }
 0x217   :  { %v671_v28 = vperm.slane %v665_v24, %v8333_v0  ;;  %v683_v40 = vperm.slane %v677_v41, %v8333_v0  ;;  %v8973_v18 = vsel %vm428_vm0, %v11968_v39, %v8642_v21  ;;  %v11969_v8 = vrot.slane %v8693_v3, 4 }
 0x218   :  { %v1392_v50 = vpack.c.bf16 %v1265_v16, %v1265_v16  ;;  %v1376_v59 = vrot.slane %v8957_v27, 4  ;;  %v724_v20 = vrot.slane %v695_v61, 4  ;;  %v1374_v62 = vrot.slane %v8866_v55, 4 }
 0x219   :  { %v777_v56 = vsel %vm428_vm0, %v11969_v8, %v8681_v13  ;;  %v700_v4 = vrot.slane %v671_v28, 4  ;;  %v11970_v6 = vrot.slane %v8690_v52, 4  ;;  %v11971_v11 = vrot.slane %v8702_v49, 4 }
 0x21a   :  { %v783_v21 = vperm.slane %v777_v56, %v8333_v0  ;;  %v2065_v13 = vsel %vm1908_vm1, %v1392_v50, 0  ;;  %v1377_v43 = vsel %vm428_vm0, %v1376_v59, %v8951_v15  ;;  %v725_v55 = vsel %vm428_vm0, %v724_v20, %v683_v40 }
 0x21b   :  { %v765_v60 = vsel %vm428_vm0, %v11970_v6, %v8973_v18  ;;  %v789_v3 = vsel %vm428_vm0, %v11971_v11, %v8696_v5  ;;  %v701_v1 = vsel %vm428_vm0, %v700_v4, %v659_v32  ;;  %2074 = vmatpush.bf16.xpose.msra.mxu0 %v2065_v13  ;;  %v1393_v12 = vpack.c.bf16 %v1377_v43, %v1377_v43 }
 0x21c   :  { %v8996_v30 = vperm.slane %v701_v1, %v8374_v31  ;;  %v8999_v26 = vperm.slane %v725_v55, %v8374_v31  ;;  %v771_v49 = vperm.slane %v765_v60, %v8333_v0  ;;  %v795_v5 = vperm.slane %v789_v3, %v8333_v0 }
 0x21d   :  { %v807_v58 = vperm.slane %v8775_v37, %v8333_v0  ;;  %v812_v9 = vrot.slane %v783_v21, 4  ;;  %v1263_v2 = vsel %vm428_vm0, %v8848_v51, %v1262_v17  ;;  %v9009_v10 = vperm.slane %v8754_v22, %v8333_v0 }
 0x21e   :  { %v2084_v24 = vsel %vm1908_vm1, %v1393_v12, 0  ;;  %v748_v45 = vrot.slane %v8999_v26, 4  ;;  %v1390_v25 = vpack.c.bf16 %v1263_v2, %v1263_v2  ;;  %v1375_v37 = vsel %vm428_vm0, %v8871_v35, %v1374_v62 }
 0x21f   :  { %2093 = vmatpush.bf16.xpose.msra.mxu1 %v2084_v24  ;;  %v813_v38 = vsel %vm428_vm0, %v812_v9, %v771_v49  ;;  %v836_v41 = vrot.slane %v807_v58, 4  ;;  %v702_v16 = vrot.slane %v659_v32, 4  ;;  %v736_v39 = vrot.slane %v8750_v33, 4 }
 0x220   :  { %v9019_v51 = vperm.slane %v8766_v7, %v8333_v0  ;;  %v11972_v22 = vrot.slane %v8699_v44, 4  ;;  %v749_v8 = vsel %vm428_vm0, %v748_v45, %v8996_v30  ;;  %v726_v32 = vrot.slane %v683_v40, 4 }
 0x221   :  { %v876_v56 = vpack.c.bf16 %v749_v8, %v749_v8  ;;  %v837_v50 = vsel %vm428_vm0, %v836_v41, %v795_v5  ;;  %v703_v35 = vsel %vm428_vm0, %v671_v28, %v702_v16  ;;  %v9030_v59 = vperm.slane %v813_v38, %v8374_v31 }
 0x222   :  { %v803_v17 = vsel %vm428_vm0, %v8705_v57, %v11972_v22  ;;  %v9033_v7 = vperm.slane %v837_v50, %v8374_v31  ;;  %v2027_v44 = vsel %vm1908_vm1, %v1390_v25, 0  ;;  %v1391_v4 = vpack.c.bf16 %v1375_v37, %v1375_v37 }
 0x223   :  { %7114 = vmatmul.msk.bf16.vlgmr.msrb.gmra.mxu2 %vm1908_vm1, %v876_v56  ;;  %v727_v57 = vsel %vm428_vm0, %v695_v61, %v726_v32  ;;  %v814_v20 = vrot.slane %v771_v49, 4  ;;  %v838_v62 = vrot.slane %v795_v5, 4  ;;  %v1222_v6 = vrot.slane %v8874_v63, 4  ;;  %v11973_v32 = vld [vmem:[#allocation10_spill] sm:$0xff] }
 0x224   :  { %v860_v28 = vrot.slane %v9033_v7, 4  ;;  %2036 = vmatpush.bf16.xpose.msrb.mxu2 %v2027_v44  ;;  %v9041_v40 = vperm.slane %v703_v35, %v8374_v31  ;;  %v9044_v60 = vperm.slane %v727_v57, %v8374_v31  ;;  %v1246_v11 = vrot.slane %v8887_v42, 4 }
 0x225   :  { %v815_v3 = vsel %vm428_vm0, %v783_v21, %v814_v20  ;;  %v839_v13 = vsel %vm428_vm0, %v807_v58, %v838_v62  ;;  %v1223_v61 = vsel %vm428_vm0, %v8878_v14, %v1222_v6  ;;  %v1334_v63 = vrot.slane %v8905_v48, 4 }
 0x226   :  { %v861_v43 = vsel %vm428_vm0, %v860_v28, %v9030_v59  ;;  %v752_v1 = vrot.slane %v9044_v60, 4  ;;  %v9056_v55 = vperm.slane %v815_v3, %v8374_v31  ;;  %v9059_v12 = vperm.slane %v839_v13, %v8374_v31 }
 0x227   :  { %v654_v42 = vrot.slane %v8936_v29, 4  ;;  %v877_v21 = vpack.c.bf16 %v861_v43, %v861_v43  ;;  %v9063_v49 = vperm.slane %v1223_v61, %v8374_v31  ;;  %v1247_v14 = vsel %vm428_vm0, %v8891_v47, %v1246_v11 }
 0x228   :  { %v753_v48 = vsel %vm428_vm0, %v752_v1, %v9041_v40  ;;  %v864_v5 = vrot.slane %v9059_v12, 4  ;;  %v9071_v58 = vperm.slane %v1247_v14, %v8374_v31  ;;  %v1335_v9 = vsel %vm428_vm0, %v8908_v19, %v1334_v63 }
 0x229   :  { %v9076_v29 = vperm.slane %v803_v17, %v8333_v0  ;;  %7115 = vmatmul.msk.bf16.vlgmr.msrb.gmra.mxu3 %vm1908_vm1, %v877_v21  ;;  %v2046_v2 = vsel %vm1908_vm1, %v1391_v4, 0  ;;  %v880_v24 = vpack.c.bf16 %v753_v48, %v753_v48  ;;  %v1358_v47 = vrot.slane %v8924_v23, 4 }
 0x22a   :  { %v750_v45 = vrot.slane %v8996_v30, 4  ;;  %v766_v25 = vrot.slane %v8973_v18, 4  ;;  %2055 = vmatpush.bf16.xpose.msrb.mxu3 %v2046_v2  ;;  %v865_v38 = vsel %vm428_vm0, %v864_v5, %v9056_v55  ;;  %v1268_v19 = vrot.slane %v9071_v58, 4 }
 0x22b   :  { %7118 = vmatmul.msk.bf16.vlgmr.msrb.gmra.mxu0 %vm1908_vm1, %v880_v24  ;;  %v881_v41 = vpack.c.bf16 %v865_v38, %v865_v38  ;;  %v9088_v37 = vperm.slane %v1335_v9, %v8374_v31  ;;  %v1359_v16 = vsel %vm428_vm0, %v8916_v53, %v1358_v47  ;;  %v1266_v23 = vrot.slane %v8919_v36, 4 }
 0x22c   :  { %v1269_v18 = vsel %vm428_vm0, %v1268_v19, %v9063_v49  ;;  %v9096_v30 = vperm.slane %v1359_v16, %v8374_v31  ;;  %v1378_v22 = vrot.slane %v8951_v15, 4  ;;  %v655_v17 = vsel %vm428_vm0, %v8684_v34, %v654_v42 }
 0x22d   :  { %7119 = vmatmul.msk.bf16.vlgmr.msrb.gmra.mxu1 %vm1908_vm1, %v881_v41  ;;  %v1396_v8 = vpack.c.bf16 %v1269_v18, %v1269_v18  ;;  %v1267_v56 = vsel %vm428_vm0, %v8929_v46, %v1266_v23  ;;  %v663_v53 = vperm.slane %v655_v17, %v8333_v0  ;;  %v712_v36 = vrot.slane %v8741_v54, 4 }
 0x22e   :  { %v848_v50 = vrot.slane %v9076_v29, 4  ;;  %v1380_v35 = vrot.slane %v9096_v30, 4  ;;  %v751_v15 = vsel %vm428_vm0, %v8999_v26, %v750_v45  ;;  %v737_v34 = vsel %vm428_vm0, %v736_v39, %v11973_v32 }
 0x22f   :  { %v2141_v44 = vsel %vm1908_vm1, %v1396_v8, 0  ;;  %v1394_v4 = vpack.c.bf16 %v1267_v56, %v1267_v56  ;;  %v713_v46 = vsel %vm428_vm0, %v712_v36, %v663_v53  ;;  %v9117_v57 = vperm.slane %v737_v34, %v8374_v31 }
 0x230   :  { %v862_v20 = vrot.slane %v9030_v59, 4  ;;  %2150 = vmatpush.bf16.xpose.msrb.mxu0 %v2141_v44  ;;  %v1381_v62 = vsel %vm428_vm0, %v1380_v35, %v9088_v37  ;;  %v767_v26 = vsel %vm428_vm0, %v8690_v52, %v766_v25  ;;  %v878_v28 = vpack.c.bf16 %v751_v15, %v751_v15 }
 0x231   :  { %v1397_v6 = vpack.c.bf16 %v1381_v62, %v1381_v62  ;;  %v1379_v39 = vsel %vm428_vm0, %v8957_v27, %v1378_v22  ;;  %v775_v11 = vperm.slane %v767_v26, %v8333_v0  ;;  %v9128_v3 = vperm.slane %v713_v46, %v8374_v31 }
 0x232   :  { %v756_v13 = vrot.slane %v9117_v57, 4  ;;  %v824_v59 = vrot.slane %v9009_v10, 4  ;;  %v849_v61 = vsel %vm428_vm0, %v848_v50, %v9019_v51  ;;  %v2103_v52 = vsel %vm1908_vm1, %v1394_v4, 0 }
 0x233   :  { %v2160_v63 = vsel %vm1908_vm1, %v1397_v6, 0  ;;  %7116 = vmatmul.msk.bf16.vlgmr.msra.gmra.mxu2 %vm1908_vm1, %v878_v28  ;;  %v855_v27 = vperm.slane %v849_v61, %v8374_v31  ;;  %v863_v43 = vsel %vm428_vm0, %v9033_v7, %v862_v20  ;;  %v1395_v42 = vpack.c.bf16 %v1379_v39, %v1379_v39 }
 0x234   :  { %2169 = vmatpush.bf16.xpose.msrb.mxu1 %v2160_v63  ;;  %2112 = vmatpush.bf16.xpose.msra.mxu2 %v2103_v52  ;;  %v825_v1 = vsel %vm428_vm0, %v824_v59, %v775_v11  ;;  %v757_v48 = vsel %vm428_vm0, %v756_v13, %v9128_v3  ;;  %v879_v5 = vpack.c.bf16 %v863_v43, %v863_v43  ;;  %v738_v9 = vrot.slane %v11973_v32, 4 }
 0x235   :  { %v831_v21 = vperm.slane %v825_v1, %v8374_v31  ;;  %v868_v14 = vrot.slane %v855_v27, 4  ;;  %v1270_v24 = vrot.slane %v9063_v49, 4  ;;  %v2122_v7 = vsel %vm1908_vm1, %v1395_v42, 0 }
 0x236   :  { %v884_v47 = vpack.c.bf16 %v757_v48, %v757_v48  ;;  %v850_v45 = vrot.slane %v9019_v51, 4  ;;  %v754_v25 = vrot.slane %v9041_v40, 4  ;;  %v714_v19 = vrot.slane %v663_v53, 4 }
 0x237   :  { %v869_v2 = vsel %vm428_vm0, %v868_v14, %v831_v21  ;;  %v739_v41 = vsel %vm428_vm0, %v8750_v33, %v738_v9  ;;  %v1271_v49 = vsel %vm428_vm0, %v9071_v58, %v1270_v24  ;;  %v826_v16 = vrot.slane %v775_v11, 4 }
 0x238   :  { %v885_v38 = vpack.c.bf16 %v869_v2, %v869_v2  ;;  %v851_v23 = vsel %vm428_vm0, %v9076_v29, %v850_v45  ;;  %v755_v51 = vsel %vm428_vm0, %v9044_v60, %v754_v25  ;;  %v1382_v40 = vrot.slane %v9088_v37, 4 }
 0x239   :  { %7117 = vmatmul.msk.bf16.vlgmr.msra.gmra.mxu3 %vm1908_vm1, %v879_v5  ;;  %v747_v18 = vperm.slane %v739_v41, %v8374_v31  ;;  %v1398_v22 = vpack.c.bf16 %v1271_v49, %v1271_v49  ;;  %v715_v33 = vsel %vm428_vm0, %v8741_v54, %v714_v19  ;;  %v866_v17 = vrot.slane %v9056_v55, 4 }
 0x23a   :  { %2131 = vmatpush.bf16.xpose.msra.mxu3 %v2122_v7  ;;  %v859_v58 = vperm.slane %v851_v23, %v8374_v31  ;;  %v882_v8 = vpack.c.bf16 %v755_v51, %v755_v51  ;;  %v827_v56 = vsel %vm428_vm0, %v9009_v10, %v826_v16  ;;  %v1383_v29 = vsel %vm428_vm0, %v9096_v30, %v1382_v40  ;;  %v11974_v16 = vld [vmem:[#allocation9_spill] sm:$0xff] }
 0x23b   :  { %7122 = vmatmul.msk.bf16.vlgmr.msra.gmra.mxu0 %vm1908_vm1, %v884_v47  ;;  %v723_v60 = vperm.slane %v715_v33, %v8374_v31  ;;  %v760_v37 = vrot.slane %v747_v18, 4  ;;  %v2179_v53 = vsel %vm1908_vm1, %v1398_v22, 0  ;;  %v867_v54 = vsel %vm428_vm0, %v9059_v12, %v866_v17 }
 0x23c   :  { %v835_v55 = vperm.slane %v827_v56, %v8374_v31  ;;  %v872_v36 = vrot.slane %v859_v58, 4  ;;  %v1399_v50 = vpack.c.bf16 %v1383_v29, %v1383_v29  ;;  %v883_v35 = vpack.c.bf16 %v867_v54, %v867_v54 }
 0x23d   :  { %7123 = vmatmul.msk.bf16.vlgmr.msra.gmra.mxu1 %vm1908_vm1, %v885_v38  ;;  %v761_v10 = vsel %vm428_vm0, %v760_v37, %v723_v60  ;;  %v758_v34 = vrot.slane %v9128_v3, 4  ;;  %v870_v4 = vrot.slane %v831_v21, 4  ;;  %v762_v26 = vrot.slane %v723_v60, 4 }
 0x23e   :  { %v873_v30 = vsel %vm428_vm0, %v872_v36, %v835_v55  ;;  %v2198_v15 = vsel %vm1908_vm1, %v1399_v50, 0  ;;  %v888_v32 = vpack.c.bf16 %v761_v10, %v761_v10  ;;  %v874_v28 = vrot.slane %v835_v55, 4 }
 0x23f   :  { %v889_v12 = vpack.c.bf16 %v873_v30, %v873_v30  ;;  %v759_v44 = vsel %vm428_vm0, %v9117_v57, %v758_v34  ;;  %v871_v20 = vsel %vm428_vm0, %v855_v27, %v870_v4  ;;  %v763_v6 = vsel %vm428_vm0, %v747_v18, %v762_v26 }
 0x240   :  { %v886_v46 = vpack.c.bf16 %v759_v44, %v759_v44  ;;  %v887_v62 = vpack.c.bf16 %v871_v20, %v871_v20  ;;  %v890_v39 = vpack.c.bf16 %v763_v6, %v763_v6  ;;  %v875_v11 = vsel %vm428_vm0, %v859_v58, %v874_v28 }
 0x241   :  { %v891_v3 = vpack.c.bf16 %v875_v11, %v875_v11 }
 0x243   :  { %7120 = vmatmul.msk.bf16.vlgmr.msrb.gmra.mxu2 %vm1908_vm1, %v882_v8 }
 0x244   :  { %2188 = vmatpush.bf16.xpose.msrb.mxu2 %v2179_v53 }
 0x249   :  { %7121 = vmatmul.msk.bf16.vlgmr.msrb.gmra.mxu3 %vm1908_vm1, %v883_v35 }
 0x24a   :  { %2207 = vmatpush.bf16.xpose.msrb.mxu3 %v2198_v15  ;;  %v9261_v15 = vpop.permute.xlu1 %7699 }
 0x24b   :  { %7126 = vmatmul.msk.bf16.vlgmr.msrb.gmra.mxu0 %vm1908_vm1, %v888_v32 }
 0x24d   :  { %7127 = vmatmul.msk.bf16.vlgmr.msrb.gmra.mxu1 %vm1908_vm1, %v889_v12  ;;  %v9265_v12 = vpop.permute.xlu0 %7694 }
 0x253   :  { %7124 = vmatmul.msk.bf16.vlgmr.msra.gmra.mxu2 %vm1908_vm1, %v886_v46 }
 0x255   :  { %v9270_v26 = vpop.permute.xlu0 %7709 }
 0x259   :  { %7125 = vmatmul.msk.bf16.vlgmr.msra.gmra.mxu3 %vm1908_vm1, %v887_v62 }
 0x263   :  { %7128 = vmatmul.msk.bf16.vlgmr.msrb.gmra.mxu2 %vm1908_vm1, %v890_v39 }
 0x269   :  { %7129 = vmatmul.msk.bf16.vlgmr.msrb.gmra.mxu3 %vm1908_vm1, %v891_v3 }
 0x2a6   :  { %v9193_v57 = vpop.f32.mrf.mxu2 }
 0x2a7   :  { %v2214_v1 = vsel %vm2213_vm2, %v9193_v57, -inf }
 0x2a8   :  { %v9195_v13 = vpop.f32.mrf.mxu0 }
 0x2a9   :  { %v2226_v59 = vsel %vm2213_vm2, %v9195_v13, -inf }
 0x2aa   :  { %v9199_v61 = vpop.f32.mrf.mxu1  ;;  %2227 = vmax.xlane.f32.xlu1 %v2226_v59 }
 0x2ab   :  { %v2229_v63 = vsel %vm2213_vm2, %v9199_v61, -inf }
 0x2ac   :  { %2230 = vmax.xlane.f32.xlu2 %v2229_v63  ;;  %v9203_v52 = vpop.f32.mrf.mxu3 }
 0x2ad   :  { %v2217_v21 = vsel %vm2213_vm2, %v9203_v52, -inf }
 0x2ae   :  { %v1926_v27 = vpop.f32.mrf.mxu2 }
 0x2b0   :  { %v2002_v43 = vpop.f32.mrf.mxu0 }
 0x2b2   :  { %v2021_v42 = vpop.f32.mrf.mxu1  ;;  %2215 = vmax.xlane.f32.xlu1 %v2214_v1 }
 0x2b4   :  { %2218 = vmax.xlane.f32.xlu2 %v2217_v21  ;;  %v1945_v14 = vpop.f32.mrf.mxu3 }
 0x2b6   :  { %v9209_v48 = vpop.f32.mrf.mxu2 }
 0x2b7   :  { %v2220_v9 = vsel %vm2213_vm2, %v9209_v48, -inf }
 0x2b8   :  { %v9211_v5 = vpop.f32.mrf.mxu0 }
 0x2b9   :  { %v2238_v50 = vsel %vm2213_vm2, %v9211_v5, -inf }
 0x2ba   :  { %v9215_v2 = vpop.f32.mrf.mxu1 }
 0x2bb   :  { %v2241_v36 = vsel %vm2213_vm2, %v9215_v2, -inf }
 0x2bc   :  { %v9217_v24 = vpop.f32.mrf.mxu3  ;;  %2221 = vmax.xlane.f32.xlu2 %v2220_v9 }
 0x2bd   :  { %v2223_v7 = vsel %vm2213_vm2, %v9217_v24, -inf }
 0x2be   :  { %2224 = vmax.xlane.f32.xlu0 %v2223_v7  ;;  %v1964_v47 = vpop.f32.mrf.mxu2 }
 0x2c0   :  { %v2078_v45 = vpop.f32.mrf.mxu0 }
 0x2c2   :  { %v2097_v25 = vpop.f32.mrf.mxu1 }
 0x2c4   :  { %v1983_v38 = vpop.f32.mrf.mxu3 }
 0x2c6   :  { %v9221_v19 = vpop.f32.mrf.mxu2 }
 0x2c7   :  { %v2232_v55 = vsel %vm2213_vm2, %v9221_v19, -inf }
 0x2c8   :  { %v9223_v41 = vpop.f32.mrf.mxu0 }
 0x2c9   :  { %v2250_v30 = vsel %vm2213_vm2, %v9223_v41, -inf }
 0x2ca   :  { %v9225_v49 = vpop.f32.mrf.mxu1 }
 0x2cb   :  { %7719 = vrot.lane.b32.xlu1 %v11974_v16, %s8078_s20  ;;  %v2253_v35 = vsel %vm2213_vm2, %v9225_v49, -inf }
 0x2cc   :  { %v9229_v23 = vpop.f32.mrf.mxu3 }
 0x2cd   :  { %v2235_v51 = vsel %vm2213_vm2, %v9229_v23, -inf }
 0x2ce   :  { %2236 = vmax.xlane.f32.xlu0 %v2235_v51  ;;  %v2040_v40 = vpop.f32.mrf.mxu2 }
 0x2d0   :  { %v2154_v18 = vpop.f32.mrf.mxu0 }
 0x2d1   :  { %v7696_v18 = vunpack.i.l.bf16 %v9265_v12 }
 0x2d2   :  { %v2173_v22 = vpop.f32.mrf.mxu1 }
 0x2d3   :  { %v7712_v22 = vunpack.i.h.bf16 %v9270_v26 }
 0x2d4   :  { %v2059_v33 = vpop.f32.mrf.mxu3  ;;  %7704 = vrot.lane.b32.xlu2 %v11974_v16, %s8076_s18 }
 0x2d5   :  { %v7711_v33 = vunpack.i.l.bf16 %v9270_v26 }
 0x2d6   :  { %v9235_v17 = vpop.f32.mrf.mxu2 }
 0x2d7   :  { %v2244_v54 = vsel %vm2213_vm2, %v9235_v17, -inf }
 0x2dc   :  { %v9237_v58 = vpop.f32.mrf.mxu3 }
 0x2dd   :  { %v2247_v10 = vsel %vm2213_vm2, %v9237_v58, -inf }
 0x2de   :  { %v2116_v8 = vpop.f32.mrf.mxu2 }
 0x2df   :  { %v7702_v8 = vunpack.i.h.bf16 %v9261_v15 }
 0x2e2   :  { %7714 = vrot.lane.b32.xlu0 %v11974_v16, %s8072_s1 }
 0x2e4   :  { %v2135_v56 = vpop.f32.mrf.mxu3 }
 0x2e5   :  { %v7701_v56 = vunpack.i.l.bf16 %v9261_v15 }
 0x2e6   :  { %v9241_v29 = vpop.f32.mrf.mxu2 }
 0x2e7   :  { %v2256_v1 = vsel %vm2213_vm2, %v9241_v29, -inf }
 0x2ec   :  { %v9243_v60 = vpop.f32.mrf.mxu3 }
 0x2ed   :  { %v2259_v32 = vsel %vm2213_vm2, %v9243_v60, -inf }
 0x2ee   :  { %v2192_v37 = vpop.f32.mrf.mxu2 }
 0x2f4   :  { %v2211_v53 = vpop.f32.mrf.mxu3 }
 0x2f5   :  { %2245 = vmax.xlane.f32.xlu1 %v2244_v54  ;;  %v1444_v53 = vrot.slane %v7696_v18, 4  ;;  %v1570_v54 = vrot.slane %v7712_v22, 4 }
 0x2fd   :  { %2233 = vmax.xlane.f32.xlu2 %v2232_v55  ;;  %v1458_v55 = vrot.slane %v7711_v33, 4 }
 0x2ff   :  { %v1459_v26 = vsel %vm428_vm0, %v7701_v56, %v1458_v55 }
 0x305   :  { %2242 = vmax.xlane.f32.xlu2 %v2241_v36  ;;  %v1568_v36 = vrot.slane %v7702_v8, 4 }
 0x30c   :  { %2239 = vmax.xlane.f32.xlu0 %v2238_v50 }
 0x30d   :  { %2248 = vmax.xlane.f32.xlu2 %v2247_v10 }
 0x30e   :  { %7724 = vrot.lane.b32.xlu1 %v11974_v16, %s8075_s17 }
 0x314   :  { %2254 = vmax.xlane.f32.xlu0 %v2253_v35  ;;  %v11975_v35 = vld [vmem:[#allocation7_spill] sm:$0xff] }
 0x315   :  { %2251 = vmax.xlane.f32.xlu2 %v2250_v30  ;;  %v1446_v30 = vrot.slane %v11975_v35, 4  ;;  %v1445_v15 = vsel %vm428_vm0, %v1444_v53, %v11975_v35 }
 0x31c   :  { %2260 = vmax.xlane.f32.xlu0 %v2259_v32  ;;  %v1456_v32 = vrot.slane %v7701_v56, 4 }
 0x31d   :  { %v2228_v34 = vpop.xlane.xlu1 %2227 }
 0x31e   :  { %v2266_v21 = vsub.f32 %v9195_v13, %v2228_v34 }
 0x31f   :  { %v9267_v44 = vpop.xlane.xlu2 %2230 }
 0x325   :  { %v2216_v4 = vpop.xlane.xlu1 %2215 }
 0x326   :  { %v2262_v46 = vsub.f32 %v9193_v57, %v2216_v4 }
 0x327   :  { %v2219_v20 = vpop.xlane.xlu2 %2218 }
 0x328   :  { %v2278_v62 = vmul.f32 1.442695, %v2262_v46  ;;  %v2263_v59 = vsub.f32 %v9203_v52, %v2219_v20  ;;  %v1569_v20 = vsel %vm428_vm0, %v1568_v36, %v7712_v22 }
 0x32a   :  { %7902 = vpow2.f32 %v2278_v62  ;;  %v2280_v43 = vmul.f32 1.442695, %v2263_v59  ;;  %v1457_v62 = vsel %vm428_vm0, %v1456_v32, %v7711_v33  ;;  %v1575_v59 = vperm.slane %v1569_v20, %v8333_v0 }
 0x32f   :  { %v2222_v6 = vpop.xlane.xlu2 %2221 }
 0x330   :  { %v9272_v28 = vpop.eup %7902  ;;  %v2264_v39 = vsub.f32 %v9209_v48, %v2222_v6  ;;  %v2286_v48 = vmul.f32 1.442695, %v2266_v21  ;;  %v1571_v6 = vsel %vm428_vm0, %v7702_v8, %v1570_v54 }
 0x331   :  { %v2225_v11 = vpop.xlane.xlu0 %2224  ;;  %v2310_v3 = vsel %vm2213_vm2, %v9272_v28, 0.0 }
 0x332   :  { %v2282_v63 = vmul.f32 1.442695, %v2264_v39  ;;  %v2265_v27 = vsub.f32 %v9217_v24, %v2225_v11  ;;  %2311 = vadd.xlane.f32.xlu0 %v2310_v3  ;;  %v1447_v11 = vsel %vm428_vm0, %v7696_v18, %v1446_v30 }
 0x334   :  { %7904 = vpow2.f32 %v2282_v63  ;;  %v2284_v57 = vmul.f32 1.442695, %v2265_v27  ;;  %v1451_v63 = vperm.slane %v1445_v15, %v8333_v0  ;;  %v1463_v27 = vperm.slane %v1457_v62, %v8333_v0 }
 0x336   :  { %7906 = vpow2.f32 %v2284_v57  ;;  %v1467_v57 = vperm.slane %v1459_v26, %v8333_v0 }
 0x337   :  { %7908 = vpow2.f32 %v2280_v43  ;;  %v9311_v50 = vpop.permute.xlu2 %7704  ;;  %v1579_v43 = vperm.slane %v1571_v6, %v8333_v0 }
 0x338   :  { %2257 = vmax.xlane.f32.xlu1 %v2256_v1  ;;  %7910 = vpow2.f32 %v2286_v48  ;;  %v1455_v1 = vperm.slane %v1447_v11, %v8333_v0  ;;  %v7706_v30 = vunpack.i.l.bf16 %v9311_v50 }
 0x33a   :  { %v9281_v42 = vpop.eup %7904  ;;  %v1506_v18 = vrot.slane %v1455_v1, 4 }
 0x33b   :  { %v2316_v52 = vsel %vm2213_vm2, %v9281_v42, 0.0 }
 0x33c   :  { %v9286_v14 = vpop.eup %7906  ;;  %2317 = vadd.xlane.f32.xlu2 %v2316_v52 }
 0x33d   :  { %v2319_v9 = vsel %vm2213_vm2, %v9286_v14, 0.0  ;;  %v9290_v24 = vpop.eup %7908  ;;  %v9303_v40 = vpop.permute.xlu1 %7719 }
 0x33e   :  { %v2313_v13 = vsel %vm2213_vm2, %v9290_v24, 0.0  ;;  %v9295_v25 = vpop.eup %7910 }
 0x33f   :  { %v2322_v38 = vsel %vm2213_vm2, %v9295_v25, 0.0 }
 0x340   :  { %2320 = vadd.xlane.f32.xlu1 %v2319_v9  ;;  %v1604_v9 = vrot.slane %v1575_v59, 4 }
 0x341   :  { %v2237_v7 = vpop.xlane.xlu0 %2236 }
 0x342   :  { %v2269_v47 = vsub.f32 %v9229_v23, %v2237_v7  ;;  %v7697_v23 = vunpack.i.h.bf16 %v9265_v12  ;;  %v11976_v12 = vld [vmem:[#allocation8_spill] sm:$0xff]  ;;  %v2267_v7 = vsub.f32 %v9199_v61, %v9267_v44  ;;  %v1507_v61 = vsel %vm428_vm0, %v1467_v57, %v1506_v18 }
 0x343   :  { %v1558_v4 = vrot.slane %v11976_v12, 4 }
 0x344   :  { %v2292_v45 = vmul.f32 1.442695, %v2269_v47  ;;  %2314 = vadd.xlane.f32.xlu2 %v2313_v13  ;;  %v1556_v37 = vrot.slane %v7697_v23, 4  ;;  %v1494_v13 = vrot.slane %v1451_v63, 4  ;;  %v2288_v44 = vmul.f32 1.442695, %v2267_v7 }
 0x346   :  { %7912 = vpow2.f32 %v2292_v45  ;;  %v1557_v46 = vsel %vm428_vm0, %v1556_v37, %v11976_v12  ;;  %v1492_v45 = vrot.slane %v1463_v27, 4  ;;  %v1495_v8 = vsel %vm428_vm0, %v1463_v27, %v1494_v13 }
 0x347   :  { %v1563_v3 = vperm.slane %v1557_v46, %v8333_v0  ;;  %v9352_v12 = vperm.slane %v1495_v8, %v8374_v31 }
 0x348   :  { %v1493_v54 = vsel %vm428_vm0, %v1492_v45, %v1451_v63 }
 0x349   :  { %v1606_v48 = vrot.slane %v1563_v3, 4  ;;  %v9361_v20 = vperm.slane %v1493_v54, %v8374_v31 }
 0x34b   :  { %v1607_v56 = vsel %vm428_vm0, %v1575_v59, %v1606_v48 }
 0x34c   :  { %v9299_v16 = vpop.eup %7912  ;;  %2323 = vadd.xlane.f32.xlu2 %v2322_v38  ;;  %v1504_v38 = vrot.slane %v1467_v57, 4  ;;  %v9358_v46 = vperm.slane %v1607_v56, %v8374_v31  ;;  %v1546_v57 = vrot.slane %v9352_v12, 4 }
 0x34d   :  { %v2331_v51 = vsel %vm2213_vm2, %v9299_v16, 0.0 }
 0x34e   :  { %2332 = vadd.xlane.f32.xlu0 %v2331_v51  ;;  %v1616_v51 = vrot.slane %v1579_v43, 4  ;;  %v1505_v55 = vsel %vm428_vm0, %v1504_v38, %v1455_v1  ;;  %v1658_v13 = vrot.slane %v9358_v46, 4 }
 0x34f   :  { %v9368_v26 = vperm.slane %v1505_v55, %v8374_v31 }
 0x351   :  { %v1550_v7 = vrot.slane %v9368_v26, 4 }
 0x354   :  { %v7715_v37 = vpop.permute.xlu0 %7714 }
 0x355   :  { %v7717_v32 = vunpack.i.h.bf16 %v7715_v37 }
 0x357   :  { %v1582_v59 = vrot.slane %v7717_v32, 4 }
 0x368   :  { %v2246_v10 = vpop.xlane.xlu1 %2245 }
 0x369   :  { %v2272_v34 = vsub.f32 %v9235_v17, %v2246_v10  ;;  %v1559_v17 = vsel %vm428_vm0, %v7697_v23, %v1558_v4  ;;  %v7707_v10 = vunpack.i.h.bf16 %v9311_v50  ;;  %v9355_v4 = vperm.slane %v1507_v61, %v8374_v31 }
 0x36a   :  { %v1567_v21 = vperm.slane %v1559_v17, %v8333_v0 }
 0x36b   :  { %v2298_v39 = vmul.f32 1.442695, %v2272_v34  ;;  %v7716_v34 = vunpack.i.l.bf16 %v7715_v37  ;;  %v1580_v11 = vrot.slane %v7707_v10, 4 }
 0x36c   :  { %v1618_v33 = vrot.slane %v1567_v21, 4  ;;  %v1617_v36 = vsel %vm428_vm0, %v1616_v51, %v1567_v21  ;;  %v7721_v21 = vunpack.i.l.bf16 %v9303_v40  ;;  %v1583_v51 = vsel %vm428_vm0, %v7707_v10, %v1582_v59 }
 0x36d   :  { %7914 = vpow2.f32 %v2298_v39  ;;  %v9371_v6 = vperm.slane %v1617_v36, %v8374_v31  ;;  %v1470_v63 = vrot.slane %v7716_v34, 4  ;;  %v1591_v36 = vperm.slane %v1583_v51, %v8333_v0 }
 0x36e   :  { %v1619_v35 = vsel %vm428_vm0, %v1579_v43, %v1618_v33  ;;  %v7722_v43 = vunpack.i.h.bf16 %v9303_v40 }
 0x36f   :  { %v9374_v39 = vperm.slane %v1619_v35, %v8374_v31  ;;  %v1662_v38 = vrot.slane %v9371_v6, 4  ;;  %v1471_v18 = vsel %vm428_vm0, %v7706_v30, %v1470_v63 }
 0x370   :  { %v2234_v52 = vpop.xlane.xlu2 %2233  ;;  %v1592_v33 = vrot.slane %v7722_v43, 4  ;;  %v1479_v10 = vperm.slane %v1471_v18, %v8333_v0 }
 0x371   :  { %v2268_v47 = vsub.f32 %v9221_v19, %v2234_v52  ;;  %v1605_v19 = vsel %vm428_vm0, %v1604_v9, %v1563_v3  ;;  %v1468_v3 = vrot.slane %v7706_v30, 4  ;;  %v1581_v52 = vsel %vm428_vm0, %v1580_v11, %v7717_v32 }
 0x372   :  { %v9364_v62 = vperm.slane %v1605_v19, %v8374_v31  ;;  %v1542_v9 = vrot.slane %v9361_v20, 4  ;;  %v1666_v40 = vrot.slane %v9374_v39, 4  ;;  %v1587_v8 = vperm.slane %v1581_v52, %v8333_v0 }
 0x373   :  { %v9337_v23 = vpop.eup %7914  ;;  %v2290_v22 = vmul.f32 1.442695, %v2268_v47  ;;  %v1469_v48 = vsel %vm428_vm0, %v1468_v3, %v7716_v34  ;;  %v1480_v19 = vrot.slane %v7721_v21, 4 }
 0x374   :  { %v2340_v53 = vsel %vm2213_vm2, %v9337_v23, 0.0  ;;  %v1654_v47 = vrot.slane %v9364_v62, 4  ;;  %v1475_v56 = vperm.slane %v1469_v48, %v8333_v0  ;;  %v1630_v11 = vrot.slane %v1587_v8, 4 }
 0x375   :  { %7916 = vpow2.f32 %v2290_v22  ;;  %2341 = vadd.xlane.f32.xlu0 %v2340_v53 }
 0x376   :  { %7918 = vpow2.f32 %v2288_v44  ;;  %v1518_v3 = vrot.slane %v1475_v56, 4 }
 0x378   :  { %v2243_v15 = vpop.xlane.xlu2 %2242 }
 0x379   :  { %v2271_v50 = vsub.f32 %v9215_v2, %v2243_v15  ;;  %v1554_v2 = vrot.slane %v9355_v4, 4 }
 0x37b   :  { %v9376_v17 = vpop.eup %7916  ;;  %v2296_v27 = vmul.f32 1.442695, %v2271_v50 }
 0x37c   :  { %v2328_v1 = vsel %vm2213_vm2, %v9376_v17, 0.0  ;;  %v9390_v45 = vpop.eup %7918 }
 0x37d   :  { %7920 = vpow2.f32 %v2296_v27  ;;  %2329 = vadd.xlane.f32.xlu1 %v2328_v1  ;;  %v2325_v30 = vsel %vm2213_vm2, %v9390_v45, 0.0 }
 0x37f   :  { %v2240_v22 = vpop.xlane.xlu0 %2239 }
 0x380   :  { %v2270_v37 = vsub.f32 %v9211_v5, %v2240_v22  ;;  %v7725_v53 = vpop.permute.xlu1 %7724  ;;  %v2249_v61 = vpop.xlane.xlu2 %2248 }
 0x381   :  { %v7727_v44 = vunpack.i.h.bf16 %v7725_v53  ;;  %v7726_v54 = vunpack.i.l.bf16 %v7725_v53  ;;  %v2273_v55 = vsub.f32 %v9237_v58, %v2249_v61 }
 0x382   :  { %v2294_v35 = vmul.f32 1.442695, %v2270_v37 }
 0x383   :  { %v9404_v32 = vpop.eup %7920  ;;  %v1593_v34 = vsel %vm428_vm0, %v1592_v33, %v7727_v44  ;;  %v1594_v5 = vrot.slane %v7727_v44, 4  ;;  %v1481_v15 = vsel %vm428_vm0, %v1480_v19, %v7726_v54  ;;  %v1482_v50 = vrot.slane %v7726_v54, 4 }
 0x384   :  { %v1599_v58 = vperm.slane %v1593_v34, %v8333_v0  ;;  %v1487_v59 = vperm.slane %v1481_v15, %v8333_v0  ;;  %v2300_v1 = vmul.f32 1.442695, %v2273_v55  ;;  %v2337_v52 = vsel %vm2213_vm2, %v9404_v32, 0.0 }
 0x385   :  { %v1595_v63 = vsel %vm428_vm0, %v7722_v43, %v1594_v5  ;;  %v1483_v27 = vsel %vm428_vm0, %v7721_v21, %v1482_v50  ;;  %2326 = vadd.xlane.f32.xlu1 %v2325_v30  ;;  %2338 = vadd.xlane.f32.xlu0 %v2337_v52  ;;  %v1530_v33 = vrot.slane %v1479_v10, 4  ;;  %7922 = vpow2.f32 %v2294_v35 }
 0x386   :  { %v1603_v48 = vperm.slane %v1595_v63, %v8333_v0  ;;  %v1628_v51 = vrot.slane %v1599_v58, 4  ;;  %v1491_v18 = vperm.slane %v1483_v27, %v8333_v0  ;;  %v1516_v22 = vrot.slane %v1487_v59, 4 }
 0x387   :  { %v1519_v37 = vsel %vm428_vm0, %v1487_v59, %v1518_v3  ;;  %v1631_v43 = vsel %vm428_vm0, %v1599_v58, %v1630_v11  ;;  %v9418_v53 = vpop.xlane.xlu0 %2254  ;;  %7924 = vpow2.f32 %v2300_v1  ;;  %v1642_v50 = vrot.slane %v1591_v36, 4 }
 0x388   :  { %v1640_v21 = vrot.slane %v1603_v48, 4  ;;  %v1517_v61 = vsel %vm428_vm0, %v1516_v22, %v1475_v56  ;;  %v1527_v19 = vperm.slane %v1519_v37, %v8374_v31  ;;  %v1528_v44 = vrot.slane %v1491_v18, 4  ;;  %v2252_v37 = vpop.xlane.xlu2 %2251 }
 0x389   :  { %v1523_v54 = vperm.slane %v1517_v61, %v8374_v31  ;;  %v1531_v55 = vsel %vm428_vm0, %v1491_v18, %v1530_v33  ;;  %v1629_v30 = vsel %vm428_vm0, %v1628_v51, %v1587_v8  ;;  %v1639_v15 = vperm.slane %v1631_v43, %v8374_v31 }
 0x38a   :  { %v1529_v35 = vsel %vm428_vm0, %v1528_v44, %v1479_v10  ;;  %v1539_v34 = vperm.slane %v1531_v55, %v8374_v31  ;;  %v1544_v5 = vrot.slane %v1527_v19, 4  ;;  %v9432_v11 = vsel %vm428_vm0, %v1527_v19, %v1546_v57 }
 0x38b   :  { %v1535_v56 = vperm.slane %v1529_v35, %v8374_v31  ;;  %v9435_v3 = vperm.slane %v1629_v30, %v8374_v31  ;;  %v1540_v8 = vrot.slane %v1523_v54, 4  ;;  %v9440_v10 = vsel %vm428_vm0, %v1523_v54, %v1542_v9  ;;  %v9443_v63 = vpop.eup %7922 }
 0x38c   :  { %v1552_v58 = vrot.slane %v1539_v34, 4  ;;  %v1641_v59 = vsel %vm428_vm0, %v1640_v21, %v1591_v36  ;;  %v9447_v27 = vsel %vm428_vm0, %v1544_v5, %v9352_v12  ;;  %v9452_v57 = vsel %vm428_vm0, %v1539_v34, %v1554_v2 }
 0x38d   :  { %v1643_v1 = vsel %vm428_vm0, %v1603_v48, %v1642_v50  ;;  %v1647_v52 = vperm.slane %v1641_v59, %v8374_v31  ;;  %v1548_v9 = vrot.slane %v1535_v56, 4  ;;  %v1652_v36 = vrot.slane %v9435_v3, 4  ;;  %v9458_v22 = vpop.eup %7924 }
 0x38e   :  { %v1651_v51 = vperm.slane %v1643_v1, %v8374_v31  ;;  %v1656_v18 = vrot.slane %v1639_v15, 4  ;;  %v9462_v12 = vsel %vm428_vm0, %v1552_v58, %v9355_v4  ;;  %v1655_v2 = vsel %vm428_vm0, %v9435_v3, %v1654_v47 }
 0x38f   :  { %v1659_v48 = vsel %vm428_vm0, %v1639_v15, %v1658_v13  ;;  %v1660_v33 = vrot.slane %v1647_v52, 4  ;;  %v1668_v61 = vrot.slane %v9447_v27, 4  ;;  %v1680_v4 = vrot.slane %v9432_v11, 4  ;;  %v2261_v19 = vpop.xlane.xlu0 %2260 }
 0x390   :  { %v9473_v43 = vsel %vm428_vm0, %v1656_v18, %v9358_v46  ;;  %v1664_v21 = vrot.slane %v1651_v51, 4  ;;  %v9480_v47 = vsel %vm428_vm0, %v1651_v51, %v1666_v40  ;;  %v1682_v44 = vrot.slane %v9440_v10, 4 }
 0x391   :  { %v1704_v13 = vrot.slane %v9452_v57, 4  ;;  %v1780_v54 = vrot.slane %v9473_v43, 4  ;;  %v1792_v55 = vrot.slane %v1659_v48, 4  ;;  %v1794_v30 = vrot.slane %v1655_v2, 4 }
 0x392   :  { %v9487_v46 = vsel %vm428_vm0, %v1664_v21, %v9374_v39  ;;  %v2274_v35 = vsub.f32 %v9223_v41, %v2252_v37  ;;  %v2275_v34 = vsub.f32 %v9225_v49, %v9418_v53  ;;  %v2334_v40 = vsel %vm2213_vm2, %v9443_v63, 0.0 }
 0x393   :  { %v2343_v5 = vsel %vm2213_vm2, %v9458_v22, 0.0  ;;  %v2277_v15 = vsub.f32 %v9243_v60, %v2261_v19  ;;  %v1816_v50 = vrot.slane %v9480_v47, 4  ;;  %2335 = vadd.xlane.f32.xlu1 %v2334_v40  ;;  %v9500_v39 = vsel %vm428_vm0, %v1540_v8, %v9361_v20 }
 0x394   :  { %v2302_v3 = vmul.f32 1.442695, %v2274_v35  ;;  %2344 = vadd.xlane.f32.xlu2 %v2343_v5  ;;  %v9504_v41 = vsel %vm428_vm0, %v1548_v9, %v9368_v26  ;;  %v9509_v53 = vsel %vm428_vm0, %v1535_v56, %v1550_v7  ;;  %v1669_v60 = vsel %vm428_vm0, %v1668_v61, %v9500_v39 }
 0x395   :  { %v2308_v49 = vmul.f32 1.442695, %v2277_v15  ;;  %v1681_v58 = vsel %vm428_vm0, %v1680_v4, %v9440_v10  ;;  %v9516_v59 = vsel %vm428_vm0, %v1659_v48, %v1794_v30  ;;  %v1675_v20 = vperm.slane %v1669_v60, %v8333_v0 }
 0x396   :  { %v1687_v8 = vperm.slane %v1681_v58, %v8333_v0  ;;  %v1692_v1 = vrot.slane %v9462_v12, 4  ;;  %v9521_v9 = vmul.f32 1.442695, %v2275_v34  ;;  %7926 = vpow2.f32 %v2302_v3 }
 0x397   :  { %v1694_v26 = vrot.slane %v9504_v41, 4  ;;  %v1705_v7 = vsel %vm428_vm0, %v1704_v13, %v9509_v53  ;;  %v1706_v51 = vrot.slane %v9509_v53, 4  ;;  %7928 = vpow2.f32 %v2308_v49 }
 0x398   :  { %v1693_v56 = vsel %vm428_vm0, %v1692_v1, %v9504_v41  ;;  %v1711_v18 = vperm.slane %v1705_v7, %v8333_v0  ;;  %v1716_v48 = vrot.slane %v1687_v8, 4  ;;  %v9533_v21 = vsel %vm428_vm0, %v1652_v36, %v9364_v62 }
 0x399   :  { %v1699_v37 = vperm.slane %v1693_v56, %v8333_v0  ;;  %v9538_v61 = vsel %vm428_vm0, %v1647_v52, %v1662_v38  ;;  %v9543_v13 = vsel %vm428_vm0, %v1660_v33, %v9371_v6  ;;  %v1781_v30 = vsel %vm428_vm0, %v1780_v54, %v9533_v21 }
 0x39a   :  { %v1717_v4 = vsel %vm428_vm0, %v1716_v48, %v1675_v20  ;;  %v1740_v19 = vrot.slane %v1711_v18, 4  ;;  %v1782_v62 = vrot.slane %v9533_v21, 4  ;;  %v1793_v36 = vsel %vm428_vm0, %v1792_v55, %v1655_v2 }
 0x39b   :  { %v1723_v35 = vperm.slane %v1717_v4, %v8374_v31  ;;  %v1804_v34 = vrot.slane %v9487_v46, 4  ;;  %v1787_v52 = vperm.slane %v1781_v30, %v8333_v0  ;;  %v1799_v40 = vperm.slane %v1793_v36, %v8333_v0 }
 0x39c   :  { %v1741_v38 = vsel %vm428_vm0, %v1740_v19, %v1699_v37  ;;  %v1817_v6 = vsel %vm428_vm0, %v1816_v50, %v9538_v61  ;;  %v9556_v33 = vpop.eup %7926  ;;  %v1806_v2 = vrot.slane %v9543_v13, 4  ;;  %v1718_v7 = vrot.slane %v1675_v20, 4 }
 0x39d   :  { %v1747_v54 = vperm.slane %v1741_v38, %v8374_v31  ;;  %v1766_v5 = vrot.slane %v1723_v35, 4  ;;  %v1805_v15 = vsel %vm428_vm0, %v1804_v34, %v9543_v13  ;;  %v2346_v55 = vsel %vm2213_vm2, %v9556_v33, 0.0  ;;  %v9566_v58 = vpop.eup %7928 }
 0x39e   :  { %v1811_v3 = vperm.slane %v1805_v15, %v8333_v0  ;;  %v1823_v49 = vperm.slane %v1817_v6, %v8333_v0  ;;  %v1828_v60 = vrot.slane %v1799_v40, 4  ;;  %2347 = vadd.xlane.f32.xlu0 %v2346_v55  ;;  %v1742_v56 = vrot.slane %v1699_v37, 4 }
 0x39f   :  { %v1767_v50 = vsel %vm428_vm0, %v1747_v54, %v1766_v5  ;;  %v1764_v1 = vrot.slane %v1747_v54, 4  ;;  %v1830_v30 = vrot.slane %v1787_v52, 4  ;;  %v1719_v38 = vsel %vm428_vm0, %v1687_v8, %v1718_v7 }
 0x3a0   :  { %v1894_v48 = vpack.c.bf16 %v1767_v50, %v1767_v50  ;;  %v1829_v4 = vsel %vm428_vm0, %v1828_v60, %v1787_v52  ;;  %v1852_v19 = vrot.slane %v1823_v49, 4  ;;  %v1743_v6 = vsel %vm428_vm0, %v1711_v18, %v1742_v56 }
 0x3a1   :  { %v1835_v36 = vperm.slane %v1829_v4, %v8374_v31  ;;  %v1765_v34 = vsel %vm428_vm0, %v1764_v1, %v1723_v35  ;;  %v1727_v20 = vperm.slane %v1719_v38, %v8374_v31  ;;  %v1751_v52 = vperm.slane %v1743_v6, %v8374_v31 }
 0x3a2   :  { %v2449_v15 = vsel %vm2409_vm3, %v1894_v48, 0  ;;  %v1853_v5 = vsel %vm428_vm0, %v1852_v19, %v1811_v3  ;;  %v1892_v54 = vpack.c.bf16 %v1765_v34, %v1765_v34  ;;  %v1831_v60 = vsel %vm428_vm0, %v1799_v40, %v1830_v30 }
 0x3a3   :  { %2458 = vmatpush.bf16.msra.mxu2 %v2449_v15  ;;  %v1859_v37 = vperm.slane %v1853_v5, %v8374_v31  ;;  %v1878_v55 = vrot.slane %v1835_v36, 4  ;;  %v1770_v8 = vrot.slane %v1727_v20, 4  ;;  %v1839_v18 = vperm.slane %v1831_v60, %v8374_v31 }
 0x3a4   :  { %v2411_v35 = vsel %vm2409_vm3, %v1892_v54, 0  ;;  %v1854_v50 = vrot.slane %v1811_v3, 4  ;;  %v2355_v56 = vsel %vm2213_vm2, %v9566_v58, 0.0  ;;  %v1768_v48 = vrot.slane %v1751_v52, 4 }
 0x3a5   :  { %v1879_v1 = vsel %vm428_vm0, %v1859_v37, %v1878_v55  ;;  %2420 = vmatpush.bf16.msra.mxu0 %v2411_v35  ;;  %v1876_v7 = vrot.slane %v1859_v37, 4  ;;  %v2312_v4 = vpop.xlane.xlu0 %2311  ;;  %v1771_v34 = vsel %vm428_vm0, %v1751_v52, %v1770_v8  ;;  %v1882_v30 = vrot.slane %v1839_v18, 4  ;;  %2356 = vadd.xlane.f32.xlu1 %v2355_v56 }
 0x3a6   :  { %v1895_v19 = vpack.c.bf16 %v1879_v1, %v1879_v1  ;;  %v1855_v40 = vsel %vm428_vm0, %v1823_v49, %v1854_v50  ;;  %v1898_v6 = vpack.c.bf16 %v1771_v34, %v1771_v34  ;;  %v1769_v15 = vsel %vm428_vm0, %v1768_v48, %v1727_v20 }
 0x3a7   :  { %v1877_v38 = vsel %vm428_vm0, %v1876_v7, %v1835_v36  ;;  %v1863_v3 = vperm.slane %v1855_v40, %v8374_v31  ;;  %v1896_v37 = vpack.c.bf16 %v1769_v15, %v1769_v15  ;;  %7930 = vrcp.f32 %v2312_v4 }
 0x3a8   :  { %v2468_v5 = vsel %vm2409_vm3, %v1895_v19, 0  ;;  %v1893_v54 = vpack.c.bf16 %v1877_v38, %v1877_v38  ;;  %v2525_v55 = vsel %vm2409_vm3, %v1898_v6, 0  ;;  %v1670_v60 = vrot.slane %v9500_v39, 4 }
 0x3a9   :  { %2477 = vmatpush.bf16.msra.mxu3 %v2468_v5  ;;  %v1883_v52 = vsel %vm428_vm0, %v1863_v3, %v1882_v30  ;;  %v1880_v49 = vrot.slane %v1863_v3, 4  ;;  %2534 = vmatpush.bf16.msrb.mxu2 %v2525_v55  ;;  %v2487_v8 = vsel %vm2409_vm3, %v1896_v37, 0  ;;  %v1683_v20 = vsel %vm428_vm0, %v9432_v11, %v1682_v44 }
 0x3aa   :  { %v2430_v36 = vsel %vm2409_vm3, %v1893_v54, 0  ;;  %v1899_v35 = vpack.c.bf16 %v1883_v52, %v1883_v52  ;;  %v1818_v50 = vrot.slane %v9538_v61, 4  ;;  %2496 = vmatpush.bf16.msrb.mxu0 %v2487_v8  ;;  %v1671_v39 = vsel %vm428_vm0, %v9447_v27, %v1670_v60 }
 0x3ab   :  { %2439 = vmatpush.bf16.msra.mxu1 %v2430_v36  ;;  %v1881_v1 = vsel %vm428_vm0, %v1880_v49, %v1839_v18  ;;  %v2258_v7 = vpop.xlane.xlu1 %2257  ;;  %v9605_v56 = vperm.slane %v1683_v20, %v8333_v0  ;;  %v9610_v11 = vperm.slane %v1671_v39, %v8333_v0  ;;  %v1695_v44 = vsel %vm428_vm0, %v9462_v12, %v1694_v26 }
 0x3ac   :  { %v2544_v48 = vsel %vm2409_vm3, %v1899_v35, 0  ;;  %v1897_v4 = vpack.c.bf16 %v1881_v1, %v1881_v1  ;;  %v2276_v10 = vsub.f32 %v9241_v29, %v2258_v7  ;;  %v1707_v27 = vsel %vm428_vm0, %v9452_v57, %v1706_v51 }
 0x3ad   :  { %2553 = vmatpush.bf16.msrb.mxu3 %v2544_v48  ;;  %v1728_v61 = vrot.slane %v9605_v56, 4  ;;  %v1783_v29 = vsel %vm428_vm0, %v9473_v43, %v1782_v62  ;;  %v7931_v18 = vpop.eup %7930  ;;  %v1703_v41 = vperm.slane %v1695_v44, %v8333_v0  ;;  %v1715_v12 = vperm.slane %v1707_v27, %v8333_v0 }
 0x3ae   :  { %v2506_v19 = vsel %vm2409_vm3, %v1897_v4, 0  ;;  %v2306_v34 = vmul.f32 1.442695, %v2276_v10  ;;  %v2374_v53 = vmul.f32 %v7931_v18, %v9272_v28  ;;  %v1791_v51 = vperm.slane %v1783_v29, %v8333_v0 }
 0x3af   :  { %2515 = vmatpush.bf16.msrb.mxu1 %v2506_v19  ;;  %v2318_v26 = vpop.xlane.xlu2 %2317  ;;  %v1729_v57 = vsel %vm428_vm0, %v1728_v61, %v9610_v11  ;;  %v1803_v43 = vperm.slane %v9516_v59, %v8333_v0  ;;  %v1752_v62 = vrot.slane %v1715_v12, 4  ;;  %v1807_v40 = vsel %vm428_vm0, %v9487_v46, %v1806_v2 }
 0x3b0   :  { %7932 = vpow2.f32 %v2306_v34  ;;  %v1735_v21 = vperm.slane %v1729_v57, %v8374_v31  ;;  %v2390_v30 = vpack.c.bf16 %v2374_v53, %v2374_v53  ;;  %v9640_v28 = vperm.slane %v1807_v40, %v8333_v0 }
 0x3b1   :  { %7934 = vrcp.f32 %v2318_v26  ;;  %v1819_v38 = vsel %vm428_vm0, %v9480_v47, %v1818_v50  ;;  %v1753_v6 = vsel %vm428_vm0, %v1752_v62, %v1703_v41  ;;  %v1840_v15 = vrot.slane %v1803_v43, 4 }
 0x3b2   :  { %v1774_v59 = vrot.slane %v1735_v21, 4  ;;  %v1827_v3 = vperm.slane %v1819_v38, %v8333_v0  ;;  %7936 = vpow2.f32 %v9521_v9  ;;  %7130 = vmatmul.msk.bf16.vlgmr.msra.gmra.mxu0 %vm2213_vm2, %v2390_v30  ;;  %v1759_v46 = vperm.slane %v1753_v6, %v8374_v31 }
 0x3b3   :  { %v2321_v13 = vpop.xlane.xlu1 %2320  ;;  %v1841_v2 = vsel %vm428_vm0, %v1840_v15, %v1791_v51  ;;  %v1754_v55 = vrot.slane %v1703_v41, 4  ;;  %v1842_v44 = vrot.slane %v1791_v51, 4  ;;  %v1730_v19 = vrot.slane %v9610_v11, 4 }
 0x3b4   :  { %7938 = vrcp.f32 %v2321_v13  ;;  %v1864_v5 = vrot.slane %v1827_v3, 4  ;;  %v1772_v54 = vrot.slane %v1759_v46, 4  ;;  %v1775_v47 = vsel %vm428_vm0, %v1759_v46, %v1774_v59 }
 0x3b5   :  { %v1847_v37 = vperm.slane %v1841_v2, %v8374_v31  ;;  %v1902_v7 = vpack.c.bf16 %v1775_v47, %v1775_v47  ;;  %v1755_v10 = vsel %vm428_vm0, %v1715_v12, %v1754_v55  ;;  %v1843_v26 = vsel %vm428_vm0, %v1803_v43, %v1842_v44 }
 0x3b6   :  { %v9652_v52 = vpop.eup %7932  ;;  %v1865_v9 = vsel %vm428_vm0, %v1864_v5, %v9640_v28  ;;  %v1773_v60 = vsel %vm428_vm0, %v1772_v54, %v1735_v21  ;;  %v1763_v53 = vperm.slane %v1755_v10, %v8374_v31  ;;  %v1866_v57 = vrot.slane %v9640_v28, 4 }
 0x3b7   :  { %v7935_v49 = vpop.eup %7934  ;;  %v2352_v36 = vsel %vm2213_vm2, %v9652_v52, 0.0  ;;  %v2315_v35 = vpop.xlane.xlu2 %2314  ;;  %v1871_v8 = vperm.slane %v1865_v9, %v8374_v31  ;;  %v1886_v20 = vrot.slane %v1847_v37, 4  ;;  %v1900_v1 = vpack.c.bf16 %v1773_v60, %v1773_v60 }
 0x3b8   :  { %v2376_v50 = vmul.f32 %v7935_v49, %v9281_v42  ;;  %2353 = vadd.xlane.f32.xlu2 %v2352_v36  ;;  %7940 = vrcp.f32 %v2315_v35  ;;  %v9661_v39 = vpop.eup %7936  ;;  %v2601_v34 = vsel %vm2409_vm3, %v1902_v7, 0  ;;  %v1731_v30 = vsel %vm428_vm0, %v9605_v56, %v1730_v19 }
 0x3b9   :  { %v1887_v48 = vsel %vm428_vm0, %v1871_v8, %v1886_v20  ;;  %v1884_v4 = vrot.slane %v1871_v8, 4  ;;  %v2563_v29 = vsel %vm2409_vm3, %v1900_v1, 0  ;;  %v1776_v43 = vrot.slane %v1763_v53, 4 }
 0x3ba   :  { %v7939_v27 = vpop.eup %7938  ;;  %v2392_v61 = vpack.c.bf16 %v2376_v50, %v2376_v50  ;;  %2572 = vmatpush.bf16.msra.mxu0 %v2563_v29  ;;  %v1903_v42 = vpack.c.bf16 %v1887_v48, %v1887_v48  ;;  %v1851_v28 = vperm.slane %v1843_v26, %v8374_v31  ;;  %v1867_v59 = vsel %vm428_vm0, %v1827_v3, %v1866_v57 }
 0x3bb   :  { %v2377_v18 = vmul.f32 %v7939_v27, %v9286_v14  ;;  %v1885_v41 = vsel %vm428_vm0, %v1884_v4, %v1847_v37  ;;  %v2349_v14 = vsel %vm2213_vm2, %v9661_v39, 0.0  ;;  %v1875_v46 = vperm.slane %v1867_v59, %v8374_v31 }
 0x3bc   :  { %7132 = vmatmul.msk.bf16.vlgmr.msra.gmra.mxu2 %vm2213_vm2, %v2392_v61  ;;  %v2620_v21 = vsel %vm2409_vm3, %v1903_v42, 0  ;;  %v1901_v40 = vpack.c.bf16 %v1885_v41, %v1885_v41  ;;  %v1890_v13 = vrot.slane %v1851_v28, 4 }
 0x3bd   :  { %v2393_v12 = vpack.c.bf16 %v2377_v18, %v2377_v18  ;;  %2610 = vmatpush.bf16.msra.mxu2 %v2601_v34  ;;  %v1888_v7 = vrot.slane %v1875_v46, 4 }
 0x3be   :  { %v7941_v51 = vpop.eup %7940  ;;  %v2582_v15 = vsel %vm2409_vm3, %v1901_v40, 0  ;;  %v1891_v3 = vsel %vm428_vm0, %v1875_v46, %v1890_v13 }
 0x3bf   :  { %v2375_v11 = vmul.f32 %v7941_v51, %v9290_v24  ;;  %7133 = vmatmul.msk.bf16.vlgmr.msra.gmra.mxu3 %vm2213_vm2, %v2393_v12  ;;  %v2324_v62 = vpop.xlane.xlu2 %2323  ;;  %v1739_v24 = vperm.slane %v1731_v30, %v8374_v31  ;;  %v1907_v49 = vpack.c.bf16 %v1891_v3, %v1891_v3  ;;  %v1889_v44 = vsel %vm428_vm0, %v1888_v7, %v1851_v28 }
 0x3c0   :  { %2629 = vmatpush.bf16.msra.mxu3 %v2620_v21  ;;  %2350 = vadd.xlane.f32.xlu2 %v2349_v14  ;;  %7942 = vrcp.f32 %v2324_v62  ;;  %v1905_v29 = vpack.c.bf16 %v1889_v44, %v1889_v44 }
 0x3c1   :  { %v2391_v38 = vpack.c.bf16 %v2375_v11, %v2375_v11  ;;  %v2333_v6 = vpop.xlane.xlu0 %2332  ;;  %v1777_v56 = vsel %vm428_vm0, %v1776_v43, %v1739_v24  ;;  %v2696_v36 = vsel %vm2409_vm3, %v1907_v49, 0  ;;  %v1778_v35 = vrot.slane %v1739_v24, 4 }
 0x3c2   :  { %7944 = vrcp.f32 %v2333_v6  ;;  %v1904_v54 = vpack.c.bf16 %v1777_v56, %v1777_v56  ;;  %v2658_v19 = vsel %vm2409_vm3, %v1905_v29, 0 }
 0x3c3   :  { %7131 = vmatmul.msk.bf16.vlgmr.msra.gmra.mxu1 %vm2213_vm2, %v2391_v38  ;;  %v1779_v8 = vsel %vm428_vm0, %v1763_v53, %v1778_v35 }
 0x3c4   :  { %2591 = vmatpush.bf16.msra.mxu1 %v2582_v15  ;;  %v2639_v9 = vsel %vm2409_vm3, %v1904_v54, 0  ;;  %v1906_v1 = vpack.c.bf16 %v1779_v8, %v1779_v8 }
 0x3c6   :  { %v7943_v2 = vpop.eup %7942  ;;  %v2677_v10 = vsel %vm2409_vm3, %v1906_v1, 0 }
 0x3c7   :  { %v2378_v5 = vmul.f32 %v7943_v2, %v9295_v25 }
 0x3c8   :  { %v7945_v47 = vpop.eup %7944 }
 0x3c9   :  { %v2394_v37 = vpack.c.bf16 %v2378_v5, %v2378_v5  ;;  %v2381_v55 = vmul.f32 %v7945_v47, %v9299_v16 }
 0x3cb   :  { %7134 = vmatmul.msk.bf16.vlgmr.msrb.gmra.mxu0 %vm2213_vm2, %v2394_v37  ;;  %v2397_v60 = vpack.c.bf16 %v2381_v55, %v2381_v55 }
 0x3cc   :  { %2648 = vmatpush.bf16.msrb.mxu0 %v2639_v9 }
 0x3cf   :  { %7137 = vmatmul.msk.bf16.vlgmr.msrb.gmra.mxu3 %vm2213_vm2, %v2397_v60 }
 0x3d0   :  { %2705 = vmatpush.bf16.msrb.mxu3 %v2696_v36 }
 0x3e8   :  { %v2342_v48 = vpop.xlane.xlu0 %2341 }
 0x3f0   :  { %v2330_v25 = vpop.xlane.xlu1 %2329 }
 0x3f1   :  { %7946 = vrcp.f32 %v2330_v25 }
 0x3f7   :  { %v7947_v20 = vpop.eup %7946 }
 0x3f8   :  { %v2380_v16 = vmul.f32 %v7947_v20, %v9376_v17  ;;  %v2327_v50 = vpop.xlane.xlu1 %2326  ;;  %v2339_v17 = vpop.xlane.xlu0 %2338 }
 0x3f9   :  { %7948 = vrcp.f32 %v2327_v50 }
 0x3fa   :  { %v2396_v4 = vpack.c.bf16 %v2380_v16, %v2380_v16  ;;  %7950 = vrcp.f32 %v2342_v48 }
 0x3fb   :  { %7952 = vrcp.f32 %v2339_v17 }
 0x3fc   :  { %7136 = vmatmul.msk.bf16.vlgmr.msrb.gmra.mxu2 %vm2213_vm2, %v2396_v4 }
 0x3fd   :  { %2686 = vmatpush.bf16.msrb.mxu2 %v2677_v10 }
 0x3ff   :  { %v7949_v27 = vpop.eup %7948 }
 0x400   :  { %v2379_v61 = vmul.f32 %v7949_v27, %v9390_v45  ;;  %v7951_v42 = vpop.eup %7950 }
 0x401   :  { %v2384_v34 = vmul.f32 %v7951_v42, %v9337_v23  ;;  %v7953_v26 = vpop.eup %7952 }
 0x402   :  { %v2395_v18 = vpack.c.bf16 %v2379_v61, %v2379_v61  ;;  %v2383_v57 = vmul.f32 %v7953_v26, %v9404_v32 }
 0x403   :  { %v2400_v12 = vpack.c.bf16 %v2384_v34, %v2384_v34 }
 0x404   :  { %7135 = vmatmul.msk.bf16.vlgmr.msrb.gmra.mxu1 %vm2213_vm2, %v2395_v18  ;;  %v2399_v62 = vpack.c.bf16 %v2383_v57, %v2383_v57 }
 0x405   :  { %2667 = vmatpush.bf16.msrb.mxu1 %v2658_v19 }
 0x406   :  { %v2336_v41 = vpop.xlane.xlu1 %2335 }
 0x407   :  { %v2345_v53 = vpop.xlane.xlu2 %2344  ;;  %7954 = vrcp.f32 %v2336_v41 }
 0x408   :  { %7956 = vrcp.f32 %v2345_v53 }
 0x40c   :  { %7140 = vmatmul.msk.bf16.vlgmr.msra.gmra.mxu2 %vm2213_vm2, %v2400_v12 }
 0x40d   :  { %v7955_v45 = vpop.eup %7954 }
 0x40e   :  { %v7957_v51 = vpop.eup %7956  ;;  %v2382_v14 = vmul.f32 %v7955_v45, %v9443_v63 }
 0x40f   :  { %v2385_v11 = vmul.f32 %v7957_v51, %v9458_v22 }
 0x410   :  { %v2398_v21 = vpack.c.bf16 %v2382_v14, %v2382_v14 }
 0x411   :  { %v2401_v40 = vpack.c.bf16 %v2385_v11, %v2385_v11  ;;  %v2348_v23 = vpop.xlane.xlu0 %2347 }
 0x412   :  { %7138 = vmatmul.msk.bf16.vlgmr.msra.gmra.mxu0 %vm2213_vm2, %v2398_v21  ;;  %7958 = vrcp.f32 %v2348_v23 }
 0x413   :  { %7141 = vmatmul.msk.bf16.vlgmr.msra.gmra.mxu3 %vm2213_vm2, %v2401_v40 }
 0x414   :  { %7139 = vmatmul.msk.bf16.vlgmr.msra.gmra.mxu1 %vm2213_vm2, %v2399_v62 }
 0x418   :  { %v2357_v30 = vpop.xlane.xlu1 %2356  ;;  %v7959_v43 = vpop.eup %7958 }
 0x419   :  { %7960 = vrcp.f32 %v2357_v30  ;;  %v2386_v32 = vmul.f32 %v7959_v43, %v9556_v33 }
 0x41b   :  { %v2402_v63 = vpack.c.bf16 %v2386_v32, %v2386_v32 }
 0x41f   :  { %v7961_v28 = vpop.eup %7960 }
 0x420   :  { %v2389_v22 = vmul.f32 %v7961_v28, %v9566_v58 }
 0x422   :  { %v2405_v38 = vpack.c.bf16 %v2389_v22, %v2389_v22  ;;  %7142 = vmatmul.msk.bf16.vlgmr.msrb.gmra.mxu0 %vm2213_vm2, %v2402_v63 }
 0x424   :  { %7145 = vmatmul.msk.bf16.vlgmr.msrb.gmra.mxu3 %vm2213_vm2, %v2405_v38 }
 0x42b   :  { %v2354_v6 = vpop.xlane.xlu2 %2353 }
 0x42c   :  { %7962 = vrcp.f32 %v2354_v6 }
 0x42f   :  { %v2422_v59 = vpop.f32.mrf.mxu0 }
 0x430   :  { %v2713_v3 = vrot.slane %v2422_v59, 4 }
 0x432   :  { %v7963_v24 = vpop.eup %7962 }
 0x433   :  { %v2388_v15 = vmul.f32 %v7963_v24, %v9652_v52  ;;  %v2351_v56 = vpop.xlane.xlu2 %2350 }
 0x434   :  { %7964 = vrcp.f32 %v2351_v56 }
 0x435   :  { %v2404_v46 = vpack.c.bf16 %v2388_v15, %v2388_v15 }
 0x437   :  { %7144 = vmatmul.msk.bf16.vlgmr.msrb.gmra.mxu2 %vm2213_vm2, %v2404_v46  ;;  %v2424_v33 = vpop.f32.mrf.mxu0 }
 0x43a   :  { %v7965_v13 = vpop.eup %7964 }
 0x43b   :  { %v2387_v58 = vmul.f32 %v7965_v13, %v9661_v39 }
 0x43d   :  { %v2403_v2 = vpack.c.bf16 %v2387_v58, %v2387_v58 }
 0x43f   :  { %7143 = vmatmul.msk.bf16.vlgmr.msrb.gmra.mxu1 %vm2213_vm2, %v2403_v2  ;;  %v2460_v5 = vpop.f32.mrf.mxu2 }
 0x440   :  { %v2441_v54 = vpop.f32.mrf.mxu1  ;;  %v2725_v7 = vrot.slane %v2460_v5, 4 }
 0x441   :  { %v2825_v4 = vrot.slane %v2441_v54, 4 }
 0x442   :  { %v2479_v47 = vpop.f32.mrf.mxu3 }
 0x443   :  { %v2837_v35 = vrot.slane %v2479_v47, 4 }
 0x447   :  { %v2462_v37 = vpop.f32.mrf.mxu2 }
 0x448   :  { %v2443_v55 = vpop.f32.mrf.mxu1  ;;  %v2498_v9 = vpop.f32.mrf.mxu0 }
 0x449   :  { %v2711_v52 = vrot.slane %v2498_v9, 4  ;;  %v2714_v49 = vsel %vm428_vm0, %v2498_v9, %v2713_v3 }
 0x44a   :  { %v2481_v60 = vpop.f32.mrf.mxu3  ;;  %v2722_v1 = vperm.slane %v2714_v49, %v8333_v0 }
 0x44b   :  { %v2712_v36 = vsel %vm428_vm0, %v2711_v52, %v2422_v59 }
 0x44c   :  { %v2718_v48 = vperm.slane %v2712_v36, %v8333_v0  ;;  %v2773_v18 = vrot.slane %v2722_v1, 4 }
 0x44e   :  { %v2761_v19 = vrot.slane %v2718_v48, 4 }
 0x450   :  { %v2500_v25 = vpop.f32.mrf.mxu0 }
 0x452   :  { %v2555_v8 = vpop.f32.mrf.mxu3 }
 0x453   :  { %v2835_v39 = vrot.slane %v2555_v8, 4  ;;  %v2838_v20 = vsel %vm428_vm0, %v2555_v8, %v2837_v35 }
 0x454   :  { %v2846_v27 = vperm.slane %v2838_v20, %v8333_v0 }
 0x455   :  { %v2836_v16 = vsel %vm428_vm0, %v2835_v39, %v2479_v47 }
 0x456   :  { %v2842_v44 = vperm.slane %v2836_v16, %v8333_v0  ;;  %v2883_v14 = vrot.slane %v2846_v27, 4 }
 0x458   :  { %v2871_v51 = vrot.slane %v2842_v44, 4 }
 0x45a   :  { %v2557_v50 = vpop.f32.mrf.mxu3 }
 0x47f   :  { %v2536_v10 = vpop.f32.mrf.mxu2 }
 0x480   :  { %v2723_v61 = vrot.slane %v2536_v10, 4  ;;  %v2726_v29 = vsel %vm428_vm0, %v2536_v10, %v2725_v7 }
 0x481   :  { %v2734_v17 = vperm.slane %v2726_v29, %v8333_v0  ;;  %v2517_v42 = vpop.f32.mrf.mxu1 }
 0x482   :  { %v2724_v34 = vsel %vm428_vm0, %v2723_v61, %v2460_v5  ;;  %v2823_v41 = vrot.slane %v2517_v42, 4  ;;  %v2826_v53 = vsel %vm428_vm0, %v2517_v42, %v2825_v4 }
 0x483   :  { %v2730_v12 = vperm.slane %v2724_v34, %v8333_v0  ;;  %v2771_v26 = vrot.slane %v2734_v17, 4  ;;  %v2774_v45 = vsel %vm428_vm0, %v2734_v17, %v2773_v18  ;;  %v2834_v57 = vperm.slane %v2826_v53, %v8333_v0 }
 0x484   :  { %v2824_v11 = vsel %vm428_vm0, %v2823_v41, %v2441_v54  ;;  %v9744_v55 = vperm.slane %v2774_v45, %v8374_v31 }
 0x485   :  { %v2759_v21 = vrot.slane %v2730_v12, 4  ;;  %v2762_v62 = vsel %vm428_vm0, %v2730_v12, %v2761_v19  ;;  %v2772_v40 = vsel %vm428_vm0, %v2771_v26, %v2722_v1  ;;  %v2830_v23 = vperm.slane %v2824_v11, %v8333_v0 }
 0x486   :  { %v2884_v30 = vsel %vm428_vm0, %v2883_v14, %v2834_v57  ;;  %v2885_v63 = vrot.slane %v2834_v57, 4  ;;  %v9747_v49 = vperm.slane %v2762_v62, %v8374_v31  ;;  %v9750_v60 = vperm.slane %v2772_v40, %v8374_v31 }
 0x487   :  { %v2760_v43 = vsel %vm428_vm0, %v2759_v21, %v2718_v48  ;;  %v2872_v32 = vsel %vm428_vm0, %v2871_v51, %v2830_v23  ;;  %v2873_v28 = vrot.slane %v2830_v23, 4  ;;  %v2538_v22 = vpop.f32.mrf.mxu2  ;;  %v9760_v39 = vperm.slane %v2884_v30, %v8374_v31 }
 0x488   :  { %v2886_v6 = vsel %vm428_vm0, %v2846_v27, %v2885_v63  ;;  %v9754_v35 = vperm.slane %v2760_v43, %v8374_v31  ;;  %v9757_v8 = vperm.slane %v2872_v32, %v8374_v31  ;;  %v2821_v16 = vrot.slane %v9744_v55, 4 }
 0x489   :  { %v2874_v38 = vsel %vm428_vm0, %v2842_v44, %v2873_v28  ;;  %v2519_v59 = vpop.f32.mrf.mxu1  ;;  %v9769_v7 = vperm.slane %v2886_v6, %v8374_v31  ;;  %v2813_v10 = vrot.slane %v9747_v49, 4  ;;  %v2817_v44 = vrot.slane %v9750_v60, 4 }
 0x48a   :  { %v9766_v1 = vperm.slane %v2874_v38, %v8374_v31  ;;  %v2809_v29 = vrot.slane %v9754_v35, 4  ;;  %v2921_v18 = vrot.slane %v9757_v8, 4  ;;  %v2929_v17 = vrot.slane %v9760_v39, 4 }
 0x48b   :  { %v2933_v45 = vrot.slane %v9769_v7, 4 }
 0x48c   :  { %v2925_v26 = vrot.slane %v9766_v1, 4 }
 0x48f   :  { %v2612_v24 = vpop.f32.mrf.mxu2  ;;  %v2574_v15 = vpop.f32.mrf.mxu0 }
 0x490   :  { %v2737_v9 = vrot.slane %v2574_v15, 4  ;;  %v2749_v27 = vrot.slane %v2612_v24, 4 }
 0x491   :  { %v2593_v56 = vpop.f32.mrf.mxu1 }
 0x492   :  { %v2849_v34 = vrot.slane %v2593_v56, 4 }
 0x496   :  { %v2631_v46 = vpop.f32.mrf.mxu3 }
 0x497   :  { %v2614_v33 = vpop.f32.mrf.mxu2  ;;  %v2576_v13 = vpop.f32.mrf.mxu0  ;;  %v2861_v36 = vrot.slane %v2631_v46, 4 }
 0x499   :  { %v2595_v58 = vpop.f32.mrf.mxu1 }
 0x49e   :  { %v2633_v2 = vpop.f32.mrf.mxu3 }
 0x49f   :  { %v2650_v5 = vpop.f32.mrf.mxu0 }
 0x4a0   :  { %v2735_v37 = vrot.slane %v2650_v5, 4  ;;  %v2738_v25 = vsel %vm428_vm0, %v2650_v5, %v2737_v9 }
 0x4a1   :  { %v2746_v48 = vperm.slane %v2738_v25, %v8333_v0 }
 0x4a2   :  { %v2736_v20 = vsel %vm428_vm0, %v2735_v37, %v2574_v15 }
 0x4a3   :  { %v2742_v61 = vperm.slane %v2736_v20, %v8333_v0  ;;  %v2797_v57 = vrot.slane %v2746_v48, 4 }
 0x4a5   :  { %v2785_v11 = vrot.slane %v2742_v61, 4 }
 0x4a7   :  { %v2707_v54 = vpop.f32.mrf.mxu3  ;;  %v2652_v47 = vpop.f32.mrf.mxu0 }
 0x4a8   :  { %v2859_v52 = vrot.slane %v2707_v54, 4  ;;  %v2862_v50 = vsel %vm428_vm0, %v2707_v54, %v2861_v36 }
 0x4a9   :  { %v9780_v42 = vperm.slane %v2862_v50, %v8333_v0 }
 0x4aa   :  { %v2860_v4 = vsel %vm428_vm0, %v2859_v52, %v2631_v46 }
 0x4ab   :  { %v2866_v41 = vperm.slane %v2860_v4, %v8333_v0  ;;  %v2907_v23 = vrot.slane %v9780_v42, 4 }
 0x4ad   :  { %v2895_v28 = vrot.slane %v2866_v41, 4 }
 0x4af   :  { %v2709_v3 = vpop.f32.mrf.mxu3 }
 0x4ba   :  { %v2688_v19 = vpop.f32.mrf.mxu2 }
 0x4bb   :  { %v2747_v53 = vrot.slane %v2688_v19, 4  ;;  %v2750_v12 = vsel %vm428_vm0, %v2688_v19, %v2749_v27 }
 0x4bc   :  { %v2758_v51 = vperm.slane %v2750_v12, %v8333_v0  ;;  %v2669_v14 = vpop.f32.mrf.mxu1 }
 0x4bd   :  { %v2748_v21 = vsel %vm428_vm0, %v2747_v53, %v2612_v24  ;;  %v2847_v62 = vrot.slane %v2669_v14, 4  ;;  %v2850_v40 = vsel %vm428_vm0, %v2669_v14, %v2849_v34 }
 0x4be   :  { %v2754_v30 = vperm.slane %v2748_v21, %v8333_v0  ;;  %v2795_v43 = vrot.slane %v2758_v51, 4  ;;  %v2798_v32 = vsel %vm428_vm0, %v2758_v51, %v2797_v57  ;;  %v2858_v38 = vperm.slane %v2850_v40, %v8333_v0 }
 0x4bf   :  { %v2806_v63 = vperm.slane %v2798_v32, %v8374_v31  ;;  %v2848_v22 = vsel %vm428_vm0, %v2847_v62, %v2593_v56 }
 0x4c0   :  { %v2783_v6 = vrot.slane %v2754_v30, 4  ;;  %v2786_v59 = vsel %vm428_vm0, %v2754_v30, %v2785_v11  ;;  %v2796_v24 = vsel %vm428_vm0, %v2795_v43, %v2746_v48  ;;  %v2854_v15 = vperm.slane %v2848_v22, %v8333_v0 }
 0x4c1   :  { %v2794_v46 = vperm.slane %v2786_v59, %v8374_v31  ;;  %v2802_v33 = vperm.slane %v2796_v24, %v8374_v31  ;;  %v2819_v13 = vrot.slane %v2806_v63, 4  ;;  %v2822_v58 = vsel %vm428_vm0, %v2806_v63, %v2821_v16 }
 0x4c2   :  { %v2784_v2 = vsel %vm428_vm0, %v2783_v6, %v2742_v61  ;;  %v2971_v5 = vrot.slane %v2822_v58, 4  ;;  %v2896_v56 = vsel %vm428_vm0, %v2895_v28, %v2854_v15  ;;  %v2897_v54 = vrot.slane %v2854_v15, 4  ;;  %v2690_v47 = vpop.f32.mrf.mxu2 }
 0x4c3   :  { %v2790_v3 = vperm.slane %v2784_v2, %v8374_v31  ;;  %v2811_v37 = vrot.slane %v2794_v46, 4  ;;  %v9805_v9 = vsel %vm428_vm0, %v2794_v46, %v2813_v10  ;;  %v2815_v52 = vrot.slane %v2802_v33, 4 }
 0x4c4   :  { %v2818_v36 = vsel %vm428_vm0, %v2802_v33, %v2817_v44  ;;  %v2820_v25 = vsel %vm428_vm0, %v2819_v13, %v9744_v55  ;;  %v2947_v20 = vrot.slane %v9805_v9, 4  ;;  %v2898_v16 = vsel %vm428_vm0, %v2866_v41, %v2897_v54  ;;  %v2671_v50 = vpop.f32.mrf.mxu1 }
 0x4c5   :  { %v2807_v48 = vrot.slane %v2790_v3, 4  ;;  %v9814_v4 = vsel %vm428_vm0, %v2811_v37, %v9747_v49  ;;  %v2816_v10 = vsel %vm428_vm0, %v2815_v52, %v9750_v60  ;;  %v2959_v27 = vrot.slane %v2820_v25, 4 }
 0x4c6   :  { %v2935_v61 = vrot.slane %v9814_v4, 4  ;;  %v2961_v44 = vrot.slane %v2816_v10, 4  ;;  %v2972_v19 = vsel %vm428_vm0, %v2971_v5, %v2818_v36  ;;  %v2973_v55 = vrot.slane %v2818_v36, 4 }
 0x4c7   :  { %v2960_v34 = vsel %vm428_vm0, %v2959_v27, %v2816_v10  ;;  %v2902_v41 = vperm.slane %v2896_v56, %v8374_v31  ;;  %v2906_v53 = vperm.slane %v2898_v16, %v8374_v31  ;;  %v2908_v12 = vsel %vm428_vm0, %v2907_v23, %v2858_v38 }
 0x4c8   :  { %v9825_v49 = vsel %vm428_vm0, %v2820_v25, %v2961_v44  ;;  %v2974_v60 = vsel %vm428_vm0, %v2822_v58, %v2973_v55  ;;  %v2909_v57 = vrot.slane %v2858_v38, 4  ;;  %v2914_v51 = vperm.slane %v2908_v12, %v8374_v31 }
 0x4c9   :  { %v9830_v14 = vperm.slane %v2974_v60, %v8333_v0  ;;  %v2919_v11 = vrot.slane %v2902_v41, 4  ;;  %v9835_v21 = vsel %vm428_vm0, %v2902_v41, %v2921_v18  ;;  %v2923_v62 = vrot.slane %v2906_v53, 4 }
 0x4ca   :  { %v2910_v40 = vsel %vm428_vm0, %v9780_v42, %v2909_v57  ;;  %v9840_v23 = vsel %vm428_vm0, %v2906_v53, %v2925_v26  ;;  %v2927_v30 = vrot.slane %v2914_v51, 4  ;;  %v2930_v43 = vsel %vm428_vm0, %v2914_v51, %v2929_v17 }
 0x4cb   :  { %v2918_v32 = vperm.slane %v2910_v40, %v8374_v31  ;;  %v9848_v28 = vsel %vm428_vm0, %v2919_v11, %v9757_v8  ;;  %v9852_v18 = vsel %vm428_vm0, %v2923_v62, %v9766_v1  ;;  %v3059_v42 = vrot.slane %v9840_v23, 4 }
 0x4cc   :  { %v9857_v26 = vsel %vm428_vm0, %v2927_v30, %v9760_v39  ;;  %v3047_v63 = vrot.slane %v9852_v18, 4  ;;  %v3049_v17 = vrot.slane %v9848_v28, 4  ;;  %v3061_v22 = vrot.slane %v9835_v21, 4 }
 0x4cd   :  { %v2931_v38 = vrot.slane %v2918_v32, 4  ;;  %v2934_v8 = vsel %vm428_vm0, %v2918_v32, %v2933_v45  ;;  %v3073_v1 = vrot.slane %v9857_v26, 4  ;;  %v3085_v6 = vrot.slane %v2930_v43, 4 }
 0x4ce   :  { %v3083_v59 = vrot.slane %v2934_v8, 4  ;;  %v9868_v24 = vsel %vm428_vm0, %v2807_v48, %v9754_v35  ;;  %v2810_v39 = vsel %vm428_vm0, %v2790_v3, %v2809_v29  ;;  %v2966_v15 = vperm.slane %v2960_v34, %v8333_v0 }
 0x4cf   :  { %v9876_v46 = vsel %vm428_vm0, %v2931_v38, %v9769_v7  ;;  %v3086_v45 = vsel %vm428_vm0, %v2934_v8, %v3085_v6  ;;  %v2936_v33 = vsel %vm428_vm0, %v2935_v61, %v9868_v24  ;;  %v2948_v13 = vsel %vm428_vm0, %v2947_v20, %v2810_v39 }
 0x4d0   :  { %v3071_v58 = vrot.slane %v9876_v46, 4  ;;  %v3084_v2 = vsel %vm428_vm0, %v3083_v59, %v2930_v43  ;;  %v9885_v35 = vperm.slane %v3086_v45, %v8333_v0  ;;  %v2942_v29 = vperm.slane %v2936_v33, %v8333_v0 }
 0x4d1   :  { %v3090_v5 = vperm.slane %v3084_v2, %v8333_v0  ;;  %v2949_v7 = vrot.slane %v2810_v39, 4  ;;  %v2954_v56 = vperm.slane %v2948_v13, %v8333_v0  ;;  %v2978_v54 = vperm.slane %v2972_v19, %v8333_v0 }
 0x4d2   :  { %v3072_v47 = vsel %vm428_vm0, %v3071_v58, %v9857_v26  ;;  %v2985_v3 = vrot.slane %v2942_v29, 4  ;;  %v3009_v37 = vrot.slane %v2966_v15, 4  ;;  %v3048_v52 = vsel %vm428_vm0, %v3047_v63, %v9848_v28 }
 0x4d3   :  { %v3078_v36 = vperm.slane %v3072_v47, %v8333_v0  ;;  %v3054_v25 = vperm.slane %v3048_v52, %v8333_v0  ;;  %v3060_v20 = vsel %vm428_vm0, %v3059_v42, %v9835_v21  ;;  %v2983_v16 = vrot.slane %v2954_v56, 4 }
 0x4d4   :  { %v2986_v50 = vsel %vm428_vm0, %v2954_v56, %v2985_v3  ;;  %v3010_v48 = vsel %vm428_vm0, %v2978_v54, %v3009_v37  ;;  %v3066_v10 = vperm.slane %v3060_v20, %v8333_v0  ;;  %v3007_v27 = vrot.slane %v2978_v54, 4 }
 0x4d5   :  { %v2994_v61 = vperm.slane %v2986_v50, %v8374_v31  ;;  %v3018_v44 = vperm.slane %v3010_v48, %v8374_v31  ;;  %v3097_v19 = vrot.slane %v3054_v25, 4  ;;  %v3121_v55 = vrot.slane %v3078_v36, 4 }
 0x4d6   :  { %v2984_v34 = vsel %vm428_vm0, %v2983_v16, %v2942_v29  ;;  %v3008_v41 = vsel %vm428_vm0, %v3007_v27, %v2966_v15  ;;  %v3095_v53 = vrot.slane %v3066_v10, 4  ;;  %v3119_v12 = vrot.slane %v3090_v5, 4 }
 0x4d7   :  { %v3035_v60 = vrot.slane %v3018_v44, 4  ;;  %v3098_v57 = vsel %vm428_vm0, %v3066_v10, %v3097_v19  ;;  %v3122_v51 = vsel %vm428_vm0, %v3090_v5, %v3121_v55  ;;  %v9909_v11 = vperm.slane %v2984_v34, %v8374_v31 }
 0x4d8   :  { %v3106_v62 = vperm.slane %v3098_v57, %v8374_v31  ;;  %v3130_v40 = vperm.slane %v3122_v51, %v8374_v31  ;;  %v9914_v30 = vperm.slane %v3008_v41, %v8374_v31  ;;  %v3096_v43 = vsel %vm428_vm0, %v3095_v53, %v3054_v25 }
 0x4d9   :  { %v3036_v32 = vsel %vm428_vm0, %v3035_v60, %v2994_v61  ;;  %v3033_v42 = vrot.slane %v9909_v11, 4  ;;  %v9920_v63 = vperm.slane %v3096_v43, %v8374_v31  ;;  %v3120_v38 = vsel %vm428_vm0, %v3119_v12, %v3078_v36 }
 0x4da   :  { %v3147_v8 = vrot.slane %v3130_v40, 4  ;;  %v3031_v6 = vrot.slane %v9914_v30, 4  ;;  %v9925_v59 = vperm.slane %v3120_v38, %v8374_v31  ;;  %v3037_v39 = vrot.slane %v2994_v61, 4 }
 0x4db   :  { %v3034_v15 = vsel %vm428_vm0, %v9914_v30, %v3033_v42  ;;  %v3145_v45 = vrot.slane %v9920_v63, 4  ;;  %v3149_v33 = vrot.slane %v3106_v62, 4  ;;  %v2937_v13 = vrot.slane %v9868_v24, 4 }
 0x4dc   :  { %v3148_v58 = vsel %vm428_vm0, %v3147_v8, %v3106_v62  ;;  %v3143_v2 = vrot.slane %v9925_v59, 4  ;;  %v3038_v29 = vsel %vm428_vm0, %v3018_v44, %v3037_v39  ;;  %v2950_v5 = vsel %vm428_vm0, %v9805_v9, %v2949_v7 }
 0x4dd   :  { %v7733_v56 = vpack.i.bf16 %v3148_v58, %v3036_v32  ;;  %v3146_v54 = vsel %vm428_vm0, %v9925_v59, %v3145_v45  ;;  %v3150_v47 = vsel %vm428_vm0, %v3130_v40, %v3149_v33  ;;  %v2938_v3 = vsel %vm428_vm0, %v9814_v4, %v2937_v13  ;;  %v7544_v59 = vld [vmem:[%s11909_s6] sm:$0xff] }
 0x4de   :  { %v7728_v37 = vpack.i.bf16 %v3146_v54, %v3034_v15  ;;  %v7743_v24 = vpack.i.bf16 %v3150_v47, %v3038_v29  ;;  %v2946_v52 = vperm.slane %v2938_v3, %v8333_v0  ;;  %v2958_v36 = vperm.slane %v2950_v5, %v8333_v0 }
 0x4df   :  { %7734 = vrot.lane.b32.xlu0 %v7733_v56, %s11936_s21  ;;  %v2970_v9 = vperm.slane %v9825_v49, %v8333_v0  ;;  %v3019_v7 = vrot.slane %v9830_v14, 4  ;;  %v3050_v25 = vsel %vm428_vm0, %v9852_v18, %v3049_v17  ;;  %v3062_v4 = vsel %vm428_vm0, %v9840_v23, %v3061_v22 }
 0x4e0   :  { %7729 = vrot.lane.b32.xlu1 %v7728_v37, %s11934_s22  ;;  %7744 = vrot.lane.b32.xlu2 %v7743_v24, %s11935_s23  ;;  %v2995_v20 = vrot.slane %v2958_v36, 4  ;;  %v3058_v49 = vperm.slane %v3050_v25, %v8333_v0  ;;  %v3070_v16 = vperm.slane %v3062_v4, %v8333_v0  ;;  %v3074_v28 = vsel %vm428_vm0, %v9876_v46, %v3073_v1 }
 0x4e1   :  { %v3020_v21 = vsel %vm428_vm0, %v3019_v7, %v2970_v9  ;;  %v3082_v23 = vperm.slane %v3074_v28, %v8333_v0  ;;  %v3131_v18 = vrot.slane %v9885_v35, 4  ;;  %v2997_v17 = vrot.slane %v2946_v52, 4 }
 0x4e2   :  { %v2996_v22 = vsel %vm428_vm0, %v2995_v20, %v2946_v52  ;;  %v3026_v50 = vperm.slane %v3020_v21, %v8374_v31  ;;  %v3107_v48 = vrot.slane %v3070_v16, 4  ;;  %v3021_v10 = vrot.slane %v2970_v9, 4 }
 0x4e3   :  { %v3002_v27 = vperm.slane %v2996_v22, %v8374_v31  ;;  %v3132_v26 = vsel %vm428_vm0, %v3131_v18, %v3082_v23  ;;  %v2998_v61 = vsel %vm428_vm0, %v2958_v36, %v2997_v17  ;;  %v3109_v1 = vrot.slane %v3058_v49, 4 }
 0x4e4   :  { %v3039_v46 = vrot.slane %v3026_v50, 4  ;;  %v3108_v44 = vsel %vm428_vm0, %v3107_v48, %v3058_v49  ;;  %v3138_v19 = vperm.slane %v3132_v26, %v8374_v31  ;;  %v3006_v55 = vperm.slane %v2998_v61, %v8374_v31 }
 0x4e5   :  { %v3114_v34 = vperm.slane %v3108_v44, %v8374_v31  ;;  %v3041_v41 = vrot.slane %v3002_v27, 4  ;;  %v3022_v53 = vsel %vm428_vm0, %v9830_v14, %v3021_v10  ;;  %v3110_v12 = vsel %vm428_vm0, %v3070_v16, %v3109_v1 }
 0x4e6   :  { %v3040_v60 = vsel %vm428_vm0, %v3039_v46, %v3002_v27  ;;  %v3151_v57 = vrot.slane %v3138_v19, 4  ;;  %v3030_v51 = vperm.slane %v3022_v53, %v8374_v31  ;;  %v3118_v62 = vperm.slane %v3110_v12, %v8374_v31 }
 0x4e7   :  { %v3042_v40 = vsel %vm428_vm0, %v3026_v50, %v3041_v41  ;;  %v3153_v43 = vrot.slane %v3114_v34, 4  ;;  %v3133_v32 = vrot.slane %v3082_v23, 4  ;;  %v3045_v42 = vrot.slane %v3006_v55, 4 }
 0x4e8   :  { %v3152_v38 = vsel %vm428_vm0, %v3151_v57, %v3114_v34  ;;  %v3043_v8 = vrot.slane %v3030_v51, 4  ;;  %v3157_v39 = vrot.slane %v3118_v62, 4  ;;  %v3032_v14 = vsel %vm428_vm0, %v3031_v6, %v9909_v11  ;;  %v7888_v57 = vld [vmem:[%s11910_s7] ss:$0 sm:$0xff] }
 0x4e9   :  { %v7738_v15 = vpack.i.bf16 %v3152_v38, %v3040_v60  ;;  %v3154_v45 = vsel %vm428_vm0, %v3138_v19, %v3153_v43  ;;  %v3134_v33 = vsel %vm428_vm0, %v9885_v35, %v3133_v32  ;;  %v3046_v13 = vsel %vm428_vm0, %v3030_v51, %v3045_v42  ;;  %v11978_v38 = vld [vmem:[#allocation6_spill] sm:$0xff] }
 0x4ea   :  { %v7748_v58 = vpack.i.bf16 %v3154_v45, %v3042_v40  ;;  %v3044_v29 = vsel %vm428_vm0, %v3043_v8, %v3006_v55  ;;  %v3142_v5 = vperm.slane %v3134_v33, %v8374_v31  ;;  %v3144_v30 = vsel %vm428_vm0, %v3143_v2, %v9920_v63  ;;  %v7545_v63 = vld [vmem:[%s11909_s6 + $0x8] sm:$0xff]  ;;  %v11977_v40 = vld [vmem:[#allocation5_spill] sm:$0xff] }
 0x4eb   :  { %7739 = vrot.lane.b32.xlu0 %v7738_v15, %s11932_s24  ;;  %3265 = vmatpush.bf16.msra.mxu0 %v7545_v63  ;;  %v8088_v33 = vmov 0.0   ;;  %v7552_v63 = vld [vmem:[%s11913_s10 + $0x30] sm:$0xff] }
 0x4ec   :  { %7749 = vrot.lane.b32.xlu1 %v7748_v58, %s11930_s25  ;;  %v3155_v11 = vrot.slane %v3142_v5, 4  ;;  %v3158_v35 = vsel %vm428_vm0, %v3142_v5, %v3157_v39  ;;  %v55_v39 = vlaneseq }
 0x4ed   :  { %v7758_v6 = vpack.i.bf16 %v3158_v35, %v3046_v13 }
 0x4ee   :  { %v3156_v56 = vsel %vm428_vm0, %v3155_v11, %v3118_v62 }
 0x4ef   :  { %v7753_v54 = vpack.i.bf16 %v3156_v56, %v3044_v29  ;;  %3266 = vmatpush.bf16.msra.mxu0 %v7544_v59 }
 0x4f1   :  { %7754 = vrot.lane.b32.xlu2 %v7753_v54, %s11933_s26  ;;  %v7553_v54 = vld [vmem:[%s11913_s10 + $0x38] sm:$0xff] }
 0x4f2   :  { %3398 = vmatpush.bf16.msra.mxu1 %v7553_v54 }
 0x4f3   :  { %7759 = vrot.lane.b32.xlu0 %v7758_v6, %s11931_s27 }
 0x4f6   :  { %3399 = vmatpush.bf16.msra.mxu1 %v7552_v63 }
 0x53a   :  { %v7745_v24 = vpop.permute.xlu2 %7744 }
 0x53b   :  { %v7747_v49 = vunpack.i.h.bf16 %v7745_v24  ;;  %v7746_v16 = vunpack.i.l.bf16 %v7745_v24  ;;  %v7561_v24 = vld [vmem:[%s11915_s12 + $0x38] sm:$0xff] }
 0x53c   :  { %3483 = vmatpush.bf16.msra.mxu2 %v7561_v24 }
 0x54b   :  { %v7755_v27 = vpop.permute.xlu2 %7754 }
 0x54c   :  { %v7757_v1 = vunpack.i.h.bf16 %v7755_v27  ;;  %v7756_v46 = vunpack.i.l.bf16 %v7755_v27 }
 0x551   :  { %v7735_v2 = vpop.permute.xlu0 %7734 }
 0x552   :  { %v7730_v47 = vpop.permute.xlu1 %7729  ;;  %v7737_v52 = vunpack.i.h.bf16 %v7735_v2  ;;  %v7736_v36 = vunpack.i.l.bf16 %v7735_v2 }
 0x553   :  { %v7732_v3 = vunpack.i.h.bf16 %v7730_v47  ;;  %v7731_v37 = vunpack.i.l.bf16 %v7730_v47  ;;  %v7551_v47 = vld [vmem:[%s11913_s10 + $0x28] sm:$0xff] }
 0x554   :  { %3400 = vmatpush.bf16.msra.mxu1 %v7551_v47 }
 0x555   :  { %v3215_v9 = vsel %vm1908_vm1, %v3032_v14, %v7731_v37  ;;  %v3216_v7 = vsel %vm1908_vm1, %v3144_v30, %v7732_v3  ;;  %v56_v14 = vand.u32 127, %v55_v39  ;;  %v7550_v37 = vld [vmem:[%s11913_s10 + $0x20] sm:$0xff] }
 0x556   :  { %v3217_v25 = vsel %vm2213_vm2, %v3215_v9, %v7736_v36  ;;  %v3218_v4 = vsel %vm2213_vm2, %v3216_v7, %v7737_v52  ;;  %v7549_v9 = vld [vmem:[%s11913_s10 + $0x18] sm:$0xff]  ;;  %v7560_v7 = vld [vmem:[%s11915_s12 + $0x30] sm:$0xff] }
 0x557   :  { %v3220_v18 = vsel %vm3219_vm4, %v3217_v25, %v7746_v16  ;;  %v3221_v17 = vsel %vm3219_vm4, %v3218_v4, %v7747_v49  ;;  %vm57_vm10 = vcmp.lt.s32.totalorder %v56_v14, 32  ;;  %v7548_v49 = vld [vmem:[%s11913_s10 + $0x10] sm:$0xff]  ;;  %3484 = vmatpush.bf16.msra.mxu2 %v7560_v7  ;;  %v7559_v16 = vld [vmem:[%s11915_s12 + $0x28] sm:$0xff]  ;;  %v7585_v7 = vld [vmem:[%s11908_s5 + $0x78] sm:$0xff] }
 0x558   :  { %v10029_v13 = vsel %vm57_vm10, 1.0, %v8088_v33  ;;  %3401 = vmatpush.bf16.msra.mxu1 %v7550_v37 }
 0x55b   :  { %3485 = vmatpush.bf16.msra.mxu2 %v7559_v16 }
 0x55c   :  { %3402 = vmatpush.bf16.msra.mxu1 %v7549_v9  ;;  %v7577_v9 = vld [vmem:[%s11907_s4 + $0x78] sm:$0xff] }
 0x55d   :  { %v7740_v20 = vpop.permute.xlu0 %7739  ;;  %3698 = vmatpush.bf16.msrb.mxu0 %v7577_v9 }
 0x55e   :  { %v7742_v28 = vunpack.i.h.bf16 %v7740_v20  ;;  %v7741_v21 = vunpack.i.l.bf16 %v7740_v20  ;;  %v7750_v23 = vpop.permute.xlu1 %7749 }
 0x55f   :  { %v7752_v22 = vunpack.i.h.bf16 %v7750_v23  ;;  %v7751_v50 = vunpack.i.l.bf16 %v7750_v23  ;;  %v7547_v23 = vld [vmem:[%s11913_s10 + $0x8] sm:$0xff] }
 0x560   :  { %v3223_v48 = vsel %vm3222_vm5, %v3220_v18, %v7741_v21  ;;  %v3224_v10 = vsel %vm3222_vm5, %v3221_v17, %v7742_v28  ;;  %3403 = vmatpush.bf16.msra.mxu1 %v7548_v49  ;;  %v7558_v18 = vld [vmem:[%s11915_s12 + $0x20] sm:$0xff] }
 0x561   :  { %v3226_v26 = vsel %vm3225_vm6, %v3223_v48, %v7751_v50  ;;  %v3227_v61 = vsel %vm3225_vm6, %v3224_v10, %v7752_v22  ;;  %v7546_v10 = vld [vmem:[%s11913_s10] sm:$0xff]  ;;  %3486 = vmatpush.bf16.msra.mxu2 %v7558_v18 }
 0x562   :  { %v3229_v34 = vsel %vm3228_vm7, %v3226_v26, %v7756_v46  ;;  %v3230_v41 = vsel %vm3228_vm7, %v3227_v61, %v7757_v1 }
 0x564   :  { %3404 = vmatpush.bf16.msra.mxu1 %v7547_v23  ;;  %v7583_v23 = vld [vmem:[%s11908_s5 + $0x68] sm:$0xff] }
 0x565   :  { %v7760_v44 = vpop.permute.xlu0 %7759 }
 0x566   :  { %v7762_v19 = vunpack.i.h.bf16 %v7760_v44  ;;  %v7761_v55 = vunpack.i.l.bf16 %v7760_v44  ;;  %v7889_v44 = vld [vmem:[%s11911_s8] ss:$0 sm:$0xff] }
 0x568   :  { %v3232_v53 = vsel %vm3231_vm8, %v3229_v34, %v7761_v55  ;;  %v3233_v12 = vsel %vm3231_vm8, %v3230_v41, %v7762_v19  ;;  %3405 = vmatpush.bf16.msra.mxu1 %v7546_v10 }
 0x569   :  { %v3234_v60 = vpack.c.bf16 %v3233_v12, %v3232_v53  ;;  %v7890_v53 = vld [vmem:[%s11912_s9] ss:$0 sm:$0xff] }
 0x56b   :  { %7154 = vmatmul.msk.bf16.vlgmr.msra.gmra.mxu0 %vm3255_vm9, %v3234_v60 }
 0x56c   :  { %3777 = vmatpush.bf16.msrb.mxu1 %v7585_v7 }
 0x5e8   :  { %v3268_v51 = vpop.f32.mrf.mxu0 }
 0x5e9   :  { %v3269_v62 = vadd.f32 %v7888_v57, %v3268_v51 }
 0x5eb   :  { %v3273_v43 = vadd.f32 %v3269_v62, %v11977_v40  ;;  %v7557_v62 = vld [vmem:[%s11915_s12 + $0x18] sm:$0xff]  ;;  %v7556_v40 = vld [vmem:[%s11915_s12 + $0x10] sm:$0xff] }
 0x5ec   :  { %3487 = vmatpush.bf16.msra.mxu2 %v7557_v62 }
 0x5ed   :  { %3277 = vadd.xlane.f32.xlu1 %v3273_v43 }
 0x5f0   :  { %v3270_v32 = vpop.f32.mrf.mxu0  ;;  %3488 = vmatpush.bf16.msra.mxu2 %v7556_v40 }
 0x5f1   :  { %v3271_v42 = vadd.f32 %v7888_v57, %v3270_v32  ;;  %v7554_v32 = vld [vmem:[%s11915_s12] sm:$0xff] }
 0x5f3   :  { %v3274_v8 = vadd.f32 %v3271_v42, %v11978_v38  ;;  %v7891_v38 = vld [vmem:[%s11914_s11] ss:$0 sm:$0xff] }
 0x5f5   :  { %3279 = vadd.xlane.f32.xlu2 %v3274_v8 }
 0x660   :  { %v3278_v15 = vpop.xlane.xlu1 %3277 }
 0x661   :  { %v3281_v45 = vmul.f32 0.03125, %v3278_v15 }
 0x663   :  { %v3283_v58 = vsub.f32 %v3273_v43, %v3281_v45  ;;  %v7555_v43 = vld [vmem:[%s11915_s12 + $0x8] sm:$0xff] }
 0x664   :  { %3489 = vmatpush.bf16.msra.mxu2 %v7555_v43 }
 0x665   :  { %v3285_v29 = vmul.f32 %v10029_v13, %v3283_v58  ;;  %v7892_v58 = vld [vmem:[%s11916_s13] ss:$0 sm:$0xff] }
 0x667   :  { %v3287_v5 = vmul.f32 %v3285_v29, %v3285_v29 }
 0x668   :  { %v3280_v30 = vpop.xlane.xlu2 %3279  ;;  %3490 = vmatpush.bf16.msra.mxu2 %v7554_v32  ;;  %v7562_v32 = vld [vmem:[%s11906_s3 + $0x40] sm:$0xff] }
 0x669   :  { %v3282_v11 = vmul.f32 0.03125, %v3280_v30  ;;  %3289 = vadd.xlane.f32.xlu0 %v3287_v5 }
 0x66b   :  { %v3284_v35 = vsub.f32 %v3274_v8, %v3282_v11 }
 0x66d   :  { %v3286_v6 = vmul.f32 %v10029_v13, %v3284_v35 }
 0x66f   :  { %v3288_v56 = vmul.f32 %v3286_v6, %v3286_v6 }
 0x671   :  { %3291 = vadd.xlane.f32.xlu1 %v3288_v56 }
 0x6dc   :  { %v3290_v59 = vpop.xlane.xlu0 %3289 }
 0x6dd   :  { %v3293_v2 = vmul.f32 0.03125, %v3290_v59 }
 0x6df   :  { %v3295_v3 = vadd.f32 1e-05, %v3293_v2 }
 0x6e1   :  { %7966 = vrsqrt.f32 %v3295_v3  ;;  %vm3303_vm12 = vweird.f32 %v3295_v3 }
 0x6e4   :  { %v3292_v52 = vpop.xlane.xlu1 %3291 }
 0x6e5   :  { %v3294_v36 = vmul.f32 0.03125, %v3292_v52 }
 0x6e7   :  { %v7967_v25 = vpop.eup %7966  ;;  %v3296_v4 = vadd.f32 1e-05, %v3294_v36  ;;  %v7569_v36 = vld [vmem:[%s11906_s3 + $0x78] sm:$0xff] }
 0x6e8   :  { %v3298_v20 = vmul.f32 %v7967_v25, %v3295_v3  ;;  %vm3304_vm11 = vweird.f32 %v7967_v25  ;;  %3619 = vmatpush.bf16.msra.mxu3 %v7569_v36 }
 0x6e9   :  { %7968 = vrsqrt.f32 %v3296_v4  ;;  %vm3305_vm13 = vmor %vm3303_vm12, %vm3304_vm11  ;;  %vm3313_vm15 = vweird.f32 %v3296_v4 }
 0x6ea   :  { %v3299_v28 = vmul.f32 %v7967_v25, %v3298_v20  ;;  %v7584_v20 = vld [vmem:[%s11908_s5 + $0x70] sm:$0xff] }
 0x6eb   :  { %3778 = vmatpush.bf16.msrb.mxu1 %v7584_v20 }
 0x6ec   :  { %v3300_v21 = vmul.f32 0.5, %v3299_v28  ;;  %v7567_v28 = vld [vmem:[%s11906_s3 + $0x68] sm:$0xff] }
 0x6ee   :  { %v3301_v17 = vsub.f32 1.5, %v3300_v21  ;;  %v7575_v21 = vld [vmem:[%s11907_s4 + $0x68] sm:$0xff] }
 0x6ef   :  { %v7969_v22 = vpop.eup %7968  ;;  %3779 = vmatpush.bf16.msrb.mxu1 %v7583_v23 }
 0x6f0   :  { %v3302_v50 = vmul.f32 %v7967_v25, %v3301_v17  ;;  %v3308_v48 = vmul.f32 %v7969_v22, %v3296_v4  ;;  %vm3314_vm14 = vweird.f32 %v7969_v22  ;;  %v7576_v4 = vld [vmem:[%s11907_s4 + $0x70] sm:$0xff]  ;;  %v7566_v17 = vld [vmem:[%s11906_s3 + $0x60] sm:$0xff] }
 0x6f1   :  { %vm3315_vm10 = vmor %vm3313_vm15, %vm3314_vm14  ;;  %3699 = vmatpush.bf16.msrb.mxu0 %v7576_v4 }
 0x6f2   :  { %v3309_v27 = vmul.f32 %v7969_v22, %v3308_v48  ;;  %v3306_v26 = vsel %vm3305_vm13, %v7967_v25, %v3302_v50  ;;  %v7568_v25 = vld [vmem:[%s11906_s3 + $0x70] sm:$0xff]  ;;  %v7582_v50 = vld [vmem:[%s11908_s5 + $0x60] sm:$0xff] }
 0x6f3   :  { %v3317_v46 = vmul.f32 %v3306_v26, %v3285_v29  ;;  %3620 = vmatpush.bf16.msra.mxu3 %v7568_v25  ;;  %v7573_v26 = vld [vmem:[%s11907_s4 + $0x58] sm:$0xff]  ;;  %3780 = vmatpush.bf16.msrb.mxu1 %v7582_v50 }
 0x6f4   :  { %v3310_v61 = vmul.f32 0.5, %v3309_v27  ;;  %v7565_v27 = vld [vmem:[%s11906_s3 + $0x58] sm:$0xff] }
 0x6f5   :  { %v3322_v41 = vmul.f32 %v7889_v44, %v3317_v46  ;;  %3700 = vmatpush.bf16.msrb.mxu0 %v7575_v21 }
 0x6f6   :  { %v3311_v1 = vsub.f32 1.5, %v3310_v61  ;;  %v7581_v61 = vld [vmem:[%s11908_s5 + $0x58] sm:$0xff] }
 0x6f7   :  { %v3327_v60 = vadd.f32 %v7890_v53, %v3322_v41  ;;  %3621 = vmatpush.bf16.msra.mxu3 %v7567_v28  ;;  %3781 = vmatpush.bf16.msrb.mxu1 %v7581_v61  ;;  %v7580_v41 = vld [vmem:[%s11908_s5 + $0x50] sm:$0xff] }
 0x6f8   :  { %v3312_v19 = vmul.f32 %v7969_v22, %v3311_v1 }
 0x6fa   :  { %v3316_v55 = vsel %vm3315_vm10, %v7969_v22, %v3312_v19  ;;  %v7574_v22 = vld [vmem:[%s11907_s4 + $0x60] sm:$0xff]  ;;  %v7564_v19 = vld [vmem:[%s11906_s3 + $0x50] sm:$0xff] }
 0x6fb   :  { %v3318_v34 = vmul.f32 %v3316_v55, %v3286_v6  ;;  %3622 = vmatpush.bf16.msra.mxu3 %v7566_v17  ;;  %3701 = vmatpush.bf16.msrb.mxu0 %v7574_v22  ;;  %v7572_v55 = vld [vmem:[%s11907_s4 + $0x50] sm:$0xff] }
 0x6fc   :  { %3782 = vmatpush.bf16.msrb.mxu1 %v7580_v41 }
 0x6fd   :  { %v3323_v12 = vmul.f32 %v7889_v44, %v3318_v34 }
 0x6ff   :  { %v3328_v57 = vadd.f32 %v7890_v53, %v3323_v12  ;;  %3623 = vmatpush.bf16.msra.mxu3 %v7565_v27  ;;  %3702 = vmatpush.bf16.msrb.mxu0 %v7573_v26  ;;  %v7563_v12 = vld [vmem:[%s11906_s3 + $0x48] sm:$0xff] }
 0x701   :  { %v3329_v51 = vpack.c.bf16 %v3328_v57, %v3327_v60 }
 0x703   :  { %3406 = vmatmul.bf16.vlgmr.msra.gmra.mxu1 %v3329_v51  ;;  %3624 = vmatpush.bf16.msra.mxu3 %v7564_v19  ;;  %v7579_v51 = vld [vmem:[%s11908_s5 + $0x48] sm:$0xff] }
 0x704   :  { %3703 = vmatpush.bf16.msrb.mxu0 %v7572_v55  ;;  %3783 = vmatpush.bf16.msrb.mxu1 %v7579_v51 }
 0x707   :  { %3625 = vmatpush.bf16.msra.mxu3 %v7563_v12 }
 0x70b   :  { %3626 = vmatpush.bf16.msra.mxu3 %v7562_v32 }
 0x780   :  { %v3407_v42 = vpop.f32.mrf.mxu1 }
 0x781   :  { %v3408_v8 = vadd.f32 %v7891_v38, %v3407_v42  ;;  %v7570_v42 = vld [vmem:[%s11907_s4 + $0x40] sm:$0xff] }
 0x783   :  { %v3412_v15 = vmax.f32 %v3408_v8, 0.0  ;;  %v7578_v8 = vld [vmem:[%s11908_s5 + $0x40] sm:$0xff] }
 0x784   :  { %3784 = vmatpush.bf16.msrb.mxu1 %v7578_v8 }
 0x788   :  { %v3409_v39 = vpop.f32.mrf.mxu1 }
 0x789   :  { %v3410_v14 = vadd.f32 %v7891_v38, %v3409_v39 }
 0x78b   :  { %v3413_v45 = vmax.f32 %v3410_v14, 0.0 }
 0x78d   :  { %v3414_v33 = vpack.c.bf16 %v3413_v45, %v3412_v15 }
 0x78f   :  { %3491 = vmatmul.bf16.vlgmr.msra.gmra.mxu2 %v3414_v33  ;;  %v7893_v33 = vld [vmem:[%s11917_s14] ss:$0 sm:$0xff] }
 0x812   :  { %v3492_v29 = vpop.f32.mrf.mxu2 }
 0x813   :  { %v3493_v5 = vadd.f32 %v7892_v58, %v3492_v29 }
 0x815   :  { %v3497_v30 = vadd.f32 %v3493_v5, %v3327_v60  ;;  %v7571_v60 = vld [vmem:[%s11907_s4 + $0x48] sm:$0xff] }
 0x816   :  { %3704 = vmatpush.bf16.msrb.mxu0 %v7571_v60 }
 0x817   :  { %3501 = vadd.xlane.f32.xlu2 %v3497_v30 }
 0x81a   :  { %v3494_v11 = vpop.f32.mrf.mxu2  ;;  %3705 = vmatpush.bf16.msrb.mxu0 %v7570_v42 }
 0x81b   :  { %v3495_v35 = vadd.f32 %v7892_v58, %v3494_v11  ;;  %v7894_v11 = vld [vmem:[%s11918_s15] ss:$0 sm:$0xff] }
 0x81d   :  { %v3498_v6 = vadd.f32 %v3495_v35, %v3328_v57 }
 0x81f   :  { %3503 = vadd.xlane.f32.xlu0 %v3498_v6 }
 0x88a   :  { %v3502_v56 = vpop.xlane.xlu2 %3501 }
 0x88b   :  { %v3505_v54 = vmul.f32 0.03125, %v3502_v56 }
 0x88d   :  { %v3507_v63 = vsub.f32 %v3497_v30, %v3505_v54 }
 0x88f   :  { %v10094_v59 = vmul.f32 %v10029_v13, %v3507_v63 }
 0x891   :  { %v3511_v2 = vmul.f32 %v10094_v59, %v10094_v59 }
 0x892   :  { %v3504_v47 = vpop.xlane.xlu0 %3503 }
 0x893   :  { %v3506_v3 = vmul.f32 0.03125, %v3504_v47  ;;  %3513 = vadd.xlane.f32.xlu1 %v3511_v2 }
 0x895   :  { %v3508_v37 = vsub.f32 %v3498_v6, %v3506_v3 }
 0x897   :  { %v10099_v24 = vmul.f32 %v10029_v13, %v3508_v37 }
 0x899   :  { %v3512_v52 = vmul.f32 %v10099_v24, %v10099_v24 }
 0x89b   :  { %3515 = vadd.xlane.f32.xlu2 %v3512_v52 }
 0x906   :  { %v3514_v49 = vpop.xlane.xlu1 %3513 }
 0x907   :  { %v3517_v16 = vmul.f32 0.03125, %v3514_v49 }
 0x909   :  { %v3519_v18 = vadd.f32 1e-05, %v3517_v16 }
 0x90b   :  { %7970 = vrsqrt.f32 %v3519_v18  ;;  %vm3527_vm12 = vweird.f32 %v3519_v18 }
 0x90e   :  { %v3516_v48 = vpop.xlane.xlu2 %3515 }
 0x90f   :  { %v3518_v10 = vmul.f32 0.03125, %v3516_v48 }
 0x911   :  { %v7971_v1 = vpop.eup %7970  ;;  %v3520_v46 = vadd.f32 1e-05, %v3518_v10 }
 0x912   :  { %v3522_v44 = vmul.f32 %v7971_v1, %v3519_v18  ;;  %vm3528_vm11 = vweird.f32 %v7971_v1 }
 0x913   :  { %7972 = vrsqrt.f32 %v3520_v46  ;;  %vm3529_vm13 = vmor %vm3527_vm12, %vm3528_vm11  ;;  %vm3537_vm15 = vweird.f32 %v3520_v46 }
 0x914   :  { %v3523_v34 = vmul.f32 %v7971_v1, %v3522_v44 }
 0x916   :  { %v3524_v53 = vmul.f32 0.5, %v3523_v34 }
 0x918   :  { %v3525_v57 = vsub.f32 1.5, %v3524_v53 }
 0x919   :  { %v7973_v62 = vpop.eup %7972 }
 0x91a   :  { %v3526_v40 = vmul.f32 %v7971_v1, %v3525_v57  ;;  %v3532_v43 = vmul.f32 %v7973_v62, %v3520_v46  ;;  %vm3538_vm14 = vweird.f32 %v7973_v62 }
 0x91b   :  { %vm3539_vm10 = vmor %vm3537_vm15, %vm3538_vm14 }
 0x91c   :  { %v3533_v38 = vmul.f32 %v7973_v62, %v3532_v43  ;;  %v3530_v39 = vsel %vm3529_vm13, %v7971_v1, %v3526_v40 }
 0x91d   :  { %v3541_v45 = vmul.f32 %v3530_v39, %v10094_v59 }
 0x91e   :  { %v3534_v14 = vmul.f32 0.5, %v3533_v38 }
 0x91f   :  { %v3546_v30 = vmul.f32 %v7893_v33, %v3541_v45 }
 0x920   :  { %v3535_v15 = vsub.f32 1.5, %v3534_v14 }
 0x921   :  { %v10183_v6 = vadd.f32 %v7894_v11, %v3546_v30 }
 0x922   :  { %v3536_v58 = vmul.f32 %v7973_v62, %v3535_v15 }
 0x924   :  { %v3540_v29 = vsel %vm3539_vm10, %v7973_v62, %v3536_v58 }
 0x925   :  { %v3542_v5 = vmul.f32 %v3540_v29, %v10099_v24 }
 0x927   :  { %v3547_v35 = vmul.f32 %v7893_v33, %v3542_v5 }
 0x929   :  { %v10185_v56 = vadd.f32 %v7894_v11, %v3547_v35 }
 0x92b   :  { %v3553_v54 = vpack.c.bf16 %v10185_v56, %v10183_v6 }
 0x92d   :  { %3627 = vmatmul.bf16.vlgmr.msra.gmra.mxu3 %v3553_v54  ;;  %3706 = vmatmul.bf16.vlgmr.msrb.gmra.mxu0 %v3553_v54 }
 0x92e   :  { %3785 = vmatmul.bf16.vlgmr.msrb.gmra.mxu1 %v3553_v54 }
 0x9aa   :  { %v10189_v63 = vpop.f32.mrf.mxu0 }
 0x9ab   :  { %v10218_v24 = vpop.f32.mrf.mxu1  ;;  %v4345_v17 = vrot.slane %v10189_v63, 4 }
 0x9b0   :  { %v10191_v59 = vpop.f32.mrf.mxu3 }
 0x9b1   :  { %v7773_v2 = vpack.i.bf16 %v10191_v59, %v10189_v63  ;;  %v3837_v22 = vrot.slane %v10191_v59, 4 }
 0x9b2   :  { %v10203_v3 = vpop.f32.mrf.mxu0 }
 0x9b3   :  { %7774 = vrot.lane.b32.xlu2 %v7773_v2, %s8072_s1  ;;  %7769 = vrot.lane.b32.xlu1 %v7773_v2, %s8073_s2  ;;  %v10226_v52 = vpop.f32.mrf.mxu1  ;;  %v4457_v48 = vrot.slane %v10203_v3, 4 }
 0x9b4   :  { %7764 = vrot.lane.b32.xlu0 %v7773_v2, %s8074_s0  ;;  %v10230_v36 = vpack.i.bf16 %v10226_v52, %v10218_v24 }
 0x9b8   :  { %v10201_v47 = vpop.f32.mrf.mxu3 }
 0x9b9   :  { %v7808_v37 = vpack.i.bf16 %v10201_v47, %v10203_v3  ;;  %v3949_v10 = vrot.slane %v10201_v47, 4 }
 0x9bb   :  { %7794 = vrot.lane.b32.xlu2 %v7773_v2, %s8078_s20  ;;  %7784 = vrot.lane.b32.xlu1 %v7773_v2, %s8075_s17 }
 0x9bc   :  { %7779 = vrot.lane.b32.xlu0 %v7773_v2, %s8077_s19 }
 0x9c3   :  { %7809 = vrot.lane.b32.xlu2 %v7808_v37, %s8072_s1  ;;  %7799 = vrot.lane.b32.xlu1 %v7808_v37, %s8074_s0 }
 0x9c4   :  { %7789 = vrot.lane.b32.xlu0 %v7773_v2, %s8076_s18 }
 0x9cb   :  { %4333 = vrot.lane.b32.xlu2 %v10203_v3, %s8076_s18  ;;  %7814 = vrot.lane.b32.xlu1 %v7808_v37, %s8077_s19 }
 0x9cc   :  { %7804 = vrot.lane.b32.xlu0 %v7808_v37, %s8073_s2 }
 0x9d3   :  { %3825 = vrot.lane.b32.xlu2 %v10201_v47, %s8076_s18  ;;  %4339 = vrot.lane.b32.xlu1 %v10203_v3, %s8078_s20 }
 0x9d4   :  { %4327 = vrot.lane.b32.xlu0 %v10203_v3, %s8075_s17 }
 0x9db   :  { %3831 = vrot.lane.b32.xlu1 %v10201_v47, %s8078_s20 }
 0x9dc   :  { %3819 = vrot.lane.b32.xlu0 %v10201_v47, %s8075_s17 }
 0x9e3   :  { %7829 = vrot.lane.b32.xlu1 %v10230_v36, %s8072_s1  ;;  %s12005_s1 = smov 8  }
 0x9eb   :  { %7839 = vrot.lane.b32.xlu1 %v10230_v36, %s8075_s17  ;;  %s12008_s17 = smov 24  }
 0xa0d   :  { %v10236_v9 = vpop.permute.xlu2 %7774 }
 0xa0e   :  { %v7777_v49 = vunpack.i.h.bf16 %v10236_v9  ;;  %v7776_v16 = vunpack.i.l.bf16 %v10236_v9 }
 0xa10   :  { %v10252_v27 = vrot.slane %v7777_v49, 4  ;;  %v10256_v26 = vrot.slane %v7776_v16, 4 }
 0xa15   :  { %v10238_v7 = vpop.permute.xlu2 %7794 }
 0xa16   :  { %v7797_v23 = vunpack.i.h.bf16 %v10238_v7  ;;  %v7796_v46 = vunpack.i.l.bf16 %v10238_v7 }
 0xa18   :  { %v3871_v34 = vrot.slane %v7797_v23, 4  ;;  %v4379_v39 = vrot.slane %v7796_v46, 4 }
 0xa1d   :  { %v10240_v25 = vpop.permute.xlu2 %7809 }
 0xa1e   :  { %v7811_v28 = vunpack.i.l.bf16 %v10240_v25  ;;  %v7812_v44 = vunpack.i.h.bf16 %v10240_v25 }
 0xa20   :  { %v4481_v61 = vrot.slane %v7811_v28, 4  ;;  %v3973_v14 = vrot.slane %v7812_v44, 4 }
 0xa25   :  { %v7770_v4 = vpop.permute.xlu1 %7769  ;;  %v4334_v50 = vpop.permute.xlu2 %4333 }
 0xa26   :  { %v7765_v20 = vpop.permute.xlu0 %7764  ;;  %v7772_v21 = vunpack.i.h.bf16 %v7770_v4  ;;  %v7771_v18 = vunpack.i.l.bf16 %v7770_v4  ;;  %v4479_v53 = vrot.slane %v4334_v50, 4  ;;  %v4482_v12 = vsel %vm428_vm0, %v4334_v50, %v4481_v61 }
 0xa27   :  { %v7767_v1 = vunpack.i.h.bf16 %v7765_v20  ;;  %v7766_v51 = vunpack.i.l.bf16 %v7765_v20  ;;  %v10269_v45 = vperm.slane %v4482_v12, %v8333_v0 }
 0xa28   :  { %v3835_v19 = vrot.slane %v7772_v21, 4  ;;  %v3838_v55 = vsel %vm428_vm0, %v7772_v21, %v3837_v22  ;;  %v4343_v41 = vrot.slane %v7771_v18, 4  ;;  %v4346_v57 = vsel %vm428_vm0, %v7771_v18, %v4345_v17 }
 0xa29   :  { %v3846_v32 = vperm.slane %v3838_v55, %v8333_v0  ;;  %v3849_v42 = vrot.slane %v7767_v1, 4  ;;  %v10275_v30 = vperm.slane %v4346_v57, %v8333_v0  ;;  %v4357_v37 = vrot.slane %v7766_v51, 4 }
 0xa2a   :  { %v3836_v15 = vsel %vm428_vm0, %v3835_v19, %v10191_v59  ;;  %v4344_v33 = vsel %vm428_vm0, %v4343_v41, %v10189_v63  ;;  %v4480_v7 = vsel %vm428_vm0, %v4479_v53, %v7811_v28 }
 0xa2b   :  { %v3842_v2 = vperm.slane %v3836_v15, %v8333_v0  ;;  %v3897_v59 = vrot.slane %v3846_v32, 4  ;;  %v4350_v4 = vperm.slane %v4344_v33, %v8333_v0  ;;  %v10288_v61 = vperm.slane %v4480_v7, %v8333_v0 }
 0xa2c   :  { %v4405_v41 = vrot.slane %v10275_v30, 4 }
 0xa2d   :  { %v7785_v60 = vpop.permute.xlu1 %7784 }
 0xa2e   :  { %v7787_v62 = vunpack.i.h.bf16 %v7785_v60  ;;  %v7786_v40 = vunpack.i.l.bf16 %v7785_v60  ;;  %v7780_v43 = vpop.permute.xlu0 %7779 }
 0xa2f   :  { %v7782_v38 = vunpack.i.h.bf16 %v7780_v43  ;;  %v7781_v8 = vunpack.i.l.bf16 %v7780_v43 }
 0xa30   :  { %v3873_v58 = vrot.slane %v7787_v62, 4  ;;  %v4381_v11 = vrot.slane %v7786_v40, 4  ;;  %v3872_v63 = vsel %vm428_vm0, %v3871_v34, %v7787_v62  ;;  %v4380_v17 = vsel %vm428_vm0, %v4379_v39, %v7786_v40  ;;  %v3826_v34 = vpop.permute.xlu2 %3825 }
 0xa31   :  { %v3847_v29 = vrot.slane %v7782_v38, 4  ;;  %v3850_v5 = vsel %vm428_vm0, %v7782_v38, %v3849_v42  ;;  %v4355_v54 = vrot.slane %v7781_v8, 4  ;;  %v10300_v60 = vperm.slane %v4380_v17, %v8333_v0 }
 0xa32   :  { %v3858_v35 = vperm.slane %v3850_v5, %v8333_v0  ;;  %v3874_v18 = vsel %vm428_vm0, %v7797_v23, %v3873_v58  ;;  %v4382_v19 = vsel %vm428_vm0, %v7796_v46, %v4381_v11  ;;  %v10295_v23 = vperm.slane %v3872_v63, %v8333_v0 }
 0xa33   :  { %v3848_v20 = vsel %vm428_vm0, %v3847_v29, %v7767_v1  ;;  %v4356_v21 = vsel %vm428_vm0, %v4355_v54, %v7766_v51  ;;  %v3885_v1 = vrot.slane %v3842_v2, 4  ;;  %v3882_v12 = vperm.slane %v3874_v18, %v8333_v0 }
 0xa34   :  { %v3854_v22 = vperm.slane %v3848_v20, %v8333_v0  ;;  %v3895_v50 = vrot.slane %v3858_v35, 4  ;;  %v4362_v55 = vperm.slane %v4356_v21, %v8333_v0  ;;  %v3898_v53 = vsel %vm428_vm0, %v3858_v35, %v3897_v59 }
 0xa35   :  { %v4358_v51 = vsel %vm428_vm0, %v7781_v8, %v4357_v37  ;;  %v4393_v46 = vrot.slane %v4350_v4, 4  ;;  %v10304_v62 = vperm.slane %v4382_v19, %v8333_v0  ;;  %v3971_v43 = vrot.slane %v3826_v34, 4 }
 0xa36   :  { %v3883_v57 = vrot.slane %v3854_v22, 4  ;;  %v3896_v40 = vsel %vm428_vm0, %v3895_v50, %v3846_v32  ;;  %v4529_v42 = vrot.slane %v10288_v61, 4  ;;  %v3886_v38 = vsel %vm428_vm0, %v3854_v22, %v3885_v1  ;;  %v7790_v33 = vpop.permute.xlu0 %7789 }
 0xa37   :  { %v10310_v39 = vperm.slane %v3898_v53, %v8374_v31  ;;  %v4391_v15 = vrot.slane %v4362_v55, 4  ;;  %v3907_v58 = vrot.slane %v10295_v23, 4  ;;  %v4366_v8 = vperm.slane %v4358_v51, %v8333_v0 }
 0xa38   :  { %v4394_v29 = vsel %vm428_vm0, %v4362_v55, %v4393_v46  ;;  %v3974_v5 = vsel %vm428_vm0, %v3826_v34, %v3973_v14  ;;  %v3919_v11 = vrot.slane %v3882_v12, 4  ;;  %v4415_v32 = vrot.slane %v10300_v60, 4  ;;  %v10354_v46 = vpop.permute.xlu1 %7799 }
 0xa39   :  { %v3884_v35 = vsel %vm428_vm0, %v3883_v57, %v3842_v2  ;;  %v10319_v54 = vperm.slane %v3896_v40, %v8374_v31  ;;  %v4427_v59 = vrot.slane %v10304_v62, 4  ;;  %v10323_v37 = vperm.slane %v3886_v38, %v8374_v31 }
 0xa3a   :  { %v3972_v7 = vsel %vm428_vm0, %v3971_v43, %v7812_v44  ;;  %v7792_v63 = vunpack.i.h.bf16 %v7790_v33  ;;  %v3945_v14 = vrot.slane %v10310_v39, 4  ;;  %v4392_v20 = vsel %vm428_vm0, %v4391_v15, %v4350_v4 }
 0xa3b   :  { %v10331_v21 = vperm.slane %v4394_v29, %v8374_v31  ;;  %v7791_v2 = vunpack.i.l.bf16 %v7790_v33  ;;  %v10334_v18 = vperm.slane %v3884_v35, %v8374_v31  ;;  %v4403_v17 = vrot.slane %v4366_v8, 4 }
 0xa3c   :  { %v3859_v22 = vrot.slane %v7792_v63, 4  ;;  %v3862_v50 = vsel %vm428_vm0, %v7792_v63, %v10252_v27  ;;  %v3941_v25 = vrot.slane %v10319_v54, 4  ;;  %v4406_v44 = vsel %vm428_vm0, %v4366_v8, %v4405_v41 }
 0xa3d   :  { %v10341_v19 = vperm.slane %v3972_v7, %v8333_v0  ;;  %v3870_v4 = vperm.slane %v3862_v50, %v8333_v0  ;;  %v3937_v55 = vrot.slane %v10323_v37, 4  ;;  %v10346_v34 = vperm.slane %v4392_v20, %v8374_v31 }
 0xa3e   :  { %v3860_v1 = vsel %vm428_vm0, %v3859_v22, %v7777_v49  ;;  %v4367_v53 = vrot.slane %v7791_v2, 4  ;;  %v4445_v27 = vrot.slane %v10331_v21, 4  ;;  %v3933_v40 = vrot.slane %v10334_v18, 4  ;;  %v10385_v50 = vpop.permute.xlu0 %7804 }
 0xa3f   :  { %v3866_v57 = vperm.slane %v3860_v1, %v8333_v0  ;;  %v3920_v41 = vsel %vm428_vm0, %v3919_v11, %v3870_v4  ;;  %v3921_v51 = vrot.slane %v3870_v4, 4  ;;  %v4404_v43 = vsel %vm428_vm0, %v4403_v17, %v10275_v30 }
 0xa40   :  { %v10360_v38 = vperm.slane %v4406_v44, %v8374_v31  ;;  %v10363_v49 = vperm.slane %v3974_v5, %v8333_v0  ;;  %v3926_v35 = vperm.slane %v3920_v41, %v8374_v31  ;;  %v4368_v30 = vsel %vm428_vm0, %v4367_v53, %v7776_v16 }
 0xa41   :  { %v3908_v33 = vsel %vm428_vm0, %v3907_v58, %v3866_v57  ;;  %v3909_v8 = vrot.slane %v3866_v57, 4  ;;  %v3922_v29 = vsel %vm428_vm0, %v3882_v12, %v3921_v51  ;;  %v10375_v5 = vperm.slane %v4404_v43, %v8374_v31 }
 0xa42   :  { %v3914_v11 = vperm.slane %v3908_v33, %v8374_v31  ;;  %v3930_v7 = vperm.slane %v3922_v29, %v8374_v31  ;;  %v4441_v63 = vrot.slane %v10346_v34, 4  ;;  %v4370_v12 = vsel %vm428_vm0, %v7791_v2, %v10256_v26 }
 0xa43   :  { %v3910_v58 = vsel %vm428_vm0, %v10295_v23, %v3909_v8  ;;  %v4374_v44 = vperm.slane %v4368_v30, %v8333_v0  ;;  %v7802_v4 = vunpack.i.h.bf16 %v10354_v46  ;;  %v7801_v23 = vunpack.i.l.bf16 %v10354_v46 }
 0xa44   :  { %v3918_v17 = vperm.slane %v3910_v58, %v8374_v31  ;;  %v3943_v22 = vrot.slane %v3930_v7, 4  ;;  %v3934_v9 = vsel %vm428_vm0, %v3914_v11, %v3933_v40  ;;  %v3946_v16 = vsel %vm428_vm0, %v3930_v7, %v3945_v14 }
 0xa45   :  { %v3942_v26 = vsel %vm428_vm0, %v3926_v35, %v3941_v25  ;;  %v4378_v53 = vperm.slane %v4370_v12, %v8333_v0  ;;  %v4453_v57 = vrot.slane %v10360_v38, 4  ;;  %v3931_v41 = vrot.slane %v3914_v11, 4 }
 0xa46   :  { %v3938_v1 = vsel %vm428_vm0, %v3918_v17, %v3937_v55  ;;  %v10395_v2 = vsel %vm428_vm0, %v3943_v22, %v10310_v39  ;;  %v4073_v14 = vrot.slane %v3934_v9, 4  ;;  %v7807_v51 = vunpack.i.h.bf16 %v10385_v50  ;;  %v7815_v39 = vpop.permute.xlu1 %7814 }
 0xa47   :  { %v3935_v40 = vrot.slane %v3918_v17, 4  ;;  %v3939_v43 = vrot.slane %v3926_v35, 4  ;;  %v4071_v33 = vrot.slane %v3938_v1, 4  ;;  %v4095_v8 = vrot.slane %v3946_v16, 4 }
 0xa48   :  { %v4449_v55 = vrot.slane %v10375_v5, 4  ;;  %v4083_v25 = vrot.slane %v10395_v2, 4  ;;  %v4097_v29 = vrot.slane %v3942_v26, 4  ;;  %v4417_v7 = vrot.slane %v4374_v44, 4 }
 0xa49   :  { %v4428_v30 = vsel %vm428_vm0, %v4427_v59, %v4378_v53  ;;  %v4429_v58 = vrot.slane %v4378_v53, 4  ;;  %v3961_v11 = vrot.slane %v7802_v4, 4  ;;  %v4469_v35 = vrot.slane %v7801_v23, 4 }
 0xa4a   :  { %v10411_v12 = vsel %vm428_vm0, %v3931_v41, %v10334_v18  ;;  %v4074_v17 = vsel %vm428_vm0, %v3938_v1, %v4073_v14  ;;  %v4096_v22 = vsel %vm428_vm0, %v4095_v8, %v3942_v26  ;;  %v3947_v20 = vrot.slane %v7807_v51, 4 }
 0xa4b   :  { %v10417_v15 = vsel %vm428_vm0, %v3935_v40, %v10323_v37  ;;  %v10421_v59 = vsel %vm428_vm0, %v3939_v43, %v10319_v54  ;;  %v4072_v53 = vsel %vm428_vm0, %v4071_v33, %v3934_v9  ;;  %v4416_v18 = vsel %vm428_vm0, %v4415_v32, %v4374_v44 }
 0xa4c   :  { %v4084_v1 = vsel %vm428_vm0, %v4083_v25, %v10421_v59  ;;  %v4098_v26 = vsel %vm428_vm0, %v3946_v16, %v4097_v29  ;;  %v4418_v41 = vsel %vm428_vm0, %v10300_v60, %v4417_v7  ;;  %v4434_v37 = vperm.slane %v4428_v30, %v8374_v31 }
 0xa4d   :  { %v10435_v54 = vperm.slane %v4074_v17, %v8333_v0  ;;  %v10438_v9 = vperm.slane %v4096_v22, %v8333_v0  ;;  %v4430_v32 = vsel %vm428_vm0, %v10304_v62, %v4429_v58  ;;  %v10444_v16 = vperm.slane %v4072_v53, %v8333_v0  ;;  %v4328_v58 = vpop.permute.xlu0 %4327 }
 0xa4e   :  { %v10448_v40 = vperm.slane %v4416_v18, %v8374_v31  ;;  %v10451_v43 = vperm.slane %v4084_v1, %v8333_v0  ;;  %v10454_v33 = vperm.slane %v4098_v26, %v8333_v0  ;;  %v10457_v8 = vperm.slane %v4418_v41, %v8374_v31 }
 0xa4f   :  { %v7806_v62 = vunpack.i.l.bf16 %v10385_v50  ;;  %v4438_v25 = vperm.slane %v4430_v32, %v8374_v31  ;;  %v4447_v29 = vrot.slane %v4434_v37, 4  ;;  %v3950_v7 = vsel %vm428_vm0, %v7807_v51, %v3949_v10  ;;  %v4340_v32 = vpop.permute.xlu1 %4339 }
 0xa50   :  { %v7817_v30 = vunpack.i.h.bf16 %v7815_v39  ;;  %v10466_v22 = vsel %vm428_vm0, %v4434_v37, %v4449_v55  ;;  %v3948_v53 = vsel %vm428_vm0, %v3947_v20, %v10201_v47  ;;  %v7816_v26 = vunpack.i.l.bf16 %v7815_v39 }
 0xa51   :  { %v4455_v18 = vrot.slane %v7806_v62, 4  ;;  %v10476_v10 = vsel %vm428_vm0, %v10448_v40, %v4441_v63  ;;  %v3958_v51 = vperm.slane %v3950_v7, %v8333_v0  ;;  %v4458_v47 = vsel %vm428_vm0, %v7806_v62, %v4457_v48 }
 0xa52   :  { %v3959_v1 = vrot.slane %v7817_v30, 4  ;;  %v3962_v41 = vsel %vm428_vm0, %v7817_v30, %v3961_v11  ;;  %v3954_v20 = vperm.slane %v3948_v53, %v8333_v0  ;;  %v4467_v37 = vrot.slane %v7816_v26, 4 }
 0xa53   :  { %v4456_v55 = vsel %vm428_vm0, %v4455_v18, %v10203_v3  ;;  %v3970_v11 = vperm.slane %v3962_v41, %v8333_v0  ;;  %v4470_v18 = vsel %vm428_vm0, %v7816_v26, %v4469_v35  ;;  %v10497_v3 = vsel %vm428_vm0, %v10457_v8, %v4445_v27 }
 0xa54   :  { %v3960_v39 = vsel %vm428_vm0, %v3959_v1, %v7802_v4  ;;  %v4462_v7 = vperm.slane %v4456_v55, %v8333_v0  ;;  %v4451_v48 = vrot.slane %v4438_v25, 4  ;;  %v4466_v4 = vperm.slane %v4458_v47, %v8333_v0 }
 0xa55   :  { %v3966_v30 = vperm.slane %v3960_v39, %v8333_v0  ;;  %v4468_v62 = vsel %vm428_vm0, %v4467_v37, %v7801_v23  ;;  %v10505_v53 = vsel %vm428_vm0, %v4447_v29, %v10375_v5  ;;  %v10510_v35 = vsel %vm428_vm0, %v4438_v25, %v4453_v57 }
 0xa56   :  { %v4009_v1 = vrot.slane %v3958_v51, 4  ;;  %v4474_v27 = vperm.slane %v4468_v62, %v8333_v0  ;;  %v3997_v26 = vrot.slane %v3954_v20, 4  ;;  %v4007_v55 = vrot.slane %v3970_v11, 4  ;;  %v3820_v62 = vpop.permute.xlu0 %3819 }
 0xa57   :  { %v3995_v41 = vrot.slane %v3966_v30, 4  ;;  %v4478_v47 = vperm.slane %v4470_v18, %v8333_v0  ;;  %v4505_v39 = vrot.slane %v4462_v7, 4  ;;  %v4493_v5 = vrot.slane %v4328_v58, 4 }
 0xa58   :  { %v10518_v29 = vsel %vm428_vm0, %v4451_v48, %v10360_v38  ;;  %v4603_v25 = vrot.slane %v10510_v35, 4  ;;  %v4517_v37 = vrot.slane %v4466_v4, 4  ;;  %v4010_v18 = vsel %vm428_vm0, %v3970_v11, %v4009_v1  ;;  %v3832_v48 = vpop.permute.xlu1 %3831 }
 0xa59   :  { %v4503_v14 = vrot.slane %v4474_v27, 4  ;;  %v4491_v17 = vrot.slane %v4340_v32, 4  ;;  %v3996_v44 = vsel %vm428_vm0, %v3995_v41, %v3954_v20  ;;  %v3998_v23 = vsel %vm428_vm0, %v3966_v30, %v3997_v26 }
 0xa5a   :  { %v4008_v46 = vsel %vm428_vm0, %v4007_v55, %v3958_v51  ;;  %v4515_v38 = vrot.slane %v4478_v47, 4  ;;  %v4506_v57 = vsel %vm428_vm0, %v4474_v27, %v4505_v39  ;;  %v4494_v63 = vsel %vm428_vm0, %v4340_v32, %v4493_v5 }
 0xa5b   :  { %v4492_v50 = vsel %vm428_vm0, %v4491_v17, %v4328_v58  ;;  %v3985_v28 = vrot.slane %v3820_v62, 4  ;;  %v10531_v60 = vperm.slane %v4010_v18, %v8374_v31  ;;  %v4518_v11 = vsel %vm428_vm0, %v4478_v47, %v4517_v37 }
 0xa5c   :  { %v4498_v20 = vperm.slane %v4492_v50, %v8333_v0  ;;  %v4502_v30 = vperm.slane %v4494_v63, %v8333_v0  ;;  %v10537_v51 = vperm.slane %v3998_v23, %v8374_v31  ;;  %v10540_v1 = vperm.slane %v4008_v46, %v8374_v31 }
 0xa5d   :  { %v4504_v58 = vsel %vm428_vm0, %v4503_v14, %v4462_v7  ;;  %v3983_v17 = vrot.slane %v3832_v48, 4  ;;  %v10544_v32 = vperm.slane %v3996_v44, %v8374_v31  ;;  %v4514_v27 = vperm.slane %v4506_v57, %v8374_v31 }
 0xa5e   :  { %v4516_v26 = vsel %vm428_vm0, %v4515_v38, %v4466_v4  ;;  %v4539_v41 = vrot.slane %v4502_v30, 4  ;;  %v4526_v50 = vperm.slane %v4518_v11, %v8374_v31  ;;  %v4530_v63 = vsel %vm428_vm0, %v4498_v20, %v4529_v42 }
 0xa5f   :  { %v3984_v55 = vsel %vm428_vm0, %v3983_v17, %v3820_v62  ;;  %v3986_v47 = vsel %vm428_vm0, %v3832_v48, %v3985_v28  ;;  %v10555_v14 = vperm.slane %v4504_v58, %v8374_v31  ;;  %v11979_v7 = vrot.slane %v10269_v45, 4 }
 0xa60   :  { %v4540_v44 = vsel %vm428_vm0, %v4539_v41, %v10269_v45  ;;  %v3990_v46 = vperm.slane %v3984_v55, %v8333_v0  ;;  %v4522_v42 = vperm.slane %v4516_v26, %v8374_v31  ;;  %v4527_v39 = vrot.slane %v4498_v20, 4 }
 0xa61   :  { %v4542_v4 = vsel %vm428_vm0, %v4502_v30, %v11979_v7  ;;  %v4546_v5 = vperm.slane %v4540_v44, %v8374_v31  ;;  %v10568_v28 = vsel %vm428_vm0, %v4603_v25, %v10466_v22  ;;  %v4538_v57 = vperm.slane %v4530_v63, %v8374_v31 }
 0xa62   :  { %v3994_v37 = vperm.slane %v3986_v47, %v8333_v0  ;;  %v4019_v45 = vrot.slane %v3990_v46, 4  ;;  %v4049_v62 = vrot.slane %v10537_v51, 4  ;;  %v4053_v18 = vrot.slane %v10540_v1, 4 }
 0xa63   :  { %v4057_v38 = vrot.slane %v10531_v60, 4  ;;  %v4550_v48 = vperm.slane %v4542_v4, %v8374_v31  ;;  %v4045_v11 = vrot.slane %v10544_v32, 4  ;;  %v4553_v20 = vrot.slane %v10555_v14, 4 }
 0xa64   :  { %v4557_v30 = vrot.slane %v4514_v27, 4  ;;  %v4565_v25 = vrot.slane %v4526_v50, 4  ;;  %v4561_v58 = vrot.slane %v4522_v42, 4  ;;  %v4528_v17 = vsel %vm428_vm0, %v4527_v39, %v10288_v61 }
 0xa65   :  { %v4559_v26 = vrot.slane %v4546_v5, 4  ;;  %v11980_v41 = vrot.slane %v10457_v8, 4  ;;  %v4555_v55 = vrot.slane %v4538_v57, 4  ;;  %v4020_v47 = vsel %vm428_vm0, %v4019_v45, %v10341_v19 }
 0xa66   :  { %v11981_v44 = vrot.slane %v10341_v19, 4  ;;  %v4031_v4 = vrot.slane %v3994_v37, 4  ;;  %v4562_v23 = vsel %vm428_vm0, %v4546_v5, %v4561_v58  ;;  %v4566_v61 = vsel %vm428_vm0, %v4550_v48, %v4565_v25 }
 0xa67   :  { %v10584_v63 = vsel %vm428_vm0, %v11980_v41, %v10331_v21  ;;  %v4026_v39 = vperm.slane %v4020_v47, %v8374_v31  ;;  %v10596_v21 = vperm.slane %v4528_v17, %v8374_v31  ;;  %v4563_v41 = vrot.slane %v4550_v48, 4 }
 0xa68   :  { %v4022_v7 = vsel %vm428_vm0, %v3990_v46, %v11981_v44  ;;  %v4032_v45 = vsel %vm428_vm0, %v4031_v4, %v10363_v49  ;;  %v11982_v19 = vrot.slane %v10448_v40, 4  ;;  %v10607_v5 = vsel %vm428_vm0, %v4559_v26, %v4522_v42 }
 0xa69   :  { %v4030_v8 = vperm.slane %v4022_v7, %v8374_v31  ;;  %v11983_v25 = vrot.slane %v10363_v49, 4  ;;  %v4038_v17 = vperm.slane %v4032_v45, %v8374_v31  ;;  %v4567_v48 = vrot.slane %v10584_v63, 4 }
 0xa6a   :  { %v10604_v46 = vsel %vm428_vm0, %v11982_v19, %v10346_v34  ;;  %v10615_v47 = vsel %vm428_vm0, %v4538_v57, %v4557_v30  ;;  %v4715_v44 = vrot.slane %v4566_v61, 4  ;;  %v4717_v7 = vrot.slane %v4562_v23, 4 }
 0xa6b   :  { %v4034_v58 = vsel %vm428_vm0, %v3994_v37, %v11983_v25  ;;  %v10619_v34 = vsel %vm428_vm0, %v4555_v55, %v4514_v27  ;;  %v4043_v42 = vrot.slane %v4026_v39, 4  ;;  %v4047_v26 = vrot.slane %v4030_v8, 4 }
 0xa6c   :  { %v4042_v40 = vperm.slane %v4034_v58, %v8374_v31  ;;  %v4050_v49 = vsel %vm428_vm0, %v4030_v8, %v4049_v62  ;;  %v10624_v37 = vsel %vm428_vm0, %v10596_v21, %v4553_v20  ;;  %v10627_v4 = vsel %vm428_vm0, %v4563_v41, %v4526_v50 }
 0xa6d   :  { %v4705_v57 = vrot.slane %v10607_v5, 4  ;;  %v4551_v45 = vrot.slane %v10596_v21, 4  ;;  %v4046_v27 = vsel %vm428_vm0, %v4026_v39, %v4045_v11  ;;  %v4051_v55 = vrot.slane %v4038_v17, 4 }
 0xa6e   :  { %v4055_v30 = vrot.slane %v4042_v40, 4  ;;  %v4716_v62 = vsel %vm428_vm0, %v4715_v44, %v4562_v23  ;;  %v4718_v20 = vsel %vm428_vm0, %v4566_v61, %v4717_v7  ;;  %v4183_v8 = vrot.slane %v4050_v49, 4 }
 0xa6f   :  { %v10640_v58 = vsel %vm428_vm0, %v4043_v42, %v10544_v32  ;;  %v10644_v19 = vsel %vm428_vm0, %v4047_v26, %v10537_v51  ;;  %v10648_v11 = vsel %vm428_vm0, %v10627_v4, %v4705_v57  ;;  %v4185_v61 = vrot.slane %v4046_v27, 4 }
 0xa70   :  { %v4056_v23 = vsel %vm428_vm0, %v4055_v30, %v10531_v60  ;;  %v4568_v39 = vsel %vm428_vm0, %v4567_v48, %v10604_v46  ;;  %v10655_v44 = vperm.slane %v4716_v62, %v8333_v0  ;;  %v10658_v32 = vperm.slane %v4718_v20, %v8333_v0 }
 0xa71   :  { %v4052_v51 = vsel %vm428_vm0, %v4051_v55, %v10540_v1  ;;  %v4058_v7 = vsel %vm428_vm0, %v4042_v40, %v4057_v38  ;;  %v4054_v42 = vsel %vm428_vm0, %v4038_v17, %v4053_v18  ;;  %v4173_v60 = vrot.slane %v10640_v58, 4 }
 0xa72   :  { %v4184_v57 = vsel %vm428_vm0, %v4183_v8, %v4046_v27  ;;  %v4195_v48 = vrot.slane %v4056_v23, 4  ;;  %v4574_v30 = vperm.slane %v4568_v39, %v8333_v0  ;;  %v11984_v62 = vrot.slane %v10497_v3, 4 }
 0xa73   :  { %v11985_v1 = vrot.slane %v10518_v29, 4  ;;  %v4186_v18 = vsel %vm428_vm0, %v4050_v49, %v4185_v61  ;;  %v4197_v17 = vrot.slane %v4052_v51, 4  ;;  %v4207_v40 = vrot.slane %v4058_v7, 4 }
 0xa74   :  { %v4580_v20 = vsel %vm428_vm0, %v11984_v62, %v10476_v10  ;;  %v4209_v27 = vrot.slane %v4054_v42, 4  ;;  %v4610_v39 = vperm.slane %v10568_v28, %v8333_v0  ;;  %v4617_v26 = vrot.slane %v4574_v30, 4 }
 0xa75   :  { %v4592_v38 = vsel %vm428_vm0, %v11985_v1, %v10505_v53  ;;  %v4586_v55 = vperm.slane %v4580_v20, %v8333_v0  ;;  %v10683_v62 = vsel %vm428_vm0, %v10644_v19, %v4173_v60  ;;  %v10686_v50 = vperm.slane %v4184_v57, %v8333_v0 }
 0xa76   :  { %v4598_v8 = vperm.slane %v4592_v38, %v8333_v0  ;;  %v4569_v49 = vrot.slane %v10604_v46, 4  ;;  %v10690_v1 = vperm.slane %v4186_v18, %v8333_v0  ;;  %v10693_v20 = vsel %vm428_vm0, %v4195_v48, %v4052_v51 }
 0xa77   :  { %v4615_v61 = vrot.slane %v4586_v55, 4  ;;  %v4639_v38 = vrot.slane %v4610_v39, 4  ;;  %v4618_v28 = vsel %vm428_vm0, %v4586_v55, %v4617_v26  ;;  %v10697_v41 = vsel %vm428_vm0, %v4056_v23, %v4197_v17 }
 0xa78   :  { %v10701_v57 = vperm.slane %v4618_v28, %v8374_v31  ;;  %v4641_v25 = vrot.slane %v4598_v8, 4  ;;  %v4208_v46 = vsel %vm428_vm0, %v4207_v40, %v4054_v42  ;;  %v10705_v18 = vsel %vm428_vm0, %v4058_v7, %v4209_v27 }
 0xa79   :  { %v4616_v60 = vsel %vm428_vm0, %v4615_v61, %v4574_v30  ;;  %v4640_v48 = vsel %vm428_vm0, %v4639_v38, %v4598_v8  ;;  %v4570_v30 = vsel %vm428_vm0, %v10584_v63, %v4569_v49  ;;  %v11986_v42 = vrot.slane %v10476_v10, 4 }
 0xa7a   :  { %v4622_v51 = vperm.slane %v4616_v60, %v8374_v31  ;;  %v4646_v26 = vperm.slane %v4640_v48, %v8374_v31  ;;  %v4642_v23 = vsel %vm428_vm0, %v4610_v39, %v4641_v25  ;;  %v4669_v17 = vrot.slane %v10701_v57, 4 }
 0xa7b   :  { %v10715_v61 = vperm.slane %v4642_v23, %v8374_v31  ;;  %v4578_v7 = vperm.slane %v4570_v30, %v8333_v0  ;;  %v4582_v40 = vsel %vm428_vm0, %v10497_v3, %v11986_v42  ;;  %v11987_v25 = vrot.slane %v10505_v53, 4 }
 0xa7c   :  { %v4665_v55 = vrot.slane %v4622_v51, 4  ;;  %v4663_v27 = vrot.slane %v4646_v26, 4  ;;  %v4590_v8 = vperm.slane %v4582_v40, %v8333_v0  ;;  %v11988_v63 = vrot.slane %v10466_v22, 4 }
 0xa7d   :  { %v4594_v39 = vsel %vm428_vm0, %v10518_v29, %v11987_v25  ;;  %v4670_v10 = vsel %vm428_vm0, %v10715_v61, %v4669_v17  ;;  %v11989_v22 = vrot.slane %v10417_v15, 4 }
 0xa7e   :  { %v4606_v49 = vsel %vm428_vm0, %v10510_v35, %v11988_v63  ;;  %v4666_v38 = vsel %vm428_vm0, %v4646_v26, %v4665_v55  ;;  %v4602_v3 = vperm.slane %v4594_v39, %v8333_v0  ;;  %v4664_v60 = vsel %vm428_vm0, %v4663_v27, %v4622_v51 }
 0xa7f   :  { %v4614_v28 = vperm.slane %v4606_v49, %v8333_v0  ;;  %v4793_v53 = vpack.c.bf16 %v4666_v38, %v4666_v38  ;;  %v4797_v48 = vpack.c.bf16 %v4670_v10, %v4670_v10  ;;  %v4627_v23 = vrot.slane %v4590_v8, 4 }
 0xa80   :  { %v4791_v29 = vpack.c.bf16 %v4664_v60, %v4664_v60  ;;  %v4060_v35 = vsel %vm428_vm0, %v11989_v22, %v10411_v12  ;;  %v4107_v26 = vrot.slane %v10444_v16, 4  ;;  %v11990_v39 = vrot.slane %v10438_v9, 4 }
 0xa81   :  { %v4651_v30 = vrot.slane %v4614_v28, 4  ;;  %v5357_v17 = vsel %vm1908_vm1, %v4793_v53, 0  ;;  %v5433_v55 = vsel %vm1908_vm1, %v4797_v48, 0  ;;  %v4628_v42 = vsel %vm428_vm0, %v4627_v23, %v4578_v7 }
 0xa82   :  { %v4066_v51 = vperm.slane %v4060_v35, %v8333_v0  ;;  %v5319_v40 = vsel %vm1908_vm1, %v4791_v29, 0  ;;  %5366 = vmatpush.bf16.xpose.msra.mxu0 %v5357_v17  ;;  %5442 = vmatpush.bf16.xpose.msra.mxu1 %v5433_v55  ;;  %v10748_v27 = vperm.slane %v4628_v42, %v8374_v31  ;;  %v4132_v63 = vsel %vm428_vm0, %v11990_v39, %v10451_v43 }
 0xa83   :  { %v4652_v25 = vsel %vm428_vm0, %v4651_v30, %v4602_v3  ;;  %5328 = vmatpush.bf16.xpose.msrb.mxu2 %v5319_v40  ;;  %v4138_v10 = vperm.slane %v4132_v63, %v8374_v31  ;;  %v4133_v23 = vrot.slane %v10451_v43, 4  ;;  %v4629_v29 = vrot.slane %v4578_v7, 4 }
 0xa84   :  { %v10756_v49 = vperm.slane %v4652_v25, %v8374_v31  ;;  %v4108_v38 = vsel %vm428_vm0, %v4107_v26, %v4066_v51  ;;  %v4109_v60 = vrot.slane %v4066_v51, 4  ;;  %v4673_v53 = vrot.slane %v10748_v27, 4 }
 0xa85   :  { %v4114_v48 = vperm.slane %v4108_v38, %v8374_v31  ;;  %v10764_v30 = vperm.slane %v4208_v46, %v8333_v0  ;;  %v4155_v22 = vrot.slane %v4138_v10, 4  ;;  %v4653_v17 = vrot.slane %v4602_v3, 4 }
 0xa86   :  { %v4110_v35 = vsel %vm428_vm0, %v10444_v16, %v4109_v60  ;;  %v4674_v26 = vsel %vm428_vm0, %v10756_v49, %v4673_v53  ;;  %v4134_v51 = vsel %vm428_vm0, %v10438_v9, %v4133_v23  ;;  %v4630_v40 = vsel %vm428_vm0, %v4590_v8, %v4629_v29 }
 0xa87   :  { %v4157_v55 = vrot.slane %v4114_v48, 4  ;;  %v10771_v42 = vperm.slane %v4110_v35, %v8374_v31  ;;  %v4801_v43 = vpack.c.bf16 %v4674_v26, %v4674_v26  ;;  %v4156_v7 = vsel %vm428_vm0, %v4155_v22, %v4114_v48 }
 0xa88   :  { %v10777_v46 = vperm.slane %v4134_v51, %v8374_v31  ;;  %v4283_v16 = vpack.c.bf16 %v4156_v7, %v4156_v7  ;;  %v10783_v39 = vperm.slane %v4630_v40, %v8374_v31  ;;  %v10787_v63 = vperm.slane %v10693_v20, %v8333_v0 }
 0xa89   :  { %v4158_v3 = vsel %vm428_vm0, %v4138_v10, %v4157_v55  ;;  %v4161_v25 = vrot.slane %v10771_v42, 4  ;;  %v5509_v9 = vsel %vm1908_vm1, %v4801_v43, 0  ;;  %v4654_v60 = vsel %vm428_vm0, %v4614_v28, %v4653_v17 }
 0xa8a   :  { %v4285_v38 = vpack.c.bf16 %v4158_v3, %v4158_v3  ;;  %v10793_v8 = vperm.slane %v10705_v18, %v8333_v0  ;;  %5518 = vmatpush.bf16.xpose.msrb.mxu1 %v5509_v9  ;;  %7363 = vmatmul.msk.bf16.vlgmr.msrb.gmra.mxu2 %vm1908_vm1, %v4283_v16  ;;  %v10799_v53 = vperm.slane %v4654_v60, %v8374_v31  ;;  %v4677_v20 = vrot.slane %v10783_v39, 4 }
 0xa8b   :  { %v4162_v10 = vsel %vm428_vm0, %v10777_v46, %v4161_v25  ;;  %v4243_v48 = vrot.slane %v10764_v30, 4  ;;  %v4552_v18 = vsel %vm428_vm0, %v4551_v45, %v10555_v14  ;;  %v11991_v23 = vrot.slane %v10615_v47, 4 }
 0xa8c   :  { %7365 = vmatmul.msk.bf16.vlgmr.msra.gmra.mxu0 %vm1908_vm1, %v4285_v38  ;;  %v4289_v28 = vpack.c.bf16 %v4162_v10, %v4162_v10  ;;  %v4678_v22 = vsel %vm428_vm0, %v10799_v53, %v4677_v20  ;;  %v11992_v35 = vrot.slane %v10619_v34, 4  ;;  %v4681_v26 = vrot.slane %v4552_v18, 4 }
 0xa8d   :  { %v4692_v29 = vsel %vm428_vm0, %v11991_v23, %v10624_v37  ;;  %v4245_v51 = vrot.slane %v10787_v63, 4  ;;  %v4805_v14 = vpack.c.bf16 %v4678_v22, %v4678_v22  ;;  %v11993_v45 = vrot.slane %v10627_v4, 4 }
 0xa8e   :  { %v4680_v17 = vsel %vm428_vm0, %v11992_v35, %v4552_v18  ;;  %v4698_v55 = vperm.slane %v4692_v29, %v8333_v0  ;;  %7369 = vmatmul.msk.bf16.vlgmr.msra.gmra.mxu1 %vm1908_vm1, %v4289_v28  ;;  %v4751_v16 = vrot.slane %v10655_v44, 4  ;;  %v4667_v3 = vrot.slane %v10715_v61, 4 }
 0xa8f   :  { %v4686_v21 = vperm.slane %v4680_v17, %v8333_v0  ;;  %v4704_v43 = vsel %vm428_vm0, %v11993_v45, %v10607_v5  ;;  %v5585_v25 = vsel %vm1908_vm1, %v4805_v14, 0  ;;  %v4682_v38 = vsel %vm428_vm0, %v10619_v34, %v4681_v26 }
 0xa90   :  { %v4710_v7 = vperm.slane %v4704_v43, %v8333_v0  ;;  %v4727_v40 = vrot.slane %v4698_v55, 4  ;;  %v11994_v60 = vrot.slane %v10624_v37, 4  ;;  %v4668_v20 = vsel %vm428_vm0, %v4667_v3, %v10701_v57 }
 0xa91   :  { %v4729_v9 = vrot.slane %v4686_v21, 4  ;;  %v4795_v23 = vpack.c.bf16 %v4668_v20, %v4668_v20  ;;  %v10846_v29 = vperm.slane %v4682_v38, %v8333_v0 }
 0xa92   :  { %v4694_v4 = vsel %vm428_vm0, %v10615_v47, %v11994_v60  ;;  %5594 = vmatpush.bf16.xpose.msra.mxu1 %v5585_v25  ;;  %v4728_v5 = vsel %vm428_vm0, %v4727_v40, %v4686_v21  ;;  %v4752_v10 = vsel %vm428_vm0, %v4751_v16, %v4710_v7  ;;  %v4753_v61 = vrot.slane %v4710_v7, 4 }
 0xa93   :  { %v4734_v28 = vperm.slane %v4728_v5, %v8374_v31  ;;  %v4758_v18 = vperm.slane %v4752_v10, %v8374_v31  ;;  %v4730_v34 = vsel %vm428_vm0, %v4698_v55, %v4729_v9  ;;  %v10849_v22 = vperm.slane %v4694_v4, %v8333_v0 }
 0xa94   :  { %v4738_v37 = vperm.slane %v4730_v34, %v8374_v31  ;;  %v4754_v47 = vsel %vm428_vm0, %v10655_v44, %v4753_v61  ;;  %v5395_v17 = vsel %vm1908_vm1, %v4795_v23, 0  ;;  %v10855_v55 = vperm.slane %v10648_v11, %v8333_v0 }
 0xa95   :  { %v4775_v57 = vrot.slane %v4758_v18, 4  ;;  %v4777_v35 = vrot.slane %v4734_v28, 4  ;;  %v4762_v26 = vperm.slane %v4754_v47, %v8374_v31  ;;  %v4739_v21 = vrot.slane %v10849_v22, 4 }
 0xa96   :  { %v4781_v14 = vrot.slane %v4738_v37, 4  ;;  %v4763_v44 = vrot.slane %v10658_v32, 4  ;;  %v11995_v40 = vrot.slane %v10644_v19, 4  ;;  %v4244_v23 = vsel %vm428_vm0, %v4243_v48, %v10787_v63 }
 0xa97   :  { %v4776_v45 = vsel %vm428_vm0, %v4775_v57, %v4734_v28  ;;  %v4778_v43 = vsel %vm428_vm0, %v4758_v18, %v4777_v35  ;;  %v4779_v7 = vrot.slane %v4762_v26, 4  ;;  %v4740_v11 = vsel %vm428_vm0, %v4739_v21, %v10846_v29 }
 0xa98   :  { %v4172_v16 = vsel %vm428_vm0, %v11995_v40, %v10640_v58  ;;  %v4792_v3 = vpack.c.bf16 %v4776_v45, %v4776_v45  ;;  %v4794_v25 = vpack.c.bf16 %v4778_v43, %v4778_v43  ;;  %v4782_v9 = vsel %vm428_vm0, %v4762_v26, %v4781_v14 }
 0xa99   :  { %v4780_v38 = vsel %vm428_vm0, %v4779_v7, %v4738_v37  ;;  %v4798_v60 = vpack.c.bf16 %v4782_v9, %v4782_v9  ;;  %v4746_v4 = vperm.slane %v4740_v11, %v8374_v31  ;;  %v4764_v5 = vsel %vm428_vm0, %v4763_v44, %v10855_v55 }
 0xa9a   :  { %v5338_v10 = vsel %vm1908_vm1, %v4792_v3, 0  ;;  %v5376_v19 = vsel %vm1908_vm1, %v4794_v25, 0  ;;  %v4796_v58 = vpack.c.bf16 %v4780_v38, %v4780_v38  ;;  %v4770_v20 = vperm.slane %v4764_v5, %v8374_v31 }
 0xa9b   :  { %5347 = vmatpush.bf16.xpose.msrb.mxu3 %v5338_v10  ;;  %5385 = vmatpush.bf16.xpose.msra.mxu2 %v5376_v19  ;;  %v5452_v61 = vsel %vm1908_vm1, %v4798_v60, 0  ;;  %v4178_v28 = vperm.slane %v4172_v16, %v8333_v0  ;;  %v4219_v18 = vrot.slane %v10686_v50, 4  ;;  %v4250_v47 = vperm.slane %v4244_v23, %v8374_v31 }
 0xa9c   :  { %v5414_v34 = vsel %vm1908_vm1, %v4796_v58, 0  ;;  %v4783_v37 = vrot.slane %v4770_v20, 4  ;;  %v4671_v57 = vrot.slane %v10756_v49, 4  ;;  %v4785_v26 = vrot.slane %v4746_v4, 4 }
 0xa9d   :  { %5423 = vmatpush.bf16.xpose.msrb.mxu0 %v5414_v34  ;;  %v4220_v35 = vsel %vm428_vm0, %v4219_v18, %v4178_v28  ;;  %v4221_v14 = vrot.slane %v4178_v28, 4  ;;  %v4246_v21 = vsel %vm428_vm0, %v10764_v30, %v4245_v51  ;;  %v4267_v44 = vrot.slane %v4250_v47, 4 }
 0xa9e   :  { %v4784_v48 = vsel %vm428_vm0, %v4783_v37, %v4746_v4  ;;  %v4672_v45 = vsel %vm428_vm0, %v4671_v57, %v10748_v27  ;;  %v4786_v7 = vsel %vm428_vm0, %v4770_v20, %v4785_v26  ;;  %v10899_v63 = vperm.slane %v10697_v41, %v8333_v0 }
 0xa9f   :  { %v4800_v43 = vpack.c.bf16 %v4784_v48, %v4784_v48  ;;  %v4799_v49 = vpack.c.bf16 %v4672_v45, %v4672_v45  ;;  %v4222_v40 = vsel %vm428_vm0, %v10686_v50, %v4221_v14  ;;  %v4255_v30 = vrot.slane %v10793_v8, 4 }
 0xaa0   :  { %v4802_v27 = vpack.c.bf16 %v4786_v7, %v4786_v7  ;;  %v4254_v9 = vperm.slane %v4246_v21, %v8374_v31  ;;  %v4230_v38 = vperm.slane %v4222_v40, %v8374_v31  ;;  %v4741_v41 = vrot.slane %v10846_v29, 4 }
 0xaa1   :  { %v5490_v3 = vsel %vm1908_vm1, %v4800_v43, 0  ;;  %v5471_v11 = vsel %vm1908_vm1, %v4799_v49, 0  ;;  %v4765_v5 = vrot.slane %v10855_v55, 4  ;;  %v11996_v10 = vrot.slane %v10411_v12, 4 }
 0xaa2   :  { %v4271_v4 = vrot.slane %v4254_v9, 4  ;;  %v4742_v58 = vsel %vm428_vm0, %v10849_v22, %v4741_v41  ;;  %v4119_v28 = vrot.slane %v10435_v54, 4  ;;  %v5528_v12 = vsel %vm1908_vm1, %v4802_v27, 0 }
 0xaa3   :  { %5404 = vmatpush.bf16.xpose.msra.mxu3 %v5395_v17  ;;  %5461 = vmatpush.bf16.xpose.msrb.mxu2 %v5452_v61  ;;  %v4226_v17 = vperm.slane %v4220_v35, %v8374_v31  ;;  %v4062_v19 = vsel %vm428_vm0, %v10417_v15, %v11996_v10  ;;  %v11997_v61 = vrot.slane %v10421_v59, 4  ;;  %v4766_v15 = vsel %vm428_vm0, %v10658_v32, %v4765_v5 }
 0xaa4   :  { %v4070_v20 = vperm.slane %v4062_v19, %v8333_v0  ;;  %v4272_v55 = vsel %vm428_vm0, %v4271_v4, %v4230_v38  ;;  %v4750_v59 = vperm.slane %v4742_v58, %v8374_v31  ;;  %v4774_v23 = vperm.slane %v4766_v15, %v8374_v31 }
 0xaa5   :  { %v4268_v51 = vsel %vm428_vm0, %v4267_v44, %v4226_v17  ;;  %v4269_v16 = vrot.slane %v4226_v17, 4  ;;  %5499 = vmatpush.bf16.xpose.msra.mxu0 %v5490_v3  ;;  %v4086_v29 = vsel %vm428_vm0, %v10395_v2, %v11997_v61  ;;  %v4288_v18 = vpack.c.bf16 %v4272_v55, %v4272_v55 }
 0xaa6   :  { %v4284_v25 = vpack.c.bf16 %v4268_v51, %v4268_v51  ;;  %v4094_v22 = vperm.slane %v4086_v29, %v8333_v0  ;;  %v4120_v2 = vsel %vm428_vm0, %v4119_v28, %v4070_v20  ;;  %v4143_v37 = vrot.slane %v10454_v33, 4 }
 0xaa7   :  { %v4270_v50 = vsel %vm428_vm0, %v4250_v47, %v4269_v16  ;;  %v4126_v34 = vperm.slane %v4120_v2, %v8374_v31  ;;  %v4256_v47 = vsel %vm428_vm0, %v4255_v30, %v10899_v63  ;;  %7368 = vmatmul.msk.bf16.vlgmr.msrb.gmra.mxu0 %vm1908_vm1, %v4288_v18  ;;  %v4787_v32 = vrot.slane %v4774_v23, 4 }
 0xaa8   :  { %7364 = vmatmul.msk.bf16.vlgmr.msrb.gmra.mxu3 %vm1908_vm1, %v4284_v25  ;;  %v4286_v60 = vpack.c.bf16 %v4270_v50, %v4270_v50  ;;  %v4675_v57 = vrot.slane %v10799_v53, 4  ;;  %v4182_v35 = vperm.slane %v10683_v62, %v8333_v0  ;;  %v4231_v26 = vrot.slane %v10690_v1, 4 }
 0xaa9   :  { %v4144_v14 = vsel %vm428_vm0, %v4143_v37, %v4094_v22  ;;  %v4165_v21 = vrot.slane %v4126_v34, 4  ;;  %v4159_v48 = vrot.slane %v10777_v46, 4  ;;  %v4788_v17 = vsel %vm428_vm0, %v4787_v32, %v4750_v59 }
 0xaaa   :  { %7366 = vmatmul.msk.bf16.vlgmr.msra.gmra.mxu2 %vm1908_vm1, %v4286_v60  ;;  %v4150_v44 = vperm.slane %v4144_v14, %v8374_v31  ;;  %v4789_v45 = vrot.slane %v4750_v59, 4  ;;  %v4262_v43 = vperm.slane %v4256_v47, %v8374_v31  ;;  %v4804_v49 = vpack.c.bf16 %v4788_v17, %v4788_v17 }
 0xaab   :  { %5480 = vmatpush.bf16.xpose.msrb.mxu3 %v5471_v11  ;;  %5537 = vmatpush.bf16.xpose.msra.mxu2 %v5528_v12  ;;  %v4121_v7 = vrot.slane %v4070_v20, 4  ;;  %v4273_v53 = vrot.slane %v4230_v38, 4  ;;  %v4676_v62 = vsel %vm428_vm0, %v4675_v57, %v10783_v39  ;;  %v4160_v46 = vsel %vm428_vm0, %v4159_v48, %v10771_v42 }
 0xaac   :  { %v4166_v40 = vsel %vm428_vm0, %v4150_v44, %v4165_v21  ;;  %v5566_v30 = vsel %vm1908_vm1, %v4804_v49, 0  ;;  %v4790_v16 = vsel %vm428_vm0, %v4774_v23, %v4789_v45  ;;  %v4232_v3 = vsel %vm428_vm0, %v4231_v26, %v4182_v35 }
 0xaad   :  { %v4293_v51 = vpack.c.bf16 %v4166_v40, %v4166_v40  ;;  %5575 = vmatpush.bf16.xpose.msrb.mxu0 %v5566_v30  ;;  %v4803_v25 = vpack.c.bf16 %v4676_v62, %v4676_v62  ;;  %v4275_v27 = vrot.slane %v4262_v43, 4  ;;  %v4122_v11 = vsel %vm428_vm0, %v10435_v54, %v4121_v7 }
 0xaae   :  { %v4274_v39 = vsel %vm428_vm0, %v4254_v9, %v4273_v53  ;;  %v4145_v50 = vrot.slane %v4094_v22, 4  ;;  %v4287_v38 = vpack.c.bf16 %v4160_v46, %v4160_v46  ;;  %v4806_v41 = vpack.c.bf16 %v4790_v16, %v4790_v16 }
 0xaaf   :  { %7373 = vmatmul.msk.bf16.vlgmr.msrb.gmra.mxu1 %vm1908_vm1, %v4293_v51  ;;  %v4238_v60 = vperm.slane %v4232_v3, %v8374_v31  ;;  %v4130_v42 = vperm.slane %v4122_v11, %v8374_v31  ;;  %v5547_v4 = vsel %vm1908_vm1, %v4803_v25, 0  ;;  %v4290_v5 = vpack.c.bf16 %v4274_v39, %v4274_v39 }
 0xab0   :  { %v4257_v19 = vrot.slane %v10899_v63, 4  ;;  %v5604_v54 = vsel %vm1908_vm1, %v4806_v41, 0  ;;  %v4146_v9 = vsel %vm428_vm0, %v10454_v33, %v4145_v50  ;;  %v4233_v28 = vrot.slane %v4182_v35, 4 }
 0xab1   :  { %v4276_v10 = vsel %vm428_vm0, %v4275_v27, %v4238_v60  ;;  %v4169_v20 = vrot.slane %v4130_v42, 4  ;;  %v4154_v29 = vperm.slane %v4146_v9, %v8374_v31  ;;  %v4163_v63 = vrot.slane %v4150_v44, 4 }
 0xab2   :  { %v4292_v58 = vpack.c.bf16 %v4276_v10, %v4276_v10  ;;  %v4258_v61 = vsel %vm428_vm0, %v10793_v8, %v4257_v19  ;;  %v4277_v15 = vrot.slane %v4238_v60, 4  ;;  %v4234_v18 = vsel %vm428_vm0, %v10690_v1, %v4233_v28 }
 0xab3   :  { %v4170_v12 = vsel %vm428_vm0, %v4154_v29, %v4169_v20  ;;  %v4266_v55 = vperm.slane %v4258_v61, %v8374_v31  ;;  %v4164_v33 = vsel %vm428_vm0, %v4163_v63, %v4126_v34  ;;  %v4242_v2 = vperm.slane %v4234_v18, %v8374_v31 }
 0xab4   :  { %v4297_v22 = vpack.c.bf16 %v4170_v12, %v4170_v12  ;;  %v4278_v59 = vsel %vm428_vm0, %v4262_v43, %v4277_v15  ;;  %v4291_v23 = vpack.c.bf16 %v4164_v33, %v4164_v33  ;;  %v4167_v34 = vrot.slane %v4154_v29, 4 }
 0xab5   :  { %v4279_v8 = vrot.slane %v4266_v55, 4  ;;  %v4294_v37 = vpack.c.bf16 %v4278_v59, %v4278_v59  ;;  %v4281_v1 = vrot.slane %v4242_v2, 4 }
 0xab6   :  { %v4168_v57 = vsel %vm428_vm0, %v4167_v34, %v4130_v42 }
 0xab7   :  { %7372 = vmatmul.msk.bf16.vlgmr.msra.gmra.mxu0 %vm1908_vm1, %v4292_v58  ;;  %v4280_v47 = vsel %vm428_vm0, %v4279_v8, %v4242_v2  ;;  %v4282_v35 = vsel %vm428_vm0, %v4266_v55, %v4281_v1  ;;  %v4295_v26 = vpack.c.bf16 %v4168_v57, %v4168_v57 }
 0xab8   :  { %7367 = vmatmul.msk.bf16.vlgmr.msra.gmra.mxu3 %vm1908_vm1, %v4287_v38  ;;  %v4296_v32 = vpack.c.bf16 %v4280_v47, %v4280_v47  ;;  %v4298_v14 = vpack.c.bf16 %v4282_v35, %v4282_v35  ;;  %v11047_v47 = vpop.permute.xlu1 %7829 }
 0xab9   :  { %5556 = vmatpush.bf16.xpose.msra.mxu3 %v5547_v4 }
 0xaba   :  { %7370 = vmatmul.msk.bf16.vlgmr.msrb.gmra.mxu2 %vm1908_vm1, %v4290_v5 }
 0xabb   :  { %5613 = vmatpush.bf16.xpose.msrb.mxu2 %v5604_v54 }
 0xabf   :  { %7377 = vmatmul.msk.bf16.vlgmr.msra.gmra.mxu1 %vm1908_vm1, %v4297_v22 }
 0xac0   :  { %v11051_v1 = vpop.permute.xlu1 %7839 }
 0xac7   :  { %7376 = vmatmul.msk.bf16.vlgmr.msrb.gmra.mxu0 %vm1908_vm1, %v4296_v32 }
 0xac8   :  { %7371 = vmatmul.msk.bf16.vlgmr.msrb.gmra.mxu3 %vm1908_vm1, %v4291_v23 }
 0xaca   :  { %7374 = vmatmul.msk.bf16.vlgmr.msra.gmra.mxu2 %vm1908_vm1, %v4294_v37 }
 0xad8   :  { %7375 = vmatmul.msk.bf16.vlgmr.msra.gmra.mxu3 %vm1908_vm1, %v4295_v26 }
 0xada   :  { %7378 = vmatmul.msk.bf16.vlgmr.msrb.gmra.mxu2 %vm1908_vm1, %v4298_v14 }
 0xb09   :  { %v10988_v21 = vpop.f32.mrf.mxu0 }
 0xb0a   :  { %v5625_v48 = vsel %vm2213_vm2, %v10988_v21, -inf }
 0xb0b   :  { %v10992_v17 = vpop.f32.mrf.mxu1  ;;  %5626 = vmax.xlane.f32.xlu0 %v5625_v48 }
 0xb0c   :  { %v5637_v44 = vsel %vm2213_vm2, %v10992_v17, -inf }
 0xb0d   :  { %5638 = vmax.xlane.f32.xlu2 %v5637_v44  ;;  %v5330_v45 = vpop.f32.mrf.mxu2 }
 0xb0e   :  { %v5619_v49 = vsel %vm2213_vm2, %v5330_v45, -inf }
 0xb11   :  { %v5370_v43 = vpop.f32.mrf.mxu0 }
 0xb13   :  { %v5446_v7 = vpop.f32.mrf.mxu1  ;;  %5620 = vmax.xlane.f32.xlu0 %v5619_v49 }
 0xb15   :  { %v5332_v53 = vpop.f32.mrf.mxu2 }
 0xb24   :  { %v10997_v40 = vpop.f32.mrf.mxu0 }
 0xb25   :  { %7824 = vrot.lane.b32.xlu2 %v10230_v36, %s8073_s2  ;;  %v5634_v61 = vsel %vm2213_vm2, %v10997_v40, -inf  ;;  %s12006_s2 = smov 12  }
 0xb27   :  { %7819 = vrot.lane.b32.xlu0 %v10230_v36, %s8074_s0  ;;  %s12007_s0 = smov 4  }
 0xb2b   :  { %v5349_v62 = vpop.f32.mrf.mxu3 }
 0xb2c   :  { %v5622_v30 = vsel %vm2213_vm2, %v5349_v62, -inf  ;;  %v11006_v46 = vpop.f32.mrf.mxu1  ;;  %v5427_v16 = vpop.f32.mrf.mxu0 }
 0xb2d   :  { %v11002_v51 = vpop.f32.mrf.mxu2  ;;  %5623 = vmax.xlane.f32.xlu1 %v5622_v30  ;;  %7834 = vrot.lane.b32.xlu2 %v10230_v36, %s8077_s19  ;;  %v5649_v23 = vsel %vm2213_vm2, %v11006_v46, -inf  ;;  %s12010_s19 = smov 20  }
 0xb2e   :  { %v5628_v28 = vsel %vm2213_vm2, %v11002_v51, -inf }
 0xb33   :  { %v5351_v3 = vpop.f32.mrf.mxu3 }
 0xb34   :  { %v5522_v27 = vpop.f32.mrf.mxu1  ;;  %v11010_v11 = vpop.f32.mrf.mxu0 }
 0xb35   :  { %v5389_v25 = vpop.f32.mrf.mxu2  ;;  %v5646_v14 = vsel %vm2213_vm2, %v11010_v11, -inf }
 0xb3b   :  { %v11012_v39 = vpop.f32.mrf.mxu3 }
 0xb3c   :  { %v11015_v41 = vpop.f32.mrf.mxu1  ;;  %v5503_v60 = vpop.f32.mrf.mxu0  ;;  %v5631_v15 = vsel %vm2213_vm2, %v11012_v39, -inf }
 0xb3d   :  { %v5463_v50 = vpop.f32.mrf.mxu2  ;;  %v5661_v53 = vsel %vm2213_vm2, %v11015_v41, -inf }
 0xb3e   :  { %v5640_v38 = vsel %vm2213_vm2, %v5463_v50, -inf }
 0xb3f   :  { %5641 = vmax.xlane.f32.xlu1 %v5640_v38 }
 0xb43   :  { %v5408_v42 = vpop.f32.mrf.mxu3 }
 0xb44   :  { %v5598_v5 = vpop.f32.mrf.mxu1  ;;  %v11017_v10 = vpop.f32.mrf.mxu0 }
 0xb45   :  { %v5465_v4 = vpop.f32.mrf.mxu2 }
 0xb4b   :  { %v11019_v19 = vpop.f32.mrf.mxu3 }
 0xb4c   :  { %v5579_v9 = vpop.f32.mrf.mxu0  ;;  %v5643_v8 = vsel %vm2213_vm2, %v11019_v19, -inf }
 0xb4d   :  { %v11021_v54 = vpop.f32.mrf.mxu2 }
 0xb4e   :  { %v5652_v12 = vsel %vm2213_vm2, %v11021_v54, -inf }
 0xb51   :  { %5635 = vmax.xlane.f32.xlu0 %v5634_v61 }
 0xb53   :  { %v5484_v58 = vpop.f32.mrf.mxu3 }
 0xb55   :  { %v5541_v20 = vpop.f32.mrf.mxu2 }
 0xb56   :  { %5629 = vmax.xlane.f32.xlu2 %v5628_v28 }
 0xb58   :  { %7849 = vrot.lane.b32.xlu1 %v10230_v36, %s8078_s20  ;;  %s12011_s20 = smov 28  }
 0xb59   :  { %5653 = vmax.xlane.f32.xlu0 %v5652_v12 }
 0xb5b   :  { %v11027_v29 = vpop.f32.mrf.mxu3 }
 0xb5c   :  { %v5655_v33 = vsel %vm2213_vm2, %v11027_v29, -inf }
 0xb5d   :  { %v11031_v63 = vpop.f32.mrf.mxu2 }
 0xb5e   :  { %5632 = vmax.xlane.f32.xlu2 %v5631_v15  ;;  %v5664_v18 = vsel %vm2213_vm2, %v11031_v63, -inf }
 0xb61   :  { %5656 = vmax.xlane.f32.xlu0 %v5655_v33  ;;  %v4853_v33 = vrot.slane %v10218_v24, 4 }
 0xb63   :  { %v5560_v55 = vpop.f32.mrf.mxu3 }
 0xb65   :  { %v5617_v22 = vpop.f32.mrf.mxu2 }
 0xb69   :  { %5665 = vmax.xlane.f32.xlu0 %v5664_v18 }
 0xb76   :  { %7844 = vrot.lane.b32.xlu2 %v10230_v36, %s8076_s18  ;;  %s12009_s18 = smov 16  }
 0xb7e   :  { %v5627_v59 = vpop.xlane.xlu0 %5626 }
 0xb7f   :  { %v5669_v60 = vsub.f32 %v10988_v21, %v5627_v59  ;;  %v7831_v59 = vunpack.i.l.bf16 %v11047_v47 }
 0xb80   :  { %v5639_v43 = vpop.xlane.xlu2 %5638 }
 0xb81   :  { %v5687_v20 = vmul.f32 1.442695, %v5669_v60  ;;  %v5673_v22 = vsub.f32 %v10992_v17, %v5639_v43 }
 0xb82   :  { %5644 = vmax.xlane.f32.xlu1 %v5643_v8  ;;  %v7832_v8 = vunpack.i.h.bf16 %v11047_v47 }
 0xb84   :  { %v11091_v43 = vrot.slane %v7832_v8, 4 }
 0xb86   :  { %v5621_v2 = vpop.xlane.xlu0 %5620 }
 0xb87   :  { %v5667_v37 = vsub.f32 %v5330_v45, %v5621_v2  ;;  %v5658_v45 = vsel %vm2213_vm2, %v11017_v10, -inf }
 0xb88   :  { %v7825_v30 = vpop.permute.xlu2 %7824 }
 0xb89   :  { %v5683_v32 = vmul.f32 1.442695, %v5667_v37  ;;  %v7827_v25 = vunpack.i.h.bf16 %v7825_v30  ;;  %v7826_v4 = vunpack.i.l.bf16 %v7825_v30  ;;  %v7842_v37 = vunpack.i.h.bf16 %v11051_v1 }
 0xb8a   :  { %5650 = vmax.xlane.f32.xlu1 %v5649_v23  ;;  %v4965_v23 = vrot.slane %v10226_v52, 4 }
 0xb8b   :  { %7974 = vpow2.f32 %v5683_v32  ;;  %v4851_v12 = vrot.slane %v7826_v4, 4 }
 0xb90   :  { %v7835_v38 = vpop.permute.xlu2 %7834 }
 0xb91   :  { %v11049_v34 = vpop.eup %7974  ;;  %v7837_v5 = vunpack.i.h.bf16 %v7835_v38  ;;  %v7836_v58 = vunpack.i.l.bf16 %v7835_v38 }
 0xb92   :  { %v5715_v36 = vsel %vm2213_vm2, %v11049_v34, 0.0 }
 0xb93   :  { %5716 = vadd.xlane.f32.xlu0 %v5715_v36  ;;  %v4975_v55 = vrot.slane %v7837_v5, 4  ;;  %v4863_v18 = vrot.slane %v7836_v58, 4 }
 0xb99   :  { %v7820_v27 = vpop.permute.xlu0 %7819 }
 0xb9a   :  { %v7822_v42 = vunpack.i.h.bf16 %v7820_v27  ;;  %v7821_v9 = vunpack.i.l.bf16 %v7820_v27  ;;  %v5001_v27 = vrot.slane %v7842_v37, 4 }
 0xb9c   :  { %v4977_v61 = vrot.slane %v7822_v42, 4  ;;  %v4865_v15 = vrot.slane %v7821_v9, 4  ;;  %v4976_v2 = vsel %vm428_vm0, %v4975_v55, %v7822_v42  ;;  %v4864_v17 = vsel %vm428_vm0, %v4863_v18, %v7821_v9 }
 0xb9e   :  { %v4978_v36 = vsel %vm428_vm0, %v7837_v5, %v4977_v61 }
 0xb9f   :  { %5647 = vmax.xlane.f32.xlu2 %v5646_v14  ;;  %v5695_v14 = vmul.f32 1.442695, %v5673_v22 }
 0xba0   :  { %v5624_v57 = vpop.xlane.xlu1 %5623 }
 0xba1   :  { %v5668_v35 = vsub.f32 %v5349_v62, %v5624_v57  ;;  %v4966_v57 = vsel %vm428_vm0, %v7827_v25, %v4965_v23 }
 0xba3   :  { %v5685_v26 = vmul.f32 1.442695, %v5668_v35  ;;  %v4852_v35 = vsel %vm428_vm0, %v4851_v12, %v10218_v24  ;;  %v4974_v24 = vperm.slane %v4966_v57, %v8333_v0 }
 0xba4   :  { %v4858_v30 = vperm.slane %v4852_v35, %v8333_v0 }
 0xba5   :  { %7976 = vpow2.f32 %v5685_v26  ;;  %v4866_v26 = vsel %vm428_vm0, %v7836_v58, %v4865_v15  ;;  %v5025_v55 = vrot.slane %v4974_v24, 4 }
 0xba6   :  { %v4901_v15 = vrot.slane %v4858_v30, 4 }
 0xba7   :  { %5659 = vmax.xlane.f32.xlu2 %v5658_v45  ;;  %v4982_v45 = vperm.slane %v4976_v2, %v8333_v0 }
 0xbab   :  { %v11057_v48 = vpop.eup %7976 }
 0xbac   :  { %v5718_v44 = vsel %vm2213_vm2, %v11057_v48, 0.0 }
 0xbad   :  { %5719 = vadd.xlane.f32.xlu1 %v5718_v44  ;;  %v4854_v44 = vsel %vm428_vm0, %v7826_v4, %v4853_v33  ;;  %v5011_v4 = vrot.slane %v4982_v45, 4 }
 0xbae   :  { %v4862_v38 = vperm.slane %v4854_v44, %v8333_v0 }
 0xbaf   :  { %5662 = vmax.xlane.f32.xlu2 %v5661_v53 }
 0xbb2   :  { %v5642_v49 = vpop.xlane.xlu1 %5641 }
 0xbb3   :  { %v5674_v7 = vsub.f32 %v5463_v50, %v5642_v49  ;;  %v4963_v50 = vrot.slane %v7827_v25, 4  ;;  %v4986_v49 = vperm.slane %v4978_v36, %v8333_v0  ;;  %v11100_v25 = vrot.slane %v7831_v59, 4 }
 0xbb5   :  { %v5697_v62 = vmul.f32 1.442695, %v5674_v7  ;;  %v4964_v28 = vsel %vm428_vm0, %v4963_v50, %v10226_v52  ;;  %v7841_v52 = vunpack.i.l.bf16 %v11051_v1  ;;  %v4870_v7 = vperm.slane %v4864_v17, %v8333_v0 }
 0xbb6   :  { %v4970_v32 = vperm.slane %v4964_v28, %v8333_v0  ;;  %v5026_v57 = vsel %vm428_vm0, %v4986_v49, %v5025_v55 }
 0xbb7   :  { %7978 = vpow2.f32 %v5697_v62  ;;  %v4889_v50 = vrot.slane %v7841_v52, 4  ;;  %v4899_v61 = vrot.slane %v4870_v7, 4  ;;  %v4902_v17 = vsel %vm428_vm0, %v4870_v7, %v4901_v15 }
 0xbb8   :  { %7980 = vpow2.f32 %v5687_v20  ;;  %v5013_v62 = vrot.slane %v4970_v32, 4  ;;  %v5023_v20 = vrot.slane %v4986_v49, 4  ;;  %v5012_v2 = vsel %vm428_vm0, %v5011_v4, %v4970_v32 }
 0xbb9   :  { %7982 = vpow2.f32 %v5695_v14  ;;  %v4900_v35 = vsel %vm428_vm0, %v4899_v61, %v4858_v30  ;;  %v11137_v30 = vperm.slane %v5026_v57, %v8374_v31 }
 0xbba   :  { %v5014_v5 = vsel %vm428_vm0, %v4982_v45, %v5013_v62 }
 0xbbb   :  { %v11115_v36 = vperm.slane %v5014_v5, %v8374_v31 }
 0xbbd   :  { %v11065_v16 = vpop.eup %7978 }
 0xbbe   :  { %v5736_v3 = vsel %vm2213_vm2, %v11065_v16, 0.0  ;;  %v11109_v58 = vpop.eup %7980 }
 0xbbf   :  { %5737 = vadd.xlane.f32.xlu1 %v5736_v3  ;;  %v4874_v3 = vperm.slane %v4866_v26, %v8333_v0 }
 0xbc1   :  { %v4911_v22 = vrot.slane %v4874_v3, 4 }
 0xbc3   :  { %v4912_v32 = vsel %vm428_vm0, %v4911_v22, %v4862_v38 }
 0xbc4   :  { %v5636_v21 = vpop.xlane.xlu0 %5635  ;;  %v11149_v5 = vperm.slane %v4912_v32, %v8374_v31 }
 0xbc5   :  { %v5672_v28 = vsub.f32 %v10997_v40, %v5636_v21  ;;  %v11120_v40 = vsel %vm2213_vm2, %v11109_v58, 0.0  ;;  %v5024_v21 = vsel %vm428_vm0, %v5023_v20, %v4974_v24  ;;  %v11134_v24 = vperm.slane %v4902_v17, %v8374_v31 }
 0xbc6   :  { %v4957_v57 = vrot.slane %v11149_v5, 4 }
 0xbc7   :  { %v5693_v26 = vmul.f32 1.442695, %v5672_v28 }
 0xbc9   :  { %v5630_v53 = vpop.xlane.xlu2 %5629 }
 0xbca   :  { %v7850_v60 = vpop.permute.xlu1 %7849  ;;  %v5670_v42 = vsub.f32 %v11002_v51, %v5630_v53  ;;  %v4913_v51 = vrot.slane %v4862_v38, 4  ;;  %v11131_v53 = vperm.slane %v5012_v2, %v8374_v31 }
 0xbcb   :  { %v7852_v33 = vunpack.i.h.bf16 %v7850_v60  ;;  %v7851_v18 = vunpack.i.l.bf16 %v7850_v60  ;;  %v11140_v60 = vperm.slane %v4900_v35, %v8374_v31 }
 0xbcc   :  { %v5654_v9 = vpop.xlane.xlu0 %5653  ;;  %v5689_v12 = vmul.f32 1.442695, %v5670_v42  ;;  %v4914_v44 = vsel %vm428_vm0, %v4874_v3, %v4913_v51  ;;  %v5061_v15 = vrot.slane %v11131_v53, 4 }
 0xbcd   :  { %v5678_v23 = vsub.f32 %v11021_v54, %v5654_v9  ;;  %v11125_v54 = vpop.eup %7982  ;;  %v4999_v45 = vrot.slane %v7852_v33, 4  ;;  %v4887_v49 = vrot.slane %v7851_v18, 4  ;;  %v5002_v38 = vsel %vm428_vm0, %v7852_v33, %v5001_v27 }
 0xbce   :  { %7984 = vpow2.f32 %v5689_v12  ;;  %v11152_v9 = vperm.slane %v4914_v44, %v8374_v31  ;;  %v4890_v27 = vsel %vm428_vm0, %v7851_v18, %v4889_v50  ;;  %v5010_v28 = vperm.slane %v5002_v38, %v8333_v0 }
 0xbcf   :  { %v5705_v62 = vmul.f32 1.442695, %v5678_v23  ;;  %7986 = vpow2.f32 %v5693_v26  ;;  %v5000_v20 = vsel %vm428_vm0, %v4999_v45, %v7842_v37  ;;  %v4888_v12 = vsel %vm428_vm0, %v4887_v49, %v7841_v52 }
 0xbd0   :  { %v5065_v37 = vrot.slane %v11115_v36, 4  ;;  %v5073_v50 = vrot.slane %v11137_v30, 4  ;;  %v4949_v22 = vrot.slane %v11140_v60, 4  ;;  %v4953_v33 = vrot.slane %v11134_v24, 4 }
 0xbd1   :  { %v5633_v14 = vpop.xlane.xlu2 %5632  ;;  %v5006_v51 = vperm.slane %v5000_v20, %v8333_v0  ;;  %v11172_v1 = vperm.slane %v4890_v27, %v8333_v0  ;;  %v4894_v23 = vperm.slane %v4888_v12, %v8333_v0  ;;  %v4961_v35 = vrot.slane %v11152_v9, 4 }
 0xbd2   :  { %v5671_v7 = vsub.f32 %v11012_v39, %v5633_v14  ;;  %v11146_v39 = vperm.slane %v5024_v21, %v8374_v31  ;;  %v5047_v26 = vrot.slane %v5010_v28, 4 }
 0xbd3   :  { %v5035_v38 = vrot.slane %v5006_v51, 4  ;;  %v4923_v27 = vrot.slane %v4894_v23, 4 }
 0xbd4   :  { %v5691_v3 = vmul.f32 1.442695, %v5671_v7  ;;  %v5657_v42 = vpop.xlane.xlu0 %5656  ;;  %v11143_v4 = vpop.eup %7984  ;;  %v5069_v18 = vrot.slane %v11146_v39, 4 }
 0xbd5   :  { %v5724_v61 = vsel %vm2213_vm2, %v11143_v4, 0.0  ;;  %v5679_v55 = vsub.f32 %v11027_v29, %v5657_v42  ;;  %v5733_v29 = vsel %vm2213_vm2, %v11125_v54, 0.0  ;;  %v11178_v21 = vpop.eup %7986 }
 0xbd6   :  { %7988 = vpow2.f32 %v5691_v3  ;;  %5725 = vadd.xlane.f32.xlu0 %v5724_v61  ;;  %v4935_v3 = vrot.slane %v11172_v1, 4  ;;  %v5730_v47 = vsel %vm2213_vm2, %v11178_v21, 0.0 }
 0xbd7   :  { %7990 = vpow2.f32 %v5705_v62  ;;  %v5707_v14 = vmul.f32 1.442695, %v5679_v55 }
 0xbd9   :  { %v7845_v52 = vpop.permute.xlu2 %7844  ;;  %7992 = vpow2.f32 %v5707_v14 }
 0xbda   :  { %v7847_v2 = vunpack.i.h.bf16 %v7845_v52  ;;  %v7846_v17 = vunpack.i.l.bf16 %v7845_v52 }
 0xbdc   :  { %v11182_v32 = vpop.eup %7988  ;;  %v4987_v44 = vrot.slane %v7847_v2, 4  ;;  %v4990_v45 = vsel %vm428_vm0, %v7847_v2, %v11091_v43  ;;  %v4875_v7 = vrot.slane %v7846_v17, 4  ;;  %v4878_v49 = vsel %vm428_vm0, %v7846_v17, %v11100_v25 }
 0xbdd   :  { %v11188_v62 = vpop.eup %7990  ;;  %v4998_v42 = vperm.slane %v4990_v45, %v8333_v0  ;;  %v5727_v20 = vsel %vm2213_vm2, %v11182_v32, 0.0  ;;  %v4886_v25 = vperm.slane %v4878_v49, %v8333_v0 }
 0xbde   :  { %v4988_v61 = vsel %vm428_vm0, %v4987_v44, %v7832_v8  ;;  %v4876_v43 = vsel %vm428_vm0, %v4875_v7, %v7831_v59  ;;  %5728 = vadd.xlane.f32.xlu2 %v5727_v20  ;;  %5722 = vadd.xlane.f32.xlu0 %v11120_v40  ;;  %v5748_v8 = vsel %vm2213_vm2, %v11188_v62, 0.0 }
 0xbdf   :  { %v4994_v12 = vperm.slane %v4988_v61, %v8333_v0  ;;  %v5048_v55 = vsel %vm428_vm0, %v5047_v26, %v4998_v42  ;;  %v5049_v52 = vrot.slane %v4998_v42, 4  ;;  %v4882_v2 = vperm.slane %v4876_v43, %v8333_v0 }
 0xbe0   :  { %v5054_v17 = vperm.slane %v5048_v55, %v8374_v31  ;;  %v4936_v61 = vsel %vm428_vm0, %v4935_v3, %v4886_v25  ;;  %v4937_v43 = vrot.slane %v4886_v25, 4  ;;  %v11233_v3 = vpop.eup %7992 }
 0xbe1   :  { %v5036_v59 = vsel %vm428_vm0, %v5035_v38, %v4994_v12  ;;  %v5037_v44 = vrot.slane %v4994_v12, 4  ;;  %v5050_v45 = vsel %vm428_vm0, %v5010_v28, %v5049_v52  ;;  %v4924_v26 = vsel %vm428_vm0, %v4923_v27, %v4882_v2 }
 0xbe2   :  { %v5042_v7 = vperm.slane %v5036_v59, %v8374_v31  ;;  %v5058_v40 = vperm.slane %v5050_v45, %v8374_v31  ;;  %v5067_v14 = vrot.slane %v5054_v17, 4  ;;  %v11216_v49 = vsel %vm428_vm0, %v5054_v17, %v5069_v18 }
 0xbe3   :  { %v5038_v42 = vsel %vm428_vm0, %v5006_v51, %v5037_v44  ;;  %v4925_v20 = vrot.slane %v4882_v2, 4  ;;  %v4930_v12 = vperm.slane %v4924_v26, %v8374_v31  ;;  %v4938_v44 = vsel %vm428_vm0, %v11172_v1, %v4937_v43 }
 0xbe4   :  { %v5046_v38 = vperm.slane %v5038_v42, %v8374_v31  ;;  %v11222_v28 = vsel %vm428_vm0, %v5042_v7, %v5061_v15  ;;  %v5059_v55 = vrot.slane %v5042_v7, 4  ;;  %v11228_v18 = vsel %vm428_vm0, %v5067_v14, %v11146_v39 }
 0xbe5   :  { %v5071_v52 = vrot.slane %v5058_v40, 4  ;;  %v11231_v51 = vsel %vm428_vm0, %v5058_v40, %v5073_v50  ;;  %v4926_v17 = vsel %vm428_vm0, %v4894_v23, %v4925_v20  ;;  %v4942_v26 = vperm.slane %v4936_v61, %v8374_v31 }
 0xbe6   :  { %v5063_v25 = vrot.slane %v5046_v38, 4  ;;  %v11238_v15 = vsel %vm428_vm0, %v5046_v38, %v5065_v37  ;;  %5734 = vadd.xlane.f32.xlu2 %v5733_v29  ;;  %v5223_v50 = vrot.slane %v11231_v51, 4  ;;  %v4934_v59 = vperm.slane %v4926_v17, %v8374_v31  ;;  %5731 = vadd.xlane.f32.xlu0 %v5730_v47 }
 0xbe7   :  { %v11244_v39 = vsel %vm428_vm0, %v5071_v52, %v11137_v30  ;;  %v5199_v37 = vrot.slane %v11238_v15, 4  ;;  %v4946_v29 = vperm.slane %v4938_v44, %v8374_v31  ;;  %v4947_v23 = vrot.slane %v4930_v12, 4 }
 0xbe8   :  { %v5211_v45 = vrot.slane %v11244_v39, 4  ;;  %v11257_v30 = vsel %vm428_vm0, %v4930_v12, %v4949_v22  ;;  %v4951_v7 = vrot.slane %v4934_v59, 4  ;;  %v11262_v1 = vsel %vm428_vm0, %v4934_v59, %v4953_v33 }
 0xbe9   :  { %v4955_v47 = vrot.slane %v4942_v26, 4  ;;  %v11267_v40 = vsel %vm428_vm0, %v4942_v26, %v4957_v57  ;;  %v4959_v14 = vrot.slane %v4946_v29, 4  ;;  %v11272_v42 = vsel %vm428_vm0, %v4946_v29, %v4961_v35 }
 0xbea   :  { %v5224_v22 = vsel %vm428_vm0, %v5223_v50, %v11216_v49  ;;  %v5087_v20 = vrot.slane %v11262_v1, 4  ;;  %v5111_v61 = vrot.slane %v11272_v42, 4  ;;  %v11290_v38 = vsel %vm428_vm0, %v4947_v23, %v11140_v60 }
 0xbeb   :  { %v11281_v43 = vsel %vm428_vm0, %v4955_v47, %v11149_v5  ;;  %v11285_v57 = vsel %vm428_vm0, %v4959_v14, %v11152_v9  ;;  %v11298_v5 = vsel %vm428_vm0, %v4951_v7, %v11134_v24  ;;  %v11310_v24 = vsel %vm428_vm0, %v5059_v55, %v11131_v53 }
 0xbec   :  { %v5099_v12 = vrot.slane %v11285_v57, 4  ;;  %v5112_v17 = vsel %vm428_vm0, %v5111_v61, %v11267_v40  ;;  %v5075_v9 = vrot.slane %v11298_v5, 4  ;;  %v5088_v59 = vsel %vm428_vm0, %v5087_v20, %v11257_v30 }
 0xbed   :  { %v5118_v60 = vperm.slane %v5112_v17, %v8333_v0  ;;  %v5094_v26 = vperm.slane %v5088_v59, %v8333_v0  ;;  %v11314_v23 = vsel %vm428_vm0, %v5063_v25, %v11115_v36  ;;  %v5200_v36 = vsel %vm428_vm0, %v5199_v37, %v11222_v28 }
 0xbee   :  { %5749 = vadd.xlane.f32.xlu0 %v5748_v8  ;;  %v5100_v29 = vsel %vm428_vm0, %v5099_v12, %v11281_v43  ;;  %v5076_v47 = vsel %vm428_vm0, %v5075_v9, %v11290_v38  ;;  %v5187_v12 = vrot.slane %v11314_v23, 4 }
 0xbef   :  { %v5106_v8 = vperm.slane %v5100_v29, %v8333_v0  ;;  %v5147_v14 = vrot.slane %v5118_v60, 4  ;;  %v5082_v20 = vperm.slane %v5076_v47, %v8333_v0  ;;  %v5123_v61 = vrot.slane %v5094_v26, 4 }
 0xbf0   :  { %v5188_v59 = vsel %vm428_vm0, %v5187_v12, %v11310_v24 }
 0xbf1   :  { %v5148_v17 = vsel %vm428_vm0, %v5147_v14, %v5106_v8  ;;  %v5124_v25 = vsel %vm428_vm0, %v5123_v61, %v5082_v20  ;;  %v5230_v14 = vperm.slane %v5224_v22, %v8333_v0  ;;  %v5751_v61 = vsel %vm2213_vm2, %v11233_v3, 0.0 }
 0xbf2   :  { %v5154_v9 = vperm.slane %v5148_v17, %v8374_v31  ;;  %v5130_v29 = vperm.slane %v5124_v25, %v8374_v31  ;;  %v5125_v27 = vrot.slane %v5082_v20, 4  ;;  %v5149_v2 = vrot.slane %v5106_v8, 4 }
 0xbf3   :  { %v5259_v25 = vrot.slane %v5230_v14, 4 }
 0xbf4   :  { %v5171_v37 = vrot.slane %v5154_v9, 4  ;;  %v5173_v17 = vrot.slane %v5130_v29, 4  ;;  %v5126_v8 = vsel %vm428_vm0, %v5094_v26, %v5125_v27  ;;  %v5150_v50 = vsel %vm428_vm0, %v5118_v60, %v5149_v2 }
 0xbf5   :  { %v5645_v44 = vpop.xlane.xlu1 %5644  ;;  %v5158_v27 = vperm.slane %v5150_v50, %v8374_v31 }
 0xbf6   :  { %v5675_v7 = vsub.f32 %v11019_v19, %v5645_v44  ;;  %v5212_v19 = vsel %vm428_vm0, %v5211_v45, %v11228_v18  ;;  %v5206_v44 = vperm.slane %v5200_v36, %v8333_v0  ;;  %5752 = vadd.xlane.f32.xlu0 %v5751_v61  ;;  %v5174_v52 = vsel %vm428_vm0, %v5154_v9, %v5173_v17  ;;  %v11360_v17 = vpop.xlane.xlu0 %5665 }
 0xbf7   :  { %v5218_v47 = vperm.slane %v5212_v19, %v8333_v0  ;;  %v5301_v20 = vpack.c.bf16 %v5174_v52, %v5174_v52  ;;  %v5134_v52 = vperm.slane %v5126_v8, %v8374_v31  ;;  %v5175_v26 = vrot.slane %v5158_v27, 4 }
 0xbf8   :  { %v5699_v55 = vmul.f32 1.442695, %v5675_v7  ;;  %v5194_v7 = vperm.slane %v5188_v59, %v8333_v0  ;;  %v5235_v45 = vrot.slane %v5206_v44, 4 }
 0xbf9   :  { %v5261_v59 = vrot.slane %v5218_v47, 4  ;;  %v5260_v33 = vsel %vm428_vm0, %v5259_v25, %v5218_v47  ;;  %v5853_v9 = vsel %vm2409_vm3, %v5301_v20, 0  ;;  %v11998_v25 = vrot.slane %v11290_v38, 4 }
 0xbfa   :  { %7994 = vpow2.f32 %v5699_v55  ;;  %v5237_v12 = vrot.slane %v5194_v7, 4  ;;  %v5172_v55 = vsel %vm428_vm0, %v5171_v37, %v5130_v29  ;;  %v5236_v36 = vsel %vm428_vm0, %v5235_v45, %v5194_v7  ;;  %5862 = vmatpush.bf16.msrb.mxu1 %v5853_v9 }
 0xbfb   :  { %v5299_v35 = vpack.c.bf16 %v5172_v55, %v5172_v55  ;;  %v5242_v22 = vperm.slane %v5236_v36, %v8374_v31  ;;  %v5266_v45 = vperm.slane %v5260_v33, %v8374_v31  ;;  %v5262_v61 = vsel %vm428_vm0, %v5230_v14, %v5261_v59 }
 0xbfc   :  { %v5270_v50 = vperm.slane %v5262_v61, %v8374_v31  ;;  %v5177_v36 = vrot.slane %v5134_v52, 4  ;;  %v12001_v61 = vrot.slane %v11267_v40, 4 }
 0xbfd   :  { %v5651_v53 = vpop.xlane.xlu1 %5650  ;;  %v5815_v37 = vsel %vm2409_vm3, %v5299_v35, 0  ;;  %v5283_v2 = vrot.slane %v5266_v45, 4  ;;  %v5238_v35 = vsel %vm428_vm0, %v5206_v44, %v5237_v12  ;;  %v5176_v12 = vsel %vm428_vm0, %v5175_v26, %v5134_v52 }
 0xbfe   :  { %v5677_v19 = vsub.f32 %v11006_v46, %v5651_v53  ;;  %v5285_v46 = vrot.slane %v5242_v22, 4  ;;  %5824 = vmatpush.bf16.msrb.mxu3 %v5815_v37  ;;  %v5246_v47 = vperm.slane %v5238_v35, %v8374_v31  ;;  %v5303_v14 = vpack.c.bf16 %v5176_v12, %v5176_v12 }
 0xbff   :  { %v5284_v55 = vsel %vm428_vm0, %v5283_v2, %v5242_v22  ;;  %v5287_v59 = vrot.slane %v5270_v50, 4  ;;  %v5213_v26 = vrot.slane %v11228_v18, 4  ;;  %v12003_v12 = vrot.slane %v11222_v28, 4 }
 0xc00   :  { %v11347_v29 = vpop.eup %7994  ;;  %v5703_v7 = vmul.f32 1.442695, %v5677_v19  ;;  %v5286_v60 = vsel %vm428_vm0, %v5266_v45, %v5285_v46  ;;  %v5078_v19 = vsel %vm428_vm0, %v11298_v5, %v11998_v25  ;;  %v5300_v20 = vpack.c.bf16 %v5284_v55, %v5284_v55 }
 0xc01   :  { %v5739_v53 = vsel %vm2213_vm2, %v11347_v29, 0.0  ;;  %v5302_v33 = vpack.c.bf16 %v5286_v60, %v5286_v60  ;;  %v5289_v8 = vrot.slane %v5246_v47, 4  ;;  %v5086_v22 = vperm.slane %v5078_v19, %v8333_v0 }
 0xc02   :  { %7996 = vpow2.f32 %v5703_v7  ;;  %5740 = vadd.xlane.f32.xlu1 %v5739_v53  ;;  %v5178_v7 = vsel %vm428_vm0, %v5158_v27, %v5177_v36  ;;  %v5834_v37 = vsel %vm2409_vm3, %v5300_v20, 0  ;;  %v11999_v5 = vrot.slane %v11257_v30, 4 }
 0xc03   :  { %v5872_v44 = vsel %vm2409_vm3, %v5302_v33, 0  ;;  %v5305_v45 = vpack.c.bf16 %v5178_v7, %v5178_v7  ;;  %v5290_v38 = vsel %vm428_vm0, %v5270_v50, %v5289_v8  ;;  %5843 = vmatpush.bf16.msra.mxu0 %v5834_v37  ;;  %v5891_v9 = vsel %vm2409_vm3, %v5303_v14, 0 }
 0xc04   :  { %5881 = vmatpush.bf16.msra.mxu2 %v5872_v44  ;;  %v5090_v46 = vsel %vm428_vm0, %v11262_v1, %v11999_v5  ;;  %v5288_v52 = vsel %vm428_vm0, %v5287_v59, %v5246_v47  ;;  %v5306_v27 = vpack.c.bf16 %v5290_v38, %v5290_v38  ;;  %5900 = vmatpush.bf16.msra.mxu3 %v5891_v9  ;;  %v12000_v33 = vrot.slane %v11281_v43, 4 }
 0xc05   :  { %v5098_v2 = vperm.slane %v5090_v46, %v8333_v0  ;;  %v5304_v60 = vpack.c.bf16 %v5288_v52, %v5288_v52  ;;  %v5929_v35 = vsel %vm2409_vm3, %v5305_v45, 0  ;;  %v5114_v55 = vsel %vm428_vm0, %v11272_v42, %v12001_v61 }
 0xc06   :  { %v5102_v1 = vsel %vm428_vm0, %v11285_v57, %v12000_v33  ;;  %5938 = vmatpush.bf16.msra.mxu1 %v5929_v35  ;;  %v5948_v47 = vsel %vm2409_vm3, %v5306_v27, 0  ;;  %v5122_v25 = vperm.slane %v5114_v55, %v8333_v0  ;;  %v12002_v57 = vrot.slane %v11310_v24, 4  ;;  %v5717_v19 = vpop.xlane.xlu0 %5716 }
 0xc07   :  { %v5135_v50 = vrot.slane %v5098_v2, 4  ;;  %v5910_v36 = vsel %vm2409_vm3, %v5304_v60, 0  ;;  %v5110_v43 = vperm.slane %v5102_v1, %v8333_v0  ;;  %7998 = vrcp.f32 %v5717_v19 }
 0xc08   :  { %v11378_v53 = vpop.eup %7996  ;;  %5957 = vmatpush.bf16.msrb.mxu2 %v5948_v47  ;;  %v5190_v18 = vsel %vm428_vm0, %v11314_v23, %v12002_v57  ;;  %5919 = vmatpush.bf16.msrb.mxu0 %v5910_v36  ;;  %v5159_v44 = vrot.slane %v5122_v25, 4  ;;  %v5202_v8 = vsel %vm428_vm0, %v11238_v15, %v12003_v12  ;;  %v5214_v24 = vsel %vm428_vm0, %v11244_v39, %v5213_v26 }
 0xc09   :  { %v5745_v30 = vsel %vm2213_vm2, %v11378_v53, 0.0  ;;  %v5136_v40 = vsel %vm428_vm0, %v5135_v50, %v5086_v22  ;;  %v5198_v20 = vperm.slane %v5190_v18, %v8333_v0  ;;  %v12004_v23 = vrot.slane %v11216_v49, 4 }
 0xc0a   :  { %5746 = vadd.xlane.f32.xlu1 %v5745_v30  ;;  %v5142_v42 = vperm.slane %v5136_v40, %v8374_v31  ;;  %v5137_v59 = vrot.slane %v5086_v22, 4  ;;  %v5160_v7 = vsel %vm428_vm0, %v5159_v44, %v5110_v43  ;;  %v5161_v45 = vrot.slane %v5110_v43, 4 }
 0xc0b   :  { %v5226_v14 = vsel %vm428_vm0, %v11231_v51, %v12004_v23  ;;  %v5166_v38 = vperm.slane %v5160_v7, %v8374_v31  ;;  %v5210_v28 = vperm.slane %v5202_v8, %v8333_v0  ;;  %v5249_v15 = vrot.slane %v5198_v20, 4 }
 0xc0c   :  { %v5181_v37 = vrot.slane %v5142_v42, 4  ;;  %v5138_v5 = vsel %vm428_vm0, %v5098_v2, %v5137_v59  ;;  %v5222_v46 = vperm.slane %v5214_v24, %v8333_v0  ;;  %v5234_v39 = vperm.slane %v5226_v14, %v8333_v0 }
 0xc0d   :  { %v5146_v49 = vperm.slane %v5138_v5, %v8374_v31  ;;  %v5162_v51 = vsel %vm428_vm0, %v5122_v25, %v5161_v45  ;;  %v5179_v22 = vrot.slane %v5166_v38, 4  ;;  %v5250_v27 = vsel %vm428_vm0, %v5210_v28, %v5249_v15  ;;  %v7999_v60 = vpop.eup %7998 }
 0xc0e   :  { %v11425_v9 = vsel %vm428_vm0, %v5166_v38, %v5181_v37  ;;  %v5170_v52 = vperm.slane %v5162_v51, %v8374_v31  ;;  %v5258_v2 = vperm.slane %v5250_v27, %v8374_v31  ;;  %v5779_v35 = vmul.f32 %v7999_v60, %v11049_v34 }
 0xc0f   :  { %v5180_v30 = vsel %vm428_vm0, %v5179_v22, %v5142_v42  ;;  %v5273_v26 = vrot.slane %v5222_v46, 4  ;;  %v5271_v61 = vrot.slane %v5234_v39, 4  ;;  %v5185_v57 = vrot.slane %v5146_v49, 4 }
 0xc10   :  { %v5183_v33 = vrot.slane %v5170_v52, 4  ;;  %v5307_v1 = vpack.c.bf16 %v5180_v30, %v5180_v30  ;;  %v5795_v47 = vpack.c.bf16 %v5779_v35, %v5779_v35  ;;  %v5297_v50 = vrot.slane %v5258_v2, 4 }
 0xc11   :  { %v5274_v36 = vsel %vm428_vm0, %v5234_v39, %v5273_v26  ;;  %v5247_v19 = vrot.slane %v5210_v28, 4  ;;  %v5272_v40 = vsel %vm428_vm0, %v5271_v61, %v5222_v46  ;;  %v11445_v12 = vsel %vm428_vm0, %v5170_v52, %v5185_v57 }
 0xc12   :  { %v11433_v55 = vsel %vm428_vm0, %v5183_v33, %v5146_v49  ;;  %v5648_v43 = vpop.xlane.xlu2 %5647  ;;  %7379 = vmatmul.msk.bf16.vlgmr.msrb.gmra.mxu3 %vm2213_vm2, %v5795_v47  ;;  %v5967_v25 = vsel %vm2409_vm3, %v5307_v1, 0  ;;  %v5282_v34 = vperm.slane %v5274_v36, %v8374_v31  ;;  %v5682_v24 = vsub.f32 %v11031_v63, %v11360_v17 }
 0xc13   :  { %v5676_v18 = vsub.f32 %v11010_v11, %v5648_v43  ;;  %5976 = vmatpush.bf16.msrb.mxu3 %v5967_v25  ;;  %v5278_v11 = vperm.slane %v5272_v40, %v8374_v31  ;;  %v5248_v14 = vsel %vm428_vm0, %v5247_v19, %v5198_v20  ;;  %v5311_v40 = vpack.c.bf16 %v11433_v55, %v11433_v55 }
 0xc14   :  { %v5295_v42 = vrot.slane %v5282_v34, 4  ;;  %v11442_v44 = vsel %vm428_vm0, %v5282_v34, %v5297_v50  ;;  %v5713_v59 = vmul.f32 1.442695, %v5682_v24  ;;  %v5254_v38 = vperm.slane %v5248_v14, %v8374_v31 }
 0xc15   :  { %v5701_v8 = vmul.f32 1.442695, %v5676_v18  ;;  %v5291_v28 = vrot.slane %v5278_v11, 4 }
 0xc16   :  { %v11450_v23 = vsel %vm428_vm0, %v5295_v42, %v5258_v2  ;;  %v5293_v33 = vrot.slane %v5254_v38, 4 }
 0xc17   :  { %8000 = vpow2.f32 %v5701_v8  ;;  %v5292_v15 = vsel %vm428_vm0, %v5291_v28, %v5254_v38  ;;  %v5309_v8 = vpack.c.bf16 %v11425_v9, %v11425_v9 }
 0xc18   :  { %v5308_v39 = vpack.c.bf16 %v5292_v15, %v5292_v15  ;;  %v5294_v1 = vsel %vm428_vm0, %v5278_v11, %v5293_v33 }
 0xc19   :  { %v5310_v36 = vpack.c.bf16 %v5294_v1, %v5294_v1 }
 0xc1a   :  { %v5660_v37 = vpop.xlane.xlu2 %5659  ;;  %v5986_v60 = vsel %vm2409_vm3, %v5308_v39, 0 }
 0xc1b   :  { %v5680_v45 = vsub.f32 %v11017_v10, %v5660_v37  ;;  %v6024_v34 = vsel %vm2409_vm3, %v5310_v36, 0  ;;  %v5312_v37 = vpack.c.bf16 %v11450_v23, %v11450_v23 }
 0xc1d   :  { %v11456_v5 = vpop.eup %8000  ;;  %v5709_v63 = vmul.f32 1.442695, %v5680_v45  ;;  %v5314_v45 = vpack.c.bf16 %v11442_v44, %v11442_v44  ;;  %v6062_v15 = vsel %vm2409_vm3, %v5312_v37, 0  ;;  %v5313_v44 = vpack.c.bf16 %v11445_v12, %v11445_v12 }
 0xc1e   :  { %v5742_v17 = vsel %vm2213_vm2, %v11456_v5, 0.0 }
 0xc1f   :  { %5743 = vadd.xlane.f32.xlu2 %v5742_v17 }
 0xc20   :  { %v5720_v7 = vpop.xlane.xlu1 %5719 }
 0xc21   :  { %8002 = vrcp.f32 %v5720_v7  ;;  %v6043_v7 = vsel %vm2409_vm3, %v5311_v40, 0 }
 0xc22   :  { %8004 = vpow2.f32 %v5713_v59  ;;  %v5663_v49 = vpop.xlane.xlu2 %5662 }
 0xc23   :  { %8006 = vpow2.f32 %v5709_v63  ;;  %v5681_v10 = vsub.f32 %v11015_v41, %v5663_v49 }
 0xc25   :  { %v5711_v27 = vmul.f32 1.442695, %v5681_v10 }
 0xc27   :  { %v8003_v20 = vpop.eup %8002  ;;  %8008 = vpow2.f32 %v5711_v27 }
 0xc28   :  { %v5780_v46 = vmul.f32 %v8003_v20, %v11057_v48  ;;  %v11463_v51 = vpop.eup %8004 }
 0xc29   :  { %v11465_v52 = vpop.eup %8006  ;;  %v5760_v48 = vsel %vm2213_vm2, %v11463_v51, 0.0 }
 0xc2a   :  { %v5796_v22 = vpack.c.bf16 %v5780_v46, %v5780_v46  ;;  %v5754_v2 = vsel %vm2213_vm2, %v11465_v52, 0.0  ;;  %5761 = vadd.xlane.f32.xlu2 %v5760_v48  ;;  %v6081_v46 = vsel %vm2409_vm3, %v5313_v44, 0 }
 0xc2b   :  { %5755 = vadd.xlane.f32.xlu1 %v5754_v2 }
 0xc2c   :  { %7380 = vmatmul.msk.bf16.vlgmr.msra.gmra.mxu0 %vm2213_vm2, %v5796_v22 }
 0xc2d   :  { %5995 = vmatpush.bf16.msra.mxu0 %v5986_v60  ;;  %v11473_v41 = vpop.eup %8008 }
 0xc2e   :  { %v5757_v35 = vsel %vm2213_vm2, %v11473_v41, 0.0 }
 0xc2f   :  { %5758 = vadd.xlane.f32.xlu0 %v5757_v35 }
 0xc32   :  { %v5738_v43 = vpop.xlane.xlu1 %5737 }
 0xc49   :  { %v5726_v30 = vpop.xlane.xlu0 %5725 }
 0xc4a   :  { %8010 = vrcp.f32 %v5726_v30 }
 0xc50   :  { %v8011_v26 = vpop.eup %8010 }
 0xc51   :  { %v5729_v47 = vpop.xlane.xlu2 %5728  ;;  %v5782_v61 = vmul.f32 %v8011_v26, %v11143_v4  ;;  %v5723_v50 = vpop.xlane.xlu0 %5722 }
 0xc52   :  { %8012 = vrcp.f32 %v5729_v47 }
 0xc53   :  { %8014 = vrcp.f32 %v5723_v50  ;;  %v5798_v25 = vpack.c.bf16 %v5782_v61, %v5782_v61 }
 0xc54   :  { %8016 = vrcp.f32 %v5738_v43 }
 0xc55   :  { %7382 = vmatmul.msk.bf16.vlgmr.msra.gmra.mxu2 %vm2213_vm2, %v5798_v25 }
 0xc56   :  { %6033 = vmatpush.bf16.msra.mxu2 %v6024_v34 }
 0xc58   :  { %v8013_v57 = vpop.eup %8012 }
 0xc59   :  { %v8015_v18 = vpop.eup %8014  ;;  %v5783_v19 = vmul.f32 %v8013_v57, %v11182_v32  ;;  %v5732_v42 = vpop.xlane.xlu0 %5731  ;;  %v6005_v32 = vsel %vm2409_vm3, %v5309_v8, 0 }
 0xc5a   :  { %v5781_v4 = vmul.f32 %v8015_v18, %v11109_v58  ;;  %8018 = vrcp.f32 %v5732_v42  ;;  %v5735_v14 = vpop.xlane.xlu2 %5734  ;;  %v8017_v59 = vpop.eup %8016 }
 0xc5b   :  { %v5799_v24 = vpack.c.bf16 %v5783_v19, %v5783_v19  ;;  %8020 = vrcp.f32 %v5735_v14  ;;  %v5786_v58 = vmul.f32 %v8017_v59, %v11065_v16  ;;  %v6100_v16 = vsel %vm2409_vm3, %v5314_v45, 0 }
 0xc5c   :  { %v5797_v11 = vpack.c.bf16 %v5781_v4, %v5781_v4 }
 0xc5d   :  { %7383 = vmatmul.msk.bf16.vlgmr.msra.gmra.mxu3 %vm2213_vm2, %v5799_v24  ;;  %v5802_v38 = vpack.c.bf16 %v5786_v58, %v5786_v58 }
 0xc5e   :  { %7381 = vmatmul.msk.bf16.vlgmr.msrb.gmra.mxu1 %vm2213_vm2, %v5797_v11  ;;  %6052 = vmatpush.bf16.msra.mxu3 %v6043_v7 }
 0xc5f   :  { %6014 = vmatpush.bf16.msrb.mxu1 %v6005_v32 }
 0xc60   :  { %v8019_v55 = vpop.eup %8018 }
 0xc61   :  { %v5784_v9 = vmul.f32 %v8019_v55, %v11178_v21  ;;  %v5750_v63 = vpop.xlane.xlu0 %5749  ;;  %v8021_v17 = vpop.eup %8020 }
 0xc62   :  { %8022 = vrcp.f32 %v5750_v63  ;;  %v5785_v21 = vmul.f32 %v8021_v17, %v11125_v54 }
 0xc63   :  { %v5800_v28 = vpack.c.bf16 %v5784_v9, %v5784_v9 }
 0xc64   :  { %v5801_v23 = vpack.c.bf16 %v5785_v21, %v5785_v21 }
 0xc65   :  { %7384 = vmatmul.msk.bf16.vlgmr.msrb.gmra.mxu0 %vm2213_vm2, %v5800_v28  ;;  %7386 = vmatmul.msk.bf16.vlgmr.msrb.gmra.mxu2 %vm2213_vm2, %v5802_v38 }
 0xc66   :  { %6071 = vmatpush.bf16.msrb.mxu0 %v6062_v15  ;;  %6109 = vmatpush.bf16.msrb.mxu2 %v6100_v16 }
 0xc68   :  { %v8023_v20 = vpop.eup %8022 }
 0xc69   :  { %v5790_v49 = vmul.f32 %v8023_v20, %v11188_v62  ;;  %v5753_v60 = vpop.xlane.xlu0 %5752 }
 0xc6b   :  { %v5806_v10 = vpack.c.bf16 %v5790_v49, %v5790_v49 }
 0xc6e   :  { %7385 = vmatmul.msk.bf16.vlgmr.msra.gmra.mxu1 %vm2213_vm2, %v5801_v23 }
 0xc6f   :  { %6090 = vmatpush.bf16.msra.mxu1 %v6081_v46 }
 0xc75   :  { %v5741_v39 = vpop.xlane.xlu1 %5740  ;;  %7390 = vmatmul.msk.bf16.vlgmr.msra.gmra.mxu2 %vm2213_vm2, %v5806_v10 }
 0xc76   :  { %8024 = vrcp.f32 %v5741_v39 }
 0xc7c   :  { %v8025_v22 = vpop.eup %8024 }
 0xc7d   :  { %v5787_v54 = vmul.f32 %v8025_v22, %v11347_v29  ;;  %v5747_v27 = vpop.xlane.xlu1 %5746 }
 0xc7e   :  { %8026 = vrcp.f32 %v5747_v27 }
 0xc7f   :  { %v5803_v12 = vpack.c.bf16 %v5787_v54, %v5787_v54  ;;  %8028 = vrcp.f32 %v5753_v60 }
 0xc81   :  { %7387 = vmatmul.msk.bf16.vlgmr.msrb.gmra.mxu3 %vm2213_vm2, %v5803_v12 }
 0xc84   :  { %v8027_v2 = vpop.eup %8026 }
 0xc85   :  { %v5789_v48 = vmul.f32 %v8027_v2, %v11378_v53  ;;  %v8029_v30 = vpop.eup %8028 }
 0xc86   :  { %v5791_v62 = vmul.f32 %v8029_v30, %v11233_v3 }
 0xc87   :  { %v5805_v35 = vpack.c.bf16 %v5789_v48, %v5789_v48 }
 0xc88   :  { %v5807_v33 = vpack.c.bf16 %v5791_v62, %v5791_v62 }
 0xc89   :  { %7389 = vmatmul.msk.bf16.vlgmr.msrb.gmra.mxu1 %vm2213_vm2, %v5805_v35 }
 0xc91   :  { %7391 = vmatmul.msk.bf16.vlgmr.msra.gmra.mxu3 %vm2213_vm2, %v5807_v33 }
 0xc92   :  { %v5744_v29 = vpop.xlane.xlu2 %5743 }
 0xc93   :  { %8030 = vrcp.f32 %v5744_v29 }
 0xc95   :  { %v5826_v1 = vpop.f32.mrf.mxu3 }
 0xc96   :  { %v6117_v9 = vrot.slane %v5826_v1, 4 }
 0xc99   :  { %v8031_v26 = vpop.eup %8030 }
 0xc9a   :  { %v5788_v47 = vmul.f32 %v8031_v26, %v11456_v5 }
 0xc9c   :  { %v5804_v50 = vpack.c.bf16 %v5788_v47, %v5788_v47 }
 0xc9d   :  { %v5762_v61 = vpop.xlane.xlu2 %5761  ;;  %v5828_v53 = vpop.f32.mrf.mxu3 }
 0xc9e   :  { %v5756_v36 = vpop.xlane.xlu1 %5755  ;;  %8032 = vrcp.f32 %v5762_v61  ;;  %7388 = vmatmul.msk.bf16.vlgmr.msra.gmra.mxu0 %vm2213_vm2, %v5804_v50 }
 0xc9f   :  { %8034 = vrcp.f32 %v5756_v36 }
 0xca2   :  { %v5759_v25 = vpop.xlane.xlu0 %5758 }
 0xca3   :  { %8036 = vrcp.f32 %v5759_v25 }
 0xca4   :  { %v8033_v43 = vpop.eup %8032 }
 0xca5   :  { %v5794_v34 = vmul.f32 %v8033_v43, %v11463_v51  ;;  %v8035_v57 = vpop.eup %8034 }
 0xca6   :  { %v5792_v5 = vmul.f32 %v8035_v57, %v11465_v52 }
 0xca7   :  { %v5810_v18 = vpack.c.bf16 %v5794_v34, %v5794_v34 }
 0xca8   :  { %v5808_v42 = vpack.c.bf16 %v5792_v5, %v5792_v5 }
 0xca9   :  { %v5845_v3 = vpop.f32.mrf.mxu0  ;;  %7394 = vmatmul.msk.bf16.vlgmr.msrb.gmra.mxu2 %vm2213_vm2, %v5810_v18  ;;  %v8037_v19 = vpop.eup %8036 }
 0xcaa   :  { %v5793_v40 = vmul.f32 %v8037_v19, %v11473_v41  ;;  %v6229_v59 = vrot.slane %v5845_v3, 4 }
 0xcac   :  { %v5809_v8 = vpack.c.bf16 %v5793_v40, %v5793_v40 }
 0xcae   :  { %7392 = vmatmul.msk.bf16.vlgmr.msrb.gmra.mxu0 %vm2213_vm2, %v5808_v42  ;;  %7393 = vmatmul.msk.bf16.vlgmr.msra.gmra.mxu1 %vm2213_vm2, %v5809_v8 }
 0xcb1   :  { %v5847_v4 = vpop.f32.mrf.mxu0 }
 0xcd8   :  { %v5883_v24 = vpop.f32.mrf.mxu2 }
 0xcd9   :  { %v6241_v28 = vrot.slane %v5883_v24, 4 }
 0xcdb   :  { %v5864_v11 = vpop.f32.mrf.mxu1 }
 0xcdc   :  { %v6129_v15 = vrot.slane %v5864_v11, 4 }
 0xce0   :  { %v5902_v51 = vpop.f32.mrf.mxu3  ;;  %v5885_v14 = vpop.f32.mrf.mxu2 }
 0xce1   :  { %v6115_v7 = vrot.slane %v5902_v51, 4  ;;  %v6118_v45 = vsel %vm428_vm0, %v5902_v51, %v6117_v9 }
 0xce2   :  { %v5921_v58 = vpop.f32.mrf.mxu0  ;;  %v6126_v44 = vperm.slane %v6118_v45, %v8333_v0 }
 0xce3   :  { %v5866_v32 = vpop.f32.mrf.mxu1  ;;  %v6227_v55 = vrot.slane %v5921_v58, 4  ;;  %v6230_v52 = vsel %vm428_vm0, %v5921_v58, %v6229_v59  ;;  %v6116_v37 = vsel %vm428_vm0, %v6115_v7, %v5826_v1 }
 0xce4   :  { %v6238_v38 = vperm.slane %v6230_v52, %v8333_v0  ;;  %v6122_v21 = vperm.slane %v6116_v37, %v8333_v0  ;;  %v6177_v62 = vrot.slane %v6126_v44, 4 }
 0xce5   :  { %v6228_v41 = vsel %vm428_vm0, %v6227_v55, %v5845_v3 }
 0xce6   :  { %v6234_v63 = vperm.slane %v6228_v41, %v8333_v0  ;;  %v6289_v46 = vrot.slane %v6238_v38, 4  ;;  %v6165_v30 = vrot.slane %v6122_v21, 4 }
 0xce8   :  { %v5904_v17 = vpop.f32.mrf.mxu3  ;;  %v5959_v16 = vpop.f32.mrf.mxu2  ;;  %v6277_v22 = vrot.slane %v6234_v63, 4 }
 0xce9   :  { %v6239_v23 = vrot.slane %v5959_v16, 4  ;;  %v6242_v20 = vsel %vm428_vm0, %v5959_v16, %v6241_v28 }
 0xcea   :  { %v6250_v39 = vperm.slane %v6242_v20, %v8333_v0  ;;  %v5923_v49 = vpop.f32.mrf.mxu0 }
 0xceb   :  { %v5940_v10 = vpop.f32.mrf.mxu1  ;;  %v6240_v54 = vsel %vm428_vm0, %v6239_v23, %v5883_v24 }
 0xcec   :  { %v6127_v27 = vrot.slane %v5940_v10, 4  ;;  %v6130_v12 = vsel %vm428_vm0, %v5940_v10, %v6129_v15  ;;  %v6246_v60 = vperm.slane %v6240_v54, %v8333_v0  ;;  %v6287_v2 = vrot.slane %v6250_v39, 4 }
 0xced   :  { %v6290_v48 = vsel %vm428_vm0, %v6250_v39, %v6289_v46  ;;  %v6138_v35 = vperm.slane %v6130_v12, %v8333_v0 }
 0xcee   :  { %v6128_v33 = vsel %vm428_vm0, %v6127_v27, %v5864_v11  ;;  %v6275_v29 = vrot.slane %v6246_v60, 4  ;;  %v6278_v1 = vsel %vm428_vm0, %v6246_v60, %v6277_v22  ;;  %v6288_v26 = vsel %vm428_vm0, %v6287_v2, %v6238_v38 }
 0xcef   :  { %v6134_v47 = vperm.slane %v6128_v33, %v8333_v0  ;;  %v6175_v61 = vrot.slane %v6138_v35, 4  ;;  %v6178_v43 = vsel %vm428_vm0, %v6138_v35, %v6177_v62  ;;  %v11547_v51 = vperm.slane %v6290_v48, %v8374_v31 }
 0xcf0   :  { %v6276_v50 = vsel %vm428_vm0, %v6275_v29, %v6234_v63  ;;  %v5961_v25 = vpop.f32.mrf.mxu2  ;;  %v11550_v59 = vperm.slane %v6278_v1, %v8374_v31  ;;  %v11553_v7 = vperm.slane %v6288_v26, %v8374_v31  ;;  %v11565_v9 = vperm.slane %v6178_v43, %v8374_v31 }
 0xcf1   :  { %v6163_v36 = vrot.slane %v6134_v47, 4  ;;  %v6166_v53 = vsel %vm428_vm0, %v6134_v47, %v6165_v30  ;;  %v6176_v34 = vsel %vm428_vm0, %v6175_v61, %v6126_v44  ;;  %v11556_v58 = vperm.slane %v6276_v50, %v8374_v31 }
 0xcf2   :  { %v11559_v55 = vperm.slane %v6166_v53, %v8374_v31  ;;  %v6337_v37 = vrot.slane %v11547_v51, 4  ;;  %v6329_v45 = vrot.slane %v11550_v59, 4  ;;  %v6333_v38 = vrot.slane %v11553_v7, 4 }
 0xcf3   :  { %v6164_v3 = vsel %vm428_vm0, %v6163_v36, %v6122_v21  ;;  %v5942_v57 = vpop.f32.mrf.mxu1  ;;  %v6325_v17 = vrot.slane %v11556_v58, 4  ;;  %v11574_v15 = vperm.slane %v6176_v34, %v8374_v31  ;;  %v6225_v23 = vrot.slane %v11565_v9, 4 }
 0xcf4   :  { %v11562_v52 = vperm.slane %v6164_v3, %v8374_v31  ;;  %v6217_v16 = vrot.slane %v11559_v55, 4 }
 0xcf5   :  { %v6221_v30 = vrot.slane %v11574_v15, 4 }
 0xcf6   :  { %v6213_v44 = vrot.slane %v11562_v52, 4 }
 0xcf8   :  { %v6035_v18 = vpop.f32.mrf.mxu2 }
 0xcf9   :  { %v6265_v21 = vrot.slane %v6035_v18, 4 }
 0xd00   :  { %v6037_v40 = vpop.f32.mrf.mxu2 }
 0xd04   :  { %v5978_v5 = vpop.f32.mrf.mxu3 }
 0xd05   :  { %v6141_v41 = vrot.slane %v5978_v5, 4 }
 0xd06   :  { %v6016_v19 = vpop.f32.mrf.mxu1 }
 0xd07   :  { %v6153_v20 = vrot.slane %v6016_v19, 4 }
 0xd0c   :  { %v5980_v4 = vpop.f32.mrf.mxu3 }
 0xd0e   :  { %v6018_v42 = vpop.f32.mrf.mxu1 }
 0xd14   :  { %v6054_v8 = vpop.f32.mrf.mxu3 }
 0xd15   :  { %v6139_v32 = vrot.slane %v6054_v8, 4  ;;  %v6142_v63 = vsel %vm428_vm0, %v6054_v8, %v6141_v41 }
 0xd16   :  { %v11583_v10 = vperm.slane %v6142_v63, %v8333_v0 }
 0xd17   :  { %v6140_v28 = vsel %vm428_vm0, %v6139_v32, %v5978_v5 }
 0xd18   :  { %v11580_v49 = vperm.slane %v6140_v28, %v8333_v0  ;;  %v6201_v3 = vrot.slane %v11583_v10, 4 }
 0xd1a   :  { %v6189_v25 = vrot.slane %v11580_v49, 4 }
 0xd1b   :  { %v5997_v11 = vpop.f32.mrf.mxu0 }
 0xd1c   :  { %v6056_v24 = vpop.f32.mrf.mxu3  ;;  %v6253_v46 = vrot.slane %v5997_v11, 4 }
 0xd23   :  { %v5999_v14 = vpop.f32.mrf.mxu0 }
 0xd2b   :  { %v6073_v27 = vpop.f32.mrf.mxu0  ;;  %v6092_v12 = vpop.f32.mrf.mxu1 }
 0xd2c   :  { %v6111_v39 = vpop.f32.mrf.mxu2  ;;  %v6251_v2 = vrot.slane %v6073_v27, 4  ;;  %v6254_v48 = vsel %vm428_vm0, %v6073_v27, %v6253_v46  ;;  %v6151_v35 = vrot.slane %v6092_v12, 4  ;;  %v6154_v29 = vsel %vm428_vm0, %v6092_v12, %v6153_v20 }
 0xd2d   :  { %v6263_v22 = vrot.slane %v6111_v39, 4  ;;  %v6266_v54 = vsel %vm428_vm0, %v6111_v39, %v6265_v21  ;;  %v6262_v33 = vperm.slane %v6254_v48, %v8333_v0  ;;  %v6162_v43 = vperm.slane %v6154_v29, %v8333_v0 }
 0xd2e   :  { %v6274_v60 = vperm.slane %v6266_v54, %v8333_v0  ;;  %v6252_v47 = vsel %vm428_vm0, %v6251_v2, %v5997_v11  ;;  %v6152_v61 = vsel %vm428_vm0, %v6151_v35, %v6016_v19 }
 0xd2f   :  { %v6264_v62 = vsel %vm428_vm0, %v6263_v22, %v6035_v18  ;;  %v6258_v50 = vperm.slane %v6252_v47, %v8333_v0  ;;  %v6313_v36 = vrot.slane %v6262_v33, 4  ;;  %v6158_v53 = vperm.slane %v6152_v61, %v8333_v0 }
 0xd30   :  { %v6270_v1 = vperm.slane %v6264_v62, %v8333_v0  ;;  %v6311_v26 = vrot.slane %v6274_v60, 4  ;;  %v6199_v24 = vrot.slane %v6162_v43, 4 }
 0xd31   :  { %v6301_v18 = vrot.slane %v6258_v50, 4  ;;  %v6314_v5 = vsel %vm428_vm0, %v6274_v60, %v6313_v36  ;;  %v6187_v19 = vrot.slane %v6158_v53, 4  ;;  %v6190_v8 = vsel %vm428_vm0, %v6158_v53, %v6189_v25 }
 0xd32   :  { %v6299_v34 = vrot.slane %v6270_v1, 4  ;;  %v6312_v57 = vsel %vm428_vm0, %v6311_v26, %v6262_v33  ;;  %v6322_v42 = vperm.slane %v6314_v5, %v8374_v31  ;;  %v6200_v36 = vsel %vm428_vm0, %v6199_v24, %v11583_v10 }
 0xd33   :  { %v6318_v40 = vperm.slane %v6312_v57, %v8374_v31  ;;  %v6302_v14 = vsel %vm428_vm0, %v6270_v1, %v6301_v18  ;;  %v6075_v63 = vpop.f32.mrf.mxu0  ;;  %v6094_v21 = vpop.f32.mrf.mxu1  ;;  %v6188_v61 = vsel %vm428_vm0, %v6187_v19, %v11580_v49  ;;  %v6202_v25 = vsel %vm428_vm0, %v6162_v43, %v6201_v3 }
 0xd34   :  { %v6300_v4 = vsel %vm428_vm0, %v6299_v34, %v6258_v50  ;;  %v6113_v11 = vpop.f32.mrf.mxu2  ;;  %v6310_v20 = vperm.slane %v6302_v14, %v8374_v31  ;;  %v6335_v46 = vrot.slane %v6322_v42, 4  ;;  %v6338_v39 = vsel %vm428_vm0, %v6322_v42, %v6337_v37 }
 0xd35   :  { %v6306_v32 = vperm.slane %v6300_v4, %v8374_v31  ;;  %v6331_v41 = vrot.slane %v6318_v40, 4  ;;  %v6334_v28 = vsel %vm428_vm0, %v6318_v40, %v6333_v38  ;;  %v6487_v60 = vrot.slane %v6338_v39, 4 }
 0xd36   :  { %v6489_v22 = vrot.slane %v6334_v28, 4  ;;  %v6327_v2 = vrot.slane %v6310_v20, 4  ;;  %v11619_v38 = vsel %vm428_vm0, %v6310_v20, %v6329_v45  ;;  %v6336_v48 = vsel %vm428_vm0, %v6335_v46, %v11547_v51 }
 0xd37   :  { %v6323_v54 = vrot.slane %v6306_v32, 4  ;;  %v11612_v27 = vsel %vm428_vm0, %v6306_v32, %v6325_v17  ;;  %v6332_v12 = vsel %vm428_vm0, %v6331_v41, %v11553_v7  ;;  %v6463_v17 = vrot.slane %v11619_v38, 4 }
 0xd38   :  { %v6465_v37 = vrot.slane %v11612_v27, 4  ;;  %v6475_v62 = vrot.slane %v6336_v48, 4  ;;  %v6477_v7 = vrot.slane %v6332_v12, 4  ;;  %v11631_v33 = vsel %vm428_vm0, %v6327_v2, %v11550_v59 }
 0xd39   :  { %v11626_v35 = vsel %vm428_vm0, %v6323_v54, %v11556_v58  ;;  %v6488_v29 = vsel %vm428_vm0, %v6487_v60, %v6334_v28  ;;  %v11636_v51 = vsel %vm428_vm0, %v6338_v39, %v6489_v22  ;;  %v6451_v1 = vrot.slane %v11631_v33, 4 }
 0xd3a   :  { %v6453_v45 = vrot.slane %v11626_v35, 4  ;;  %v6476_v58 = vsel %vm428_vm0, %v6475_v62, %v6332_v12  ;;  %v11641_v26 = vsel %vm428_vm0, %v6336_v48, %v6477_v7  ;;  %v11644_v47 = vperm.slane %v6488_v29, %v8333_v0 }
 0xd3b   :  { %v11647_v59 = vperm.slane %v6476_v58, %v8333_v0  ;;  %v6198_v50 = vperm.slane %v6190_v8, %v8374_v31  ;;  %v6194_v53 = vperm.slane %v6188_v61, %v8374_v31  ;;  %v6206_v34 = vperm.slane %v6200_v36, %v8374_v31 }
 0xd3c   :  { %v6452_v57 = vsel %vm428_vm0, %v6451_v1, %v11626_v35  ;;  %v6210_v18 = vperm.slane %v6202_v25, %v8374_v31  ;;  %v6464_v48 = vsel %vm428_vm0, %v6463_v17, %v11612_v27  ;;  %v6523_v36 = vrot.slane %v11644_v47, 4 }
 0xd3d   :  { %v6215_v5 = vrot.slane %v6198_v50, 4  ;;  %v11663_v49 = vsel %vm428_vm0, %v6198_v50, %v6217_v16  ;;  %v6458_v40 = vperm.slane %v6452_v57, %v8333_v0  ;;  %v6211_v10 = vrot.slane %v6194_v53, 4 }
 0xd3e   :  { %v6219_v19 = vrot.slane %v6206_v34, 4  ;;  %v6222_v43 = vsel %vm428_vm0, %v6206_v34, %v6221_v30  ;;  %v6351_v3 = vrot.slane %v11663_v49, 4  ;;  %v6223_v42 = vrot.slane %v6210_v18, 4 }
 0xd3f   :  { %v11672_v4 = vsel %vm428_vm0, %v6215_v5, %v11559_v55  ;;  %v6226_v16 = vsel %vm428_vm0, %v6210_v18, %v6225_v23  ;;  %v6377_v8 = vrot.slane %v6222_v43, 4  ;;  %v6212_v30 = vsel %vm428_vm0, %v6211_v10, %v11562_v52 }
 0xd40   :  { %v6220_v24 = vsel %vm428_vm0, %v6219_v19, %v11574_v15  ;;  %v6339_v11 = vrot.slane %v11672_v4, 4  ;;  %v6375_v14 = vrot.slane %v6226_v16, 4  ;;  %v6224_v32 = vsel %vm428_vm0, %v6223_v42, %v11565_v9 }
 0xd41   :  { %v6365_v55 = vrot.slane %v6220_v24, 4  ;;  %v6378_v41 = vsel %vm428_vm0, %v6226_v16, %v6377_v8  ;;  %v6214_v23 = vsel %vm428_vm0, %v6194_v53, %v6213_v44  ;;  %v6363_v28 = vrot.slane %v6224_v32, 4 }
 0xd42   :  { %v6376_v63 = vsel %vm428_vm0, %v6375_v14, %v6222_v43  ;;  %v11690_v15 = vperm.slane %v6378_v41, %v8333_v0  ;;  %v6340_v21 = vsel %vm428_vm0, %v6339_v11, %v6212_v30  ;;  %v6341_v46 = vrot.slane %v6212_v30, 4 }
 0xd43   :  { %v6366_v20 = vsel %vm428_vm0, %v6224_v32, %v6365_v55  ;;  %v6346_v9 = vperm.slane %v6340_v21, %v8333_v0  ;;  %v6352_v39 = vsel %vm428_vm0, %v6351_v3, %v6214_v23  ;;  %v6364_v22 = vsel %vm428_vm0, %v6363_v28, %v6220_v24 }
 0xd44   :  { %v11698_v52 = vperm.slane %v6366_v20, %v8333_v0  ;;  %v6353_v44 = vrot.slane %v6214_v23, 4  ;;  %v6358_v54 = vperm.slane %v6352_v39, %v8333_v0  ;;  %v6370_v12 = vperm.slane %v6364_v22, %v8333_v0 }
 0xd45   :  { %v6382_v60 = vperm.slane %v6376_v63, %v8333_v0  ;;  %v6389_v2 = vrot.slane %v6346_v9, 4  ;;  %v6470_v62 = vperm.slane %v6464_v48, %v8333_v0  ;;  %v6501_v7 = vrot.slane %v6458_v40, 4 }
 0xd46   :  { %v6525_v29 = vrot.slane %v11647_v59, 4  ;;  %v6387_v1 = vrot.slane %v6358_v54, 4  ;;  %v6413_v61 = vrot.slane %v6370_v12, 4  ;;  %v6524_v42 = vsel %vm428_vm0, %v6523_v36, %v11647_v59 }
 0xd47   :  { %v6390_v58 = vsel %vm428_vm0, %v6358_v54, %v6389_v2  ;;  %v6411_v50 = vrot.slane %v6382_v60, 4  ;;  %v6502_v25 = vsel %vm428_vm0, %v6470_v62, %v6501_v7  ;;  %v6499_v3 = vrot.slane %v6470_v62, 4 }
 0xd48   :  { %v6398_v53 = vperm.slane %v6390_v58, %v8374_v31  ;;  %v6526_v34 = vsel %vm428_vm0, %v11644_v47, %v6525_v29  ;;  %v6388_v17 = vsel %vm428_vm0, %v6387_v1, %v6346_v9  ;;  %v6414_v57 = vsel %vm428_vm0, %v6382_v60, %v6413_v61 }
 0xd49   :  { %v6510_v18 = vperm.slane %v6502_v25, %v8374_v31  ;;  %v6534_v5 = vperm.slane %v6526_v34, %v8374_v31  ;;  %v11718_v10 = vperm.slane %v6388_v17, %v8374_v31  ;;  %v6422_v19 = vperm.slane %v6414_v57, %v8374_v31 }
 0xd4a   :  { %v6412_v43 = vsel %vm428_vm0, %v6411_v50, %v6370_v12  ;;  %v11729_v24 = vperm.slane %v6524_v42, %v8374_v31  ;;  %v6500_v14 = vsel %vm428_vm0, %v6499_v3, %v6458_v40  ;;  %v6441_v30 = vrot.slane %v6398_v53, 4 }
 0xd4b   :  { %v6551_v47 = vrot.slane %v6534_v5, 4  ;;  %v11725_v16 = vperm.slane %v6412_v43, %v8374_v31  ;;  %v6437_v8 = vrot.slane %v11718_v10, 4  ;;  %v6439_v11 = vrot.slane %v6422_v19, 4 }
 0xd4c   :  { %v6553_v32 = vrot.slane %v6510_v18, 4  ;;  %v6506_v23 = vperm.slane %v6500_v14, %v8374_v31  ;;  %v6547_v63 = vrot.slane %v11729_v24, 4  ;;  %v6442_v21 = vsel %vm428_vm0, %v6422_v19, %v6441_v30 }
 0xd4d   :  { %v6552_v55 = vsel %vm428_vm0, %v6551_v47, %v6510_v18  ;;  %v6435_v41 = vrot.slane %v11725_v16, 4  ;;  %v6438_v59 = vsel %vm428_vm0, %v11725_v16, %v6437_v8  ;;  %v6440_v28 = vsel %vm428_vm0, %v6439_v11, %v6398_v53  ;;  %v7586_v16 = vld [vmem:[%s11909_s6 + $0x10] sm:$0xff] }
 0xd4e   :  { %v6554_v20 = vsel %vm428_vm0, %v6534_v5, %v6553_v32  ;;  %v7858_v40 = vpack.i.bf16 %v6552_v55, %v6440_v28  ;;  %v6549_v9 = vrot.slane %v6506_v23, 4  ;;  %v6342_v22 = vsel %vm428_vm0, %v11672_v4, %v6341_v46 }
 0xd4f   :  { %v7868_v39 = vpack.i.bf16 %v6554_v20, %v6442_v21  ;;  %v6350_v54 = vperm.slane %v6342_v22, %v8333_v0  ;;  %v6354_v12 = vsel %vm428_vm0, %v11663_v49, %v6353_v44  ;;  %v6425_v60 = vrot.slane %v11698_v52, 4 }
 0xd50   :  { %v6454_v2 = vsel %vm428_vm0, %v11631_v33, %v6453_v45  ;;  %7859 = vrot.lane.b32.xlu1 %v7858_v40, %s12005_s1  ;;  %v6550_v48 = vsel %vm428_vm0, %v11729_v24, %v6549_v9  ;;  %v6362_v4 = vperm.slane %v6354_v12, %v8333_v0  ;;  %v6423_v49 = vrot.slane %v11690_v15, 4 }
 0xd51   :  { %7869 = vrot.lane.b32.xlu0 %v7868_v39, %s12006_s2  ;;  %v6462_v46 = vperm.slane %v6454_v2, %v8333_v0  ;;  %v7853_v44 = vpack.i.bf16 %v6550_v48, %v6438_v59  ;;  %v6401_v62 = vrot.slane %v6350_v54, 4  ;;  %v6426_v35 = vsel %vm428_vm0, %v11690_v15, %v6425_v60 }
 0xd52   :  { %v6466_v33 = vsel %vm428_vm0, %v11619_v38, %v6465_v37  ;;  %v6434_v45 = vperm.slane %v6426_v35, %v8374_v31  ;;  %v6486_v29 = vperm.slane %v11641_v26, %v8333_v0  ;;  %v6498_v1 = vperm.slane %v11636_v51, %v8333_v0 }
 0xd53   :  { %v6474_v7 = vperm.slane %v6466_v33, %v8333_v0  ;;  %7854 = vrot.lane.b32.xlu2 %v7853_v44, %s12007_s0  ;;  %v6402_v58 = vsel %vm428_vm0, %v6362_v4, %v6401_v62  ;;  %v6513_v15 = vrot.slane %v6462_v46, 4  ;;  %v6399_v61 = vrot.slane %v6362_v4, 4 }
 0xd54   :  { %v6424_v27 = vsel %vm428_vm0, %v6423_v49, %v11698_v52  ;;  %v6410_v38 = vperm.slane %v6402_v58, %v8374_v31  ;;  %v6447_v37 = vrot.slane %v6434_v45, 4  ;;  %v6537_v50 = vrot.slane %v6486_v29, 4 }
 0xd55   :  { %v6430_v36 = vperm.slane %v6424_v27, %v8374_v31  ;;  %v6514_v26 = vsel %vm428_vm0, %v6474_v7, %v6513_v15  ;;  %v6400_v53 = vsel %vm428_vm0, %v6399_v61, %v6350_v54  ;;  %v6511_v0 = vrot.slane %v6474_v7, 4 }
 0xd56   :  { %v6535_v51 = vrot.slane %v6498_v1, 4  ;;  %v6448_v25 = vsel %vm428_vm0, %v6447_v37, %v6410_v38  ;;  %v6522_v34 = vperm.slane %v6514_v26, %v8374_v31  ;;  %v6538_v17 = vsel %vm428_vm0, %v6498_v1, %v6537_v50 }
 0xd57   :  { %v6406_v52 = vperm.slane %v6400_v53, %v8374_v31  ;;  %v6546_v57 = vperm.slane %v6538_v17, %v8374_v31  ;;  %v6443_v18 = vrot.slane %v6430_v36, 4  ;;  %v6512_v5 = vsel %vm428_vm0, %v6511_v0, %v6462_v46 }
 0xd58   :  { %v6536_v19 = vsel %vm428_vm0, %v6535_v51, %v6486_v29  ;;  %v6518_v43 = vperm.slane %v6512_v5, %v8374_v31  ;;  %v6449_v47 = vrot.slane %v6410_v38, 4  ;;  %v6561_v11 = vrot.slane %v6522_v34, 4  ;;  %v7895_v5 = vld [vmem:[%s11910_s7 + $0x1] ss:$0 sm:$0xff] }
 0xd59   :  { %v6542_v3 = vperm.slane %v6536_v19, %v8374_v31  ;;  %v6445_v42 = vrot.slane %v6406_v52, 4  ;;  %v6559_v8 = vrot.slane %v6546_v57, 4  ;;  %v6444_v24 = vsel %vm428_vm0, %v6443_v18, %v6406_v52 }
 0xd5a   :  { %v6548_v14 = vsel %vm428_vm0, %v6547_v63, %v6506_v23  ;;  %v6557_v55 = vrot.slane %v6518_v43, 4  ;;  %v6450_v59 = vsel %vm428_vm0, %v6434_v45, %v6449_v47  ;;  %v6562_v21 = vsel %vm428_vm0, %v6546_v57, %v6561_v11 }
 0xd5b   :  { %v6555_v30 = vrot.slane %v6542_v3, 4  ;;  %v6446_v32 = vsel %vm428_vm0, %v6430_v36, %v6445_v42  ;;  %v6560_v28 = vsel %vm428_vm0, %v6559_v8, %v6522_v34  ;;  %v6436_v31 = vsel %vm428_vm0, %v6435_v41, %v11718_v10  ;;  %v7587_v10 = vld [vmem:[%s11909_s6 + $0x18] sm:$0xff]  ;;  %s8089_s6 = smov [#allocation2]  }
 0xd5c   :  { %v7878_v20 = vpack.i.bf16 %v6560_v28, %v6448_v25  ;;  %v6558_v23 = vsel %vm428_vm0, %v6542_v3, %v6557_v55  ;;  %v7883_v63 = vpack.i.bf16 %v6562_v21, %v6450_v59  ;;  %6665 = vmatpush.bf16.msrb.mxu3 %v7587_v10  ;;  %s6967_s30 = sshll.u32 %s8089_s6, 4  ;;  %s6968_s30 = int_to_ptr.vmem [resolvable:$true] %s6967_s30 }
 0xd5d   :  { %v6556_v40 = vsel %vm428_vm0, %v6555_v30, %v6518_v43  ;;  %v7873_v39 = vpack.i.bf16 %v6558_v23, %v6446_v32  ;;  %v7594_v23 = vld [vmem:[%s11913_s10 + $0x70] sm:$0xff] }
 0xd5e   :  { %v7863_v9 = vpack.i.bf16 %v6556_v40, %v6444_v24  ;;  %7879 = vrot.lane.b32.xlu1 %v7878_v20, %s12008_s17 }
 0xd5f   :  { %7874 = vrot.lane.b32.xlu0 %v7873_v39, %s12010_s19 }
 0xd60   :  { %7864 = vrot.lane.b32.xlu2 %v7863_v9, %s12009_s18  ;;  %6666 = vmatpush.bf16.msrb.mxu3 %v7586_v16  ;;  %v7603_v9 = vld [vmem:[%s11915_s12 + $0x78] sm:$0xff]  ;;  %v7592_v16 = vld [vmem:[%s11913_s10 + $0x60] sm:$0xff] }
 0xd61   :  { %6889 = vmatpush.bf16.msrb.mxu1 %v7603_v9 }
 0xd68   :  { %7884 = vrot.lane.b32.xlu2 %v7883_v63, %s12011_s20  ;;  %v7593_v63 = vld [vmem:[%s11913_s10 + $0x68] sm:$0xff] }
 0xdad   :  { %v7855_v41 = vpop.permute.xlu2 %7854 }
 0xdae   :  { %v7857_v60 = vunpack.i.h.bf16 %v7855_v41  ;;  %v7856_v2 = vunpack.i.l.bf16 %v7855_v41  ;;  %v7602_v41 = vld [vmem:[%s11915_s12 + $0x70] sm:$0xff] }
 0xdaf   :  { %6890 = vmatpush.bf16.msrb.mxu1 %v7602_v41 }
 0xdb0   :  { %v6620_v46 = vsel %vm1908_vm1, %v6548_v14, %v7857_v60  ;;  %v6619_v49 = vsel %vm1908_vm1, %v6436_v31, %v7856_v2  ;;  %v7591_v60 = vld [vmem:[%s11913_s10 + $0x58] sm:$0xff]  ;;  %v7601_v2 = vld [vmem:[%s11915_s12 + $0x68] sm:$0xff] }
 0xdb3   :  { %6891 = vmatpush.bf16.msrb.mxu1 %v7601_v2 }
 0xdba   :  { %v7865_v54 = vpop.permute.xlu2 %7864 }
 0xdbb   :  { %v7867_v1 = vunpack.i.h.bf16 %v7865_v54  ;;  %v7866_v58 = vunpack.i.l.bf16 %v7865_v54 }
 0xdc2   :  { %v7860_v22 = vpop.permute.xlu1 %7859  ;;  %v7885_v15 = vpop.permute.xlu2 %7884 }
 0xdc3   :  { %v7870_v12 = vpop.permute.xlu0 %7869  ;;  %v7862_v48 = vunpack.i.h.bf16 %v7860_v22  ;;  %v7861_v4 = vunpack.i.l.bf16 %v7860_v22  ;;  %v7887_v53 = vunpack.i.h.bf16 %v7885_v15  ;;  %v7886_v0 = vunpack.i.l.bf16 %v7885_v15 }
 0xdc4   :  { %v7872_v44 = vunpack.i.h.bf16 %v7870_v12  ;;  %v7871_v62 = vunpack.i.l.bf16 %v7870_v12 }
 0xdc5   :  { %v6621_v35 = vsel %vm2213_vm2, %v6619_v49, %v7861_v4  ;;  %v6622_v33 = vsel %vm2213_vm2, %v6620_v46, %v7862_v48  ;;  %v7590_v46 = vld [vmem:[%s11913_s10 + $0x50] sm:$0xff]  ;;  %v7600_v49 = vld [vmem:[%s11915_s12 + $0x60] sm:$0xff] }
 0xdc6   :  { %v6623_v45 = vsel %vm3219_vm4, %v6621_v35, %v7871_v62  ;;  %v6624_v7 = vsel %vm3219_vm4, %v6622_v33, %v7872_v44  ;;  %6892 = vmatpush.bf16.msrb.mxu1 %v7600_v49 }
 0xdc7   :  { %v6625_v36 = vsel %vm3222_vm5, %v6623_v45, %v7866_v58  ;;  %v6626_v26 = vsel %vm3222_vm5, %v6624_v7, %v7867_v1  ;;  %v7589_v45 = vld [vmem:[%s11913_s10 + $0x48] sm:$0xff]  ;;  %v7588_v58 = vld [vmem:[%s11913_s10 + $0x40] sm:$0xff] }
 0xdd0   :  { %v7880_v29 = vpop.permute.xlu1 %7879 }
 0xdd1   :  { %v7875_v61 = vpop.permute.xlu0 %7874  ;;  %v7882_v37 = vunpack.i.h.bf16 %v7880_v29  ;;  %v7881_v50 = vunpack.i.l.bf16 %v7880_v29 }
 0xdd2   :  { %v7877_v27 = vunpack.i.h.bf16 %v7875_v61  ;;  %v7876_v38 = vunpack.i.l.bf16 %v7875_v61  ;;  %v7896_v61 = vld [vmem:[%s11911_s8 + $0x1] ss:$0 sm:$0xff] }
 0xdd4   :  { %v6627_v51 = vsel %vm3225_vm6, %v6625_v36, %v7876_v38  ;;  %v6628_v25 = vsel %vm3225_vm6, %v6626_v26, %v7877_v27 }
 0xdd5   :  { %v6629_v34 = vsel %vm3228_vm7, %v6627_v51, %v7881_v50  ;;  %v6630_v17 = vsel %vm3228_vm7, %v6628_v25, %v7882_v37  ;;  %v7897_v50 = vld [vmem:[%s11912_s9 + $0x1] ss:$0 sm:$0xff] }
 0xdd6   :  { %v6631_v52 = vsel %vm3231_vm8, %v6629_v34, %v7886_v0  ;;  %v6632_v57 = vsel %vm3231_vm8, %v6630_v17, %v7887_v53  ;;  %v7599_v34 = vld [vmem:[%s11915_s12 + $0x58] sm:$0xff]  ;;  %v7598_v17 = vld [vmem:[%s11915_s12 + $0x50] sm:$0xff] }
 0xdd7   :  { %v6633_v18 = vpack.c.bf16 %v6632_v57, %v6631_v52  ;;  %6893 = vmatpush.bf16.msrb.mxu1 %v7599_v34  ;;  %v7597_v52 = vld [vmem:[%s11915_s12 + $0x48] sm:$0xff]  ;;  %v7596_v57 = vld [vmem:[%s11915_s12 + $0x40] sm:$0xff] }
 0xdd9   :  { %7408 = vmatmul.msk.bf16.vlgmr.msrb.gmra.mxu3 %vm3255_vm9, %v6633_v18 }
 0xddb   :  { %6894 = vmatpush.bf16.msrb.mxu1 %v7598_v17 }
 0xddf   :  { %6895 = vmatpush.bf16.msrb.mxu1 %v7597_v52 }
 0xde3   :  { %6896 = vmatpush.bf16.msrb.mxu1 %v7596_v57 }
 0xe5c   :  { %v6668_v19 = vpop.f32.mrf.mxu3 }
 0xe5d   :  { %v6669_v43 = vadd.f32 %v7895_v5, %v6668_v19 }
 0xe5f   :  { %v6673_v3 = vadd.f32 %v6669_v43, %v10183_v6  ;;  %v7595_v6 = vld [vmem:[%s11913_s10 + $0x78] sm:$0xff] }
 0xe60   :  { %6802 = vmatpush.bf16.msra.mxu0 %v7595_v6 }
 0xe61   :  { %6679 = vadd.xlane.f32.xlu0 %v6673_v3 }
 0xe64   :  { %v6670_v42 = vpop.f32.mrf.mxu3  ;;  %6803 = vmatpush.bf16.msra.mxu0 %v7594_v23 }
 0xe65   :  { %v6671_v47 = vadd.f32 %v7895_v5, %v6670_v42  ;;  %v7898_v5 = vld [vmem:[%s11914_s11 + $0x1] ss:$0 sm:$0xff] }
 0xe67   :  { %v6674_v8 = vadd.f32 %v6671_v47, %v10185_v56 }
 0xe68   :  { %6804 = vmatpush.bf16.msra.mxu0 %v7593_v63 }
 0xe69   :  { %6681 = vadd.xlane.f32.xlu1 %v6674_v8 }
 0xe6c   :  { %6805 = vmatpush.bf16.msra.mxu0 %v7592_v16 }
 0xe70   :  { %6806 = vmatpush.bf16.msra.mxu0 %v7591_v60 }
 0xe74   :  { %6807 = vmatpush.bf16.msra.mxu0 %v7590_v46 }
 0xe78   :  { %6808 = vmatpush.bf16.msra.mxu0 %v7589_v45  ;;  %v7901_v45 = vld [vmem:[%s11918_s15 + $0x1] ss:$0 sm:$0xff]  ;;  %s8090_s15 = smov 128  }
 0xe7c   :  { %6809 = vmatpush.bf16.msra.mxu0 %v7588_v58 }
 0xed4   :  { %v6680_v24 = vpop.xlane.xlu0 %6679 }
 0xed5   :  { %v6683_v11 = vmul.f32 0.03125, %v6680_v24  ;;  %v7899_v24 = vld [vmem:[%s11916_s13 + $0x1] ss:$0 sm:$0xff] }
 0xed7   :  { %v6685_v14 = vsub.f32 %v6673_v3, %v6683_v11 }
 0xed9   :  { %v6687_v30 = vmul.f32 %v10029_v13, %v6685_v14 }
 0xedb   :  { %v6689_v32 = vmul.f32 %v6687_v30, %v6687_v30 }
 0xedc   :  { %v6682_v55 = vpop.xlane.xlu1 %6681 }
 0xedd   :  { %v6684_v59 = vmul.f32 0.03125, %v6682_v55  ;;  %6691 = vadd.xlane.f32.xlu2 %v6689_v32 }
 0xedf   :  { %v6686_v28 = vsub.f32 %v6674_v8, %v6684_v59 }
 0xee1   :  { %v6688_v21 = vmul.f32 %v10029_v13, %v6686_v28 }
 0xee3   :  { %v6690_v31 = vmul.f32 %v6688_v21, %v6688_v21 }
 0xee5   :  { %6693 = vadd.xlane.f32.xlu0 %v6690_v31 }
 0xf50   :  { %v6692_v56 = vpop.xlane.xlu2 %6691 }
 0xf51   :  { %v6695_v20 = vmul.f32 0.03125, %v6692_v56 }
 0xf53   :  { %v6697_v40 = vadd.f32 1e-05, %v6695_v20 }
 0xf55   :  { %8038 = vrsqrt.f32 %v6697_v40  ;;  %vm6705_vm1 = vweird.f32 %v6697_v40 }
 0xf58   :  { %v6694_v39 = vpop.xlane.xlu0 %6693 }
 0xf59   :  { %v6696_v10 = vmul.f32 0.03125, %v6694_v39 }
 0xf5b   :  { %v8039_v22 = vpop.eup %8038  ;;  %v6698_v54 = vadd.f32 1e-05, %v6696_v10 }
 0xf5c   :  { %v6700_v12 = vmul.f32 %v8039_v22, %v6697_v40  ;;  %vm6706_vm0 = vweird.f32 %v8039_v22 }
 0xf5d   :  { %8040 = vrsqrt.f32 %v6698_v54  ;;  %vm6707_vm2 = vmor %vm6705_vm1, %vm6706_vm0  ;;  %vm6715_vm4 = vweird.f32 %v6698_v54 }
 0xf5e   :  { %v6701_v48 = vmul.f32 %v8039_v22, %v6700_v12 }
 0xf60   :  { %v6702_v4 = vmul.f32 0.5, %v6701_v48 }
 0xf62   :  { %v6703_v44 = vsub.f32 1.5, %v6702_v4 }
 0xf63   :  { %v8041_v62 = vpop.eup %8040 }
 0xf64   :  { %v6704_v35 = vmul.f32 %v8039_v22, %v6703_v44  ;;  %v6710_v33 = vmul.f32 %v8041_v62, %v6698_v54  ;;  %vm6716_vm3 = vweird.f32 %v8041_v62  ;;  %v7900_v44 = vld [vmem:[%s11917_s14 + $0x1] ss:$0 sm:$0xff] }
 0xf65   :  { %vm6717_vm5 = vmor %vm6715_vm4, %vm6716_vm3 }
 0xf66   :  { %v6711_v7 = vmul.f32 %v8041_v62, %v6710_v33  ;;  %v6708_v29 = vsel %vm6707_vm2, %v8039_v22, %v6704_v35 }
 0xf67   :  { %v6719_v27 = vmul.f32 %v6708_v29, %v6687_v30 }
 0xf68   :  { %v6712_v1 = vmul.f32 0.5, %v6711_v7 }
 0xf69   :  { %v6724_v36 = vmul.f32 %v7896_v61, %v6719_v27 }
 0xf6a   :  { %v6713_v15 = vsub.f32 1.5, %v6712_v1 }
 0xf6b   :  { %v6729_v0 = vadd.f32 %v7897_v50, %v6724_v36 }
 0xf6c   :  { %v6714_v38 = vmul.f32 %v8041_v62, %v6713_v15 }
 0xf6e   :  { %v6718_v37 = vsel %vm6717_vm5, %v8041_v62, %v6714_v38 }
 0xf6f   :  { %v6720_v26 = vmul.f32 %v6718_v37, %v6688_v21 }
 0xf71   :  { %v6725_v53 = vmul.f32 %v7896_v61, %v6720_v26 }
 0xf73   :  { %v6730_v51 = vadd.f32 %v7897_v50, %v6725_v53 }
 0xf75   :  { %v6731_v25 = vpack.c.bf16 %v6730_v51, %v6729_v0 }
 0xf77   :  { %6810 = vmatmul.bf16.vlgmr.msra.gmra.mxu0 %v6731_v25 }
 0xff4   :  { %v6811_v18 = vpop.f32.mrf.mxu0 }
 0xff5   :  { %v6812_v19 = vadd.f32 %v7898_v5, %v6811_v18 }
 0xff7   :  { %v6816_v42 = vmax.f32 %v6812_v19, 0.0 }
 0xffc   :  { %v6813_v43 = vpop.f32.mrf.mxu0 }
 0xffd   :  { %v6814_v3 = vadd.f32 %v7898_v5, %v6813_v43 }
 0xfff   :  { %v6817_v47 = vmax.f32 %v6814_v3, 0.0 }
0x1001   :  { %v6818_v8 = vpack.c.bf16 %v6817_v47, %v6816_v42 }
0x1003   :  { %6897 = vmatmul.bf16.vlgmr.msrb.gmra.mxu1 %v6818_v8 }
0x1080   :  { %v6898_v11 = vpop.f32.mrf.mxu1 }
0x1081   :  { %v6899_v14 = vadd.f32 %v7899_v24, %v6898_v11 }
0x1083   :  { %v6903_v30 = vadd.f32 %v6899_v14, %v6729_v0 }
0x1085   :  { %6909 = vadd.xlane.f32.xlu1 %v6903_v30 }
0x1088   :  { %v6900_v32 = vpop.f32.mrf.mxu1 }
0x1089   :  { %v6901_v55 = vadd.f32 %v7899_v24, %v6900_v32 }
0x108b   :  { %v6904_v59 = vadd.f32 %v6901_v55, %v6730_v51 }
0x108d   :  { %6911 = vadd.xlane.f32.xlu2 %v6904_v59 }
0x10f8   :  { %v6910_v28 = vpop.xlane.xlu1 %6909 }
0x10f9   :  { %v6913_v21 = vmul.f32 0.03125, %v6910_v28 }
0x10fb   :  { %v6915_v31 = vsub.f32 %v6903_v30, %v6913_v21 }
0x10fd   :  { %v6917_v6 = vmul.f32 %v10029_v13, %v6915_v31 }
0x10ff   :  { %v6919_v56 = vmul.f32 %v6917_v6, %v6917_v6 }
0x1100   :  { %v6912_v20 = vpop.xlane.xlu2 %6911 }
0x1101   :  { %v6914_v40 = vmul.f32 0.03125, %v6912_v20  ;;  %6921 = vadd.xlane.f32.xlu0 %v6919_v56 }
0x1103   :  { %v6916_v23 = vsub.f32 %v6904_v59, %v6914_v40 }
0x1105   :  { %v6918_v63 = vmul.f32 %v10029_v13, %v6916_v23 }
0x1107   :  { %v6920_v9 = vmul.f32 %v6918_v63, %v6918_v63 }
0x1109   :  { %6923 = vadd.xlane.f32.xlu1 %v6920_v9 }
0x1174   :  { %v6922_v39 = vpop.xlane.xlu0 %6921 }
0x1175   :  { %v6925_v10 = vmul.f32 0.03125, %v6922_v39 }
0x1177   :  { %v6927_v16 = vadd.f32 1e-05, %v6925_v10 }
0x1179   :  { %8042 = vrsqrt.f32 %v6927_v16  ;;  %vm6935_vm7 = vweird.f32 %v6927_v16 }
0x117c   :  { %v6924_v41 = vpop.xlane.xlu1 %6923 }
0x117d   :  { %v6926_v22 = vmul.f32 0.03125, %v6924_v41 }
0x117f   :  { %v8043_v54 = vpop.eup %8042  ;;  %v6928_v12 = vadd.f32 1e-05, %v6926_v22 }
0x1180   :  { %v6930_v60 = vmul.f32 %v8043_v54, %v6927_v16  ;;  %vm6936_vm6 = vweird.f32 %v8043_v54 }
0x1181   :  { %8044 = vrsqrt.f32 %v6928_v12  ;;  %vm6937_vm8 = vmor %vm6935_vm7, %vm6936_vm6  ;;  %vm6945_vm11 = vweird.f32 %v6928_v12 }
0x1182   :  { %v6931_v2 = vmul.f32 %v8043_v54, %v6930_v60 }
0x1184   :  { %v6932_v48 = vmul.f32 0.5, %v6931_v2 }
0x1186   :  { %v6933_v4 = vsub.f32 1.5, %v6932_v48 }
0x1187   :  { %v8045_v46 = vpop.eup %8044 }
0x1188   :  { %v6934_v49 = vmul.f32 %v8043_v54, %v6933_v4  ;;  %v6940_v13 = vmul.f32 %v8045_v46, %v6928_v12  ;;  %vm6946_vm9 = vweird.f32 %v8045_v46 }
0x1189   :  { %vm6947_vm12 = vmor %vm6945_vm11, %vm6946_vm9 }
0x118a   :  { %v6938_v62 = vsel %vm6937_vm8, %v8043_v54, %v6934_v49  ;;  %v6941_v35 = vmul.f32 %v8045_v46, %v6940_v13 }
0x118b   :  { %v6949_v33 = vmul.f32 %v6938_v62, %v6917_v6 }
0x118c   :  { %v6942_v7 = vmul.f32 0.5, %v6941_v35 }
0x118d   :  { %v6954_v29 = vmul.f32 %v7900_v44, %v6949_v33 }
0x118e   :  { %v6943_v1 = vsub.f32 1.5, %v6942_v7 }
0x118f   :  { %v6959_v58 = vadd.f32 %v7901_v45, %v6954_v29 }
0x1190   :  { %v6944_v15 = vmul.f32 %v8045_v46, %v6943_v1 }
0x1191   :  { %6961 = vst [vmem:[#allocation2] sm:$0xff] %v6959_v58 }
0x1192   :  { %v6948_v61 = vsel %vm6947_vm12, %v8045_v46, %v6944_v15 }
0x1193   :  { %v6950_v27 = vmul.f32 %v6948_v61, %v6918_v63 }
0x1195   :  { %v6955_v38 = vmul.f32 %v7900_v44, %v6950_v27 }
0x1197   :  { %v6960_v37 = vadd.f32 %v7901_v45, %v6955_v38 }
0x1199   :  { %6962 = vst [vmem:[#allocation2 + $0x8] sm:$0xff] %v6960_v37 }
0x119a   :  { %6975 = dma.vmem_to_hbm [thread:$0]  %s6968_s30, 256, %s6970_s29, [#allocation3], %s8090_s15, %s8090_s15, %s12005_s1  }
0x119b   :  { %8070 = dma.done.wait [#allocation3], 256  }
0x119c   :  { %8071 = vsyncadd [#allocation3], 4294967040 }
0x119d   :  { %6980 = vsyncpa [#allocation3], 1 }

</bundles_post_ra>
